<compile_context>
chip_gen: v7x
topology: tpu7x:2x2x1
jax: 0.10.0
libtpu: 0.0.40
codegen_flags: <defaults>
</compile_context>

<pallas_src>
import jax
import jax.numpy as jnp
from jax.experimental import pallas as pl
from jax.experimental.pallas import tpu as pltpu


def generator_kernel(z_ref,
                     w1_ref, b1_ref,
                     w2_ref, b2_ref,
                     w3_ref, b3_ref,
                     w4_ref, b4_ref,
                     out_ref):
    # Layers 1-3: full hidden widths, recomputed per grid step (cheap, hides
    # under the streaming w4 DMA). bf16 operands, f32 accumulation.
    h = jnp.dot(z_ref[...], w1_ref[...], preferred_element_type=jnp.float32)
    h = jnp.maximum(h + b1_ref[...], 0.0).astype(jnp.bfloat16)
    h = jnp.dot(h, w2_ref[...], preferred_element_type=jnp.float32)
    h = jnp.maximum(h + b2_ref[...], 0.0).astype(jnp.bfloat16)
    h = jnp.dot(h, w3_ref[...], preferred_element_type=jnp.float32)
    h = jnp.maximum(h + b3_ref[...], 0.0).astype(jnp.bfloat16)
    # Layer 4: only the current tn-wide slice of w4 / b4 / out.
    h = jnp.dot(h, w4_ref[...], preferred_element_type=jnp.float32)
    out_ref[...] = jnp.tanh(h + b4_ref[...])


def generator_forward(z, params, *, tn=768):
    """z: (B, 100) float32 -> (B, 3, 32, 32) float32."""
    (w1, b1), (w2, b2), (w3, b3), (w4, b4) = params
    B, Din = z.shape
    N = w4.shape[1]                       # 3072
    assert N % tn == 0 and tn % 128 == 0

    # Weight-streaming regime: shrink weight bytes (bf16); biases stay f32 and
    # are added to the f32 accumulator.
    z_bf = z.astype(jnp.bfloat16)
    w1, w2, w3, w4 = (w.astype(jnp.bfloat16) for w in (w1, w2, w3, w4))

    flops = 2 * B * (Din * w1.shape[1]
                     + w1.shape[1] * w2.shape[1]
                     + w2.shape[1] * w3.shape[1]
                     + w3.shape[1] * N)
    bytes_accessed = (z_bf.size * 2
                      + (w1.size + w2.size + w3.size + w4.size) * 2
                      + (b1.size + b2.size + b3.size + b4.size) * 4
                      + B * N * 4)

    out_flat = pl.pallas_call(
        generator_kernel,
        out_shape=jax.ShapeDtypeStruct((B, N), jnp.float32),
        grid_spec=pltpu.PrefetchScalarGridSpec(
            num_scalar_prefetch=0,
            grid=(N // tn,),
            in_specs=[
                # Resident operands: index_map is constant -> DMA'd once.
                pl.BlockSpec((B, Din), lambda j: (0, 0)),            # z
                pl.BlockSpec(w1.shape, lambda j: (0, 0)),            # w1
                pl.BlockSpec(b1.shape, lambda j: (0, 0)),            # b1
                pl.BlockSpec(w2.shape, lambda j: (0, 0)),            # w2
                pl.BlockSpec(b2.shape, lambda j: (0, 0)),            # b2
                pl.BlockSpec(w3.shape, lambda j: (0, 0)),            # w3
                pl.BlockSpec(b3.shape, lambda j: (0, 0)),            # b3
                # Streamed operands: tiled along the 3072-wide output dim.
                pl.BlockSpec((w4.shape[0], tn), lambda j: (0, j)),   # w4
                pl.BlockSpec((1, tn), lambda j: (0, j)),             # b4
            ],
            out_specs=pl.BlockSpec((B, tn), lambda j: (0, j)),
        ),
        compiler_params=pltpu.CompilerParams(
            dimension_semantics=("parallel",),   # v7x: split w4 stream across both TCs
        ),
        cost_estimate=pl.CostEstimate(
            flops=flops,
            transcendentals=B * N,
            bytes_accessed=bytes_accessed,
        ),
    )(z_bf, w1, b1, w2, b2, w3, b3, w4, b4)
    return out_flat.reshape(-1, 3, 32, 32)


def init_params(key):
    """Deterministic synthetic weights, stored as (in, out) so the kernel does x @ W.
    Weights are bf16 (HBM-traffic reduction), biases f32 (added post-accumulation)."""
    # TODO(synk): for v5e/v6e an int8 (and v7x fp8) per-channel-scaled weight path
    # would cut HBM traffic another 2x; bf16 chosen here as the portable option.
    dims = [100, 256, 512, 1024, 3 * 32 * 32]
    params = []
    for i in range(4):
        key, kw, kb = jax.random.split(key, 3)
        bound = 1.0 / jnp.sqrt(dims[i])
        w = jax.random.uniform(kw, (dims[i], dims[i + 1]), jnp.float32, -bound, bound)
        b = jax.random.uniform(kb, (1, dims[i + 1]), jnp.float32, -bound, bound)
        params.append((w.astype(jnp.bfloat16), b))
    return params


def reference_forward(z, params):
    """Pure-JAX reference mirroring the kernel's precision choices
    (bf16 operands for the matmuls, f32 accumulation, f32 bias/activations)."""
    (w1, b1), (w2, b2), (w3, b3), (w4, b4) = params
    h = z.astype(jnp.bfloat16)
    h = jnp.dot(h, w1.astype(jnp.bfloat16), preferred_element_type=jnp.float32) + b1
    h = jnp.maximum(h, 0.0).astype(jnp.bfloat16)
    h = jnp.dot(h, w2.astype(jnp.bfloat16), preferred_element_type=jnp.float32) + b2
    h = jnp.maximum(h, 0.0).astype(jnp.bfloat16)
    h = jnp.dot(h, w3.astype(jnp.bfloat16), preferred_element_type=jnp.float32) + b3
    h = jnp.maximum(h, 0.0).astype(jnp.bfloat16)
    h = jnp.dot(h, w4.astype(jnp.bfloat16), preferred_element_type=jnp.float32) + b4
    return jnp.tanh(h).reshape(-1, 3, 32, 32)


if __name__ == "__main__":
    key = jax.random.PRNGKey(0)
    key, kz = jax.random.split(key)
    B = 8  # weight stream is amortizable: wall time is ~flat up to B of a few hundred
    z = jax.random.normal(kz, (B, 100), jnp.float32)
    params = init_params(key)

    out = generator_forward(z, params)
    out = jax.block_until_ready(out)

    ref = reference_forward(z, params)
    assert out.shape == (B, 3, 32, 32), out.shape
    max_err = float(jnp.max(jnp.abs(out - ref)))
    assert max_err < 1e-2, max_err

    print("KERNEL_OK")
</pallas_src>

<mosaic_0001>
module attributes {stable_mosaic.version = 11 : i64} {
  func.func @generator_kernel(%arg0: i32, %arg1: memref<8x100xbf16, #tpu.memory_space<vmem>>, %arg2: memref<100x256xbf16, #tpu.memory_space<vmem>>, %arg3: memref<1x256xf32, #tpu.memory_space<vmem>>, %arg4: memref<256x512xbf16, #tpu.memory_space<vmem>>, %arg5: memref<1x512xf32, #tpu.memory_space<vmem>>, %arg6: memref<512x1024xbf16, #tpu.memory_space<vmem>>, %arg7: memref<1x1024xf32, #tpu.memory_space<vmem>>, %arg8: memref<1024x768xbf16, #tpu.memory_space<vmem>>, %arg9: memref<1x768xf32, #tpu.memory_space<vmem>>, %arg10: memref<8x768xf32, #tpu.memory_space<vmem>>) attributes {dimension_semantics = [#tpu.dimension_semantics<parallel>], iteration_bounds = array<i64: 4>, scalar_prefetch = 0 : i64, scratch_operands = 0 : i64, tpu.core_type = #tpu.core_type<tc>, window_params = [{pipeline_mode = #tpu.pipeline_mode<synchronous>, transform_indices = @transform_0, window_bounds = array<i64: 8, 100>}, {pipeline_mode = #tpu.pipeline_mode<synchronous>, transform_indices = @transform_1, window_bounds = array<i64: 100, 256>}, {pipeline_mode = #tpu.pipeline_mode<synchronous>, transform_indices = @transform_2, window_bounds = array<i64: 1, 256>}, {pipeline_mode = #tpu.pipeline_mode<synchronous>, transform_indices = @transform_3, window_bounds = array<i64: 256, 512>}, {pipeline_mode = #tpu.pipeline_mode<synchronous>, transform_indices = @transform_4, window_bounds = array<i64: 1, 512>}, {pipeline_mode = #tpu.pipeline_mode<synchronous>, transform_indices = @transform_5, window_bounds = array<i64: 512, 1024>}, {pipeline_mode = #tpu.pipeline_mode<synchronous>, transform_indices = @transform_6, window_bounds = array<i64: 1, 1024>}, {transform_indices = @transform_7, window_bounds = array<i64: 1024, 768>}, {transform_indices = @transform_8, window_bounds = array<i64: 1, 768>}, {transform_indices = @transform_9, window_bounds = array<i64: 8, 768>}]} {
    %c0 = arith.constant 0 : index
    %c0_0 = arith.constant 0 : index
    %0 = vector.load %arg1[%c0, %c0_0] : memref<8x100xbf16, #tpu.memory_space<vmem>>, vector<8x100xbf16>
    %c0_1 = arith.constant 0 : index
    %c0_2 = arith.constant 0 : index
    %1 = vector.load %arg2[%c0_1, %c0_2] : memref<100x256xbf16, #tpu.memory_space<vmem>>, vector<100x256xbf16>
    %cst = arith.constant dense<0.000000e+00> : vector<8x256xf32>
    %2 = tpu.matmul %0, %1, %cst {dimension_numbers = #tpu.dot_dimension_numbers<[1], [0], [0], [1], [0, 0, 1, 1], [], []>} : vector<8x100xbf16>, vector<100x256xbf16>, vector<8x256xf32> -> vector<8x256xf32>
    %c0_3 = arith.constant 0 : index
    %c0_4 = arith.constant 0 : index
    %3 = vector.load %arg3[%c0_3, %c0_4] : memref<1x256xf32, #tpu.memory_space<vmem>>, vector<1x256xf32>
    %4 = vector.broadcast %3 : vector<1x256xf32> to vector<8x256xf32>
    %5 = arith.addf %2, %4 : vector<8x256xf32>
    %cst_5 = arith.constant 0.000000e+00 : f32
    %6 = vector.broadcast %cst_5 : f32 to vector<8x256xf32>
    %7 = arith.maximumf %5, %6 : vector<8x256xf32>
    %8 = arith.truncf %7 : vector<8x256xf32> to vector<8x256xbf16>
    %c0_6 = arith.constant 0 : index
    %c0_7 = arith.constant 0 : index
    %9 = vector.load %arg4[%c0_6, %c0_7] : memref<256x512xbf16, #tpu.memory_space<vmem>>, vector<256x512xbf16>
    %cst_8 = arith.constant dense<0.000000e+00> : vector<8x512xf32>
    %10 = tpu.matmul %8, %9, %cst_8 {dimension_numbers = #tpu.dot_dimension_numbers<[1], [0], [0], [1], [0, 0, 1, 1], [], []>} : vector<8x256xbf16>, vector<256x512xbf16>, vector<8x512xf32> -> vector<8x512xf32>
    %c0_9 = arith.constant 0 : index
    %c0_10 = arith.constant 0 : index
    %11 = vector.load %arg5[%c0_9, %c0_10] : memref<1x512xf32, #tpu.memory_space<vmem>>, vector<1x512xf32>
    %12 = vector.broadcast %11 : vector<1x512xf32> to vector<8x512xf32>
    %13 = arith.addf %10, %12 : vector<8x512xf32>
    %cst_11 = arith.constant 0.000000e+00 : f32
    %14 = vector.broadcast %cst_11 : f32 to vector<8x512xf32>
    %15 = arith.maximumf %13, %14 : vector<8x512xf32>
    %16 = arith.truncf %15 : vector<8x512xf32> to vector<8x512xbf16>
    %c0_12 = arith.constant 0 : index
    %c0_13 = arith.constant 0 : index
    %17 = vector.load %arg6[%c0_12, %c0_13] : memref<512x1024xbf16, #tpu.memory_space<vmem>>, vector<512x1024xbf16>
    %cst_14 = arith.constant dense<0.000000e+00> : vector<8x1024xf32>
    %18 = tpu.matmul %16, %17, %cst_14 {dimension_numbers = #tpu.dot_dimension_numbers<[1], [0], [0], [1], [0, 0, 1, 1], [], []>} : vector<8x512xbf16>, vector<512x1024xbf16>, vector<8x1024xf32> -> vector<8x1024xf32>
    %c0_15 = arith.constant 0 : index
    %c0_16 = arith.constant 0 : index
    %19 = vector.load %arg7[%c0_15, %c0_16] : memref<1x1024xf32, #tpu.memory_space<vmem>>, vector<1x1024xf32>
    %20 = vector.broadcast %19 : vector<1x1024xf32> to vector<8x1024xf32>
    %21 = arith.addf %18, %20 : vector<8x1024xf32>
    %cst_17 = arith.constant 0.000000e+00 : f32
    %22 = vector.broadcast %cst_17 : f32 to vector<8x1024xf32>
    %23 = arith.maximumf %21, %22 : vector<8x1024xf32>
    %24 = arith.truncf %23 : vector<8x1024xf32> to vector<8x1024xbf16>
    %c0_18 = arith.constant 0 : index
    %c0_19 = arith.constant 0 : index
    %25 = vector.load %arg8[%c0_18, %c0_19] : memref<1024x768xbf16, #tpu.memory_space<vmem>>, vector<1024x768xbf16>
    %cst_20 = arith.constant dense<0.000000e+00> : vector<8x768xf32>
    %26 = tpu.matmul %24, %25, %cst_20 {dimension_numbers = #tpu.dot_dimension_numbers<[1], [0], [0], [1], [0, 0, 1, 1], [], []>} : vector<8x1024xbf16>, vector<1024x768xbf16>, vector<8x768xf32> -> vector<8x768xf32>
    %c0_21 = arith.constant 0 : index
    %c0_22 = arith.constant 0 : index
    %27 = vector.load %arg9[%c0_21, %c0_22] : memref<1x768xf32, #tpu.memory_space<vmem>>, vector<1x768xf32>
    %28 = vector.broadcast %27 : vector<1x768xf32> to vector<8x768xf32>
    %29 = arith.addf %26, %28 : vector<8x768xf32>
    %30 = math.tanh %29 : vector<8x768xf32>
    %c0_23 = arith.constant 0 : index
    %c0_24 = arith.constant 0 : index
    %31 = vector.load %arg10[%c0_23, %c0_24] : memref<8x768xf32, #tpu.memory_space<vmem>>, vector<8x768xf32>
    tpu.vector_store %arg10[%c0_23, %c0_24], %30 {strides = array<i32>} : memref<8x768xf32, #tpu.memory_space<vmem>>, vector<8x768xf32>,
    return
  }
  func.func @transform_0(%arg0: i32) -> (i32, i32) {
    %c0_i32 = arith.constant 0 : i32
    %c0_i32_0 = arith.constant 0 : i32
    %c0_i32_1 = arith.constant 0 : i32
    return %c0_i32, %c0_i32_0 : i32, i32
  }
  func.func @transform_1(%arg0: i32) -> (i32, i32) {
    %c0_i32 = arith.constant 0 : i32
    %c0_i32_0 = arith.constant 0 : i32
    %c0_i32_1 = arith.constant 0 : i32
    return %c0_i32, %c0_i32_0 : i32, i32
  }
  func.func @transform_2(%arg0: i32) -> (i32, i32) {
    %c0_i32 = arith.constant 0 : i32
    %c0_i32_0 = arith.constant 0 : i32
    %c0_i32_1 = arith.constant 0 : i32
    return %c0_i32, %c0_i32_0 : i32, i32
  }
  func.func @transform_3(%arg0: i32) -> (i32, i32) {
    %c0_i32 = arith.constant 0 : i32
    %c0_i32_0 = arith.constant 0 : i32
    %c0_i32_1 = arith.constant 0 : i32
    return %c0_i32, %c0_i32_0 : i32, i32
  }
  func.func @transform_4(%arg0: i32) -> (i32, i32) {
    %c0_i32 = arith.constant 0 : i32
    %c0_i32_0 = arith.constant 0 : i32
    %c0_i32_1 = arith.constant 0 : i32
    return %c0_i32, %c0_i32_0 : i32, i32
  }
  func.func @transform_5(%arg0: i32) -> (i32, i32) {
    %c0_i32 = arith.constant 0 : i32
    %c0_i32_0 = arith.constant 0 : i32
    %c0_i32_1 = arith.constant 0 : i32
    return %c0_i32, %c0_i32_0 : i32, i32
  }
  func.func @transform_6(%arg0: i32) -> (i32, i32) {
    %c0_i32 = arith.constant 0 : i32
    %c0_i32_0 = arith.constant 0 : i32
    %c0_i32_1 = arith.constant 0 : i32
    return %c0_i32, %c0_i32_0 : i32, i32
  }
  func.func @transform_7(%arg0: i32) -> (i32, i32) {
    %c0_i32 = arith.constant 0 : i32
    %c0_i32_0 = arith.constant 0 : i32
    return %c0_i32, %arg0 : i32, i32
  }
  func.func @transform_8(%arg0: i32) -> (i32, i32) {
    %c0_i32 = arith.constant 0 : i32
    %c0_i32_0 = arith.constant 0 : i32
    return %c0_i32, %arg0 : i32, i32
  }
  func.func @transform_9(%arg0: i32) -> (i32, i32) {
    %c0_i32 = arith.constant 0 : i32
    %c0_i32_0 = arith.constant 0 : i32
    return %c0_i32, %arg0 : i32, i32
  }
}

</mosaic_0001>

<bundles_post_ra>
// kernel: tpu_custom_call.1
= control target key start
LH: loop header
LB: loop body
LE: loop exit
PB: predicated region body
PF: predicated region fallthrough
CT: control target
= control target key end

     0   :  { %s9059_s0 = inlined_call_operand.hbm [shape: bf16[8,100], index: 0, kind: input, shape index: {}]   ;;  %s9060_s1 = inlined_call_operand.hbm [shape: bf16[100,256], index: 1, kind: input, shape index: {}]   ;;  %s9061_s2 = inlined_call_operand.hbm [shape: f32[1,256], index: 2, kind: input, shape index: {}]   ;;  %s9062_s3 = inlined_call_operand.hbm [shape: bf16[256,512], index: 3, kind: input, shape index: {}]   ;;  %s9063_s4 = inlined_call_operand.hbm [shape: f32[1,512], index: 4, kind: input, shape index: {}]   ;;  %s9064_s5 = inlined_call_operand.hbm [shape: bf16[512,1024], index: 5, kind: input, shape index: {}]   ;;  %s9065_s6 = inlined_call_operand.hbm [shape: f32[1,1024], index: 6, kind: input, shape index: {}]   ;;  %s9066_s7 = inlined_call_operand.hbm [shape: bf16[1024,3072], index: 7, kind: input, shape index: {}]   ;;  %s9067_s8 = inlined_call_operand.hbm [shape: f32[1,3072], index: 8, kind: input, shape index: {}]   ;;  %s9068_s9 = inlined_call_operand.hbm [shape: f32[8,3072], index: 9, kind: output, shape index: {}]  }
   0x1   :  { %9084 = sst [smem:[#allocation28_spill]] %s9060_s1 }
   0x2   :  { %9085 = sst [smem:[#allocation29_spill]] %s9062_s3 }
   0x3   :  { %9086 = sst [smem:[#allocation30_spill]] %s9064_s5 }
   0x4   :  { %9087 = sst [smem:[#allocation31_spill]] %s9066_s7 }
   0x5   :  { %9088 = sst [smem:[#allocation32_spill]] %s9068_s9 }
   0x6   :  { %14 = vsyncpa [#allocation3], 0 }
   0x7   :  { %15 = vsyncpa [#allocation6], 0 }
   0x8   :  { %16 = vsyncpa [#allocation9], 0 }
   0x9   :  { %17 = vsyncpa [#allocation12], 0 }
   0xa   :  { %18 = vsyncpa [#allocation15], 0 }
   0xb   :  { %20 = vsyncpa [#allocation15 + $0x1], 0 }
   0xc   :  { %21 = vsyncpa [#allocation4], 0 }
   0xd   :  { %23 = vsyncpa [#allocation4 + $0x1], 0  ;;  %s8124_s30 = smov 0   ;;  %s8126_s10 = smov 0  }
   0xe   :  { %s8128_s11 = smov 0   ;;  %s8130_s12 = smov 0  }
   0xf LB: > { %9089 = sst [smem:[#allocation24_spill]] %s8040_s30  ;;  %s8054_s13 = smov [#allocation5]   ;;  %s8052_s12 = sphi %s8130_s12, %s9126_s12   ;;  %s8048_s11 = sphi %s8128_s11, %s9130_s11   ;;  %s8044_s10 = sphi %s8126_s10, %s9129_s10   ;;  %s8040_s30 = sphi %s8124_s30, %s9128_s30  }
  0x10   : > { %s282_s14 = sshll.u32 %s8054_s13, 4  ;;  %s8145_s15 = sadd.s32 4294967295, %s8052_s12   ;;  %s8150_s14 = int_to_ptr.vmem [resolvable:$true] %s282_s14 }
  0x11   : > { %p6064_p0 = scmp.ge.s32.totalorder %s8052_s12, 1  ;;  %p9070_p1 = scmp.eq.s32.totalorder %s8145_s15, 0 }
  0x12   : > { %p259_p2 = scmp.lt.s32.totalorder %s8052_s12, 5  ;;  %s8055_s17 = smov [#allocation8]  }
  0x13   : > { %s306_s18 = sshll.u32 %s8055_s17, 4  ;;  %s8056_s20 = smov [#allocation11]   ;;  %s8164_s18 = int_to_ptr.vmem [resolvable:$true] %s306_s18 }
  0x14   : > { %p8152_p3 = pnand %p6064_p0, %p259_p2  ;;  %s8166_s21 = sshll.u32 %s8056_s20, 4  ;;  %s331_s21 = int_to_ptr.vmem [resolvable:$true] %s8166_s21 }
  0x15   : > { %s9092_s1 = sld [smem:[#allocation28_spill]] }
  0x16   : > { %s9090_s16 = scalar_select %p8152_p3, 1, 0 }
  0x17   : > { %p6912_p4 = pneg %p8152_p3 }
  0x19   : > { %p8160_p5 = pnand %p6912_p4, %p9070_p1 }
  0x1b   : > { %s9091_s19 = scalar_select %p8160_p5, 1, 0 }
  0x1c   : > { %s7714_s24 = scalar_lea.hbm %s9092_s1, 1664  ;;  %p8176_p7 = pneg %p8160_p5 }
  0x1d   : > { %p7715_p6 = scmp.ne.s32.totalorder %s9092_s1, %s7714_s24  ;;  %p7721_p10 = scmp.lt.u32.totalorder %s7714_s24, %s9092_s1 }
  0x1f   : > { %p7717_p8 = pnand %p8176_p7, %p7715_p6 }
  0x21   : > { %p7718_p9 = pneg %p7717_p8 }
  0x23   : > { %p7723_p11 = pnand %p7721_p10, %p7718_p9 }
  0x25   : > { %7726 = shalt.err (!%p7723_p11)
}
  0x26   : > { %s7727_s13 = scalar_lea.vmem %s8150_s14, 1664  ;;  %p7735_p2 = scmp.lt.s32.totalorder %s8150_s14, %s8150_s14 }
  0x27   : > { %p7728_p12 = scmp.ne.s32.totalorder %s8150_s14, %s7727_s13  ;;  %p7736_p4 = scmp.lt.s32.totalorder %s7727_s13, %s7727_s13 }
  0x29   : > { %p7730_p13 = pnand %p7728_p12, %p8176_p7  ;;  %p7737_p6 = por %p7736_p4, %p7735_p2 }
  0x2b   : > { %p7731_p0 = pneg %p7730_p13 }
  0x2d   : > { %p7738_p8 = pnand %p7737_p6, %p7731_p0 }
  0x2f   : > { %7741 = shalt.err (!%p7738_p8)
}
  0x30   : > { %s8057_s17 = smov 128   ;;  %s8058_s20 = smov 8  }
  0x31   : > { %6918 = dma.hbm_to_vmem [thread:$0]  (!%p8160_p5), %s9092_s1, 1664, %s8150_s14, [#allocation6], %s8057_s17, %s8057_s17, %s8058_s20  }
  0x32   : > { %s9094_s3 = sld [smem:[#allocation29_spill]] }
  0x38   : > { %s7742_s26 = scalar_lea.hbm %s9094_s3, 8192 }
  0x39   : > { %p7743_p9 = scmp.ne.s32.totalorder %s9094_s3, %s7742_s26  ;;  %p7749_p12 = scmp.lt.u32.totalorder %s7742_s26, %s9094_s3 }
  0x3b   : > { %p7745_p10 = pnand %p7743_p9, %p8176_p7 }
  0x3d   : > { %p7746_p11 = pneg %p7745_p10 }
  0x3f   : > { %p7751_p13 = pnand %p7749_p12, %p7746_p11 }
  0x41   : > { %7754 = shalt.err (!%p7751_p13)
}
  0x42   : > { %s7755_s14 = scalar_lea.vmem %s8164_s18, 8192  ;;  %p7763_p6 = scmp.lt.s32.totalorder %s8164_s18, %s8164_s18 }
  0x43   : > { %p7756_p0 = scmp.ne.s32.totalorder %s8164_s18, %s7755_s14  ;;  %p7764_p8 = scmp.lt.s32.totalorder %s7755_s14, %s7755_s14 }
  0x45   : > { %p7758_p2 = pnand %p7756_p0, %p8176_p7  ;;  %p7765_p9 = por %p7764_p8, %p7763_p6 }
  0x47   : > { %p7759_p4 = pneg %p7758_p2 }
  0x49   : > { %p7766_p10 = pnand %p7765_p9, %p7759_p4 }
  0x4b   : > { %7769 = shalt.err (!%p7766_p10)
}
  0x4c   : > { %s8059_s17 = smov 256   ;;  %s8060_s9 = smov 16  }
  0x4d   : > { %6924 = dma.hbm_to_vmem [thread:$0]  (!%p8160_p5), %s9094_s3, 8192, %s8164_s18, [#allocation9], %s8059_s17, %s8059_s17, %s8060_s9  }
  0x4e   : > { %s9095_s5 = sld [smem:[#allocation30_spill]] }
  0x54   : > { %s7770_s25 = scalar_lea.hbm %s9095_s5, 32768 }
  0x55   : > { %p7771_p11 = scmp.ne.s32.totalorder %s9095_s5, %s7770_s25  ;;  %p7777_p0 = scmp.lt.u32.totalorder %s7770_s25, %s9095_s5 }
  0x57   : > { %p7773_p12 = pnand %p7771_p11, %p8176_p7 }
  0x59   : > { %p7774_p13 = pneg %p7773_p12 }
  0x5b   : > { %p7779_p2 = pnand %p7777_p0, %p7774_p13 }
  0x5d   : > { %7782 = shalt.err (!%p7779_p2)
}
  0x5e   : > { %s7783_s14 = scalar_lea.vmem %s331_s21, 32768  ;;  %p7791_p9 = scmp.lt.s32.totalorder %s331_s21, %s331_s21 }
  0x5f   : > { %p7784_p4 = scmp.ne.s32.totalorder %s331_s21, %s7783_s14  ;;  %p7792_p10 = scmp.lt.s32.totalorder %s7783_s14, %s7783_s14 }
  0x61   : > { %p7786_p6 = pnand %p7784_p4, %p8176_p7  ;;  %p7793_p1 = por %p7792_p10, %p7791_p9 }
  0x63   : > { %p7787_p8 = pneg %p7786_p6 }
  0x65   : > { %p7794_p3 = pnand %p7793_p1, %p7787_p8 }
  0x67   : > { %7797 = shalt.err (!%p7794_p3)
}
  0x68   : > { %s8061_s18 = smov 512   ;;  %s8062_s17 = smov 32  }
  0x69   : > { %6930 = dma.hbm_to_vmem [thread:$0]  (!%p8160_p5), %s9095_s5, 32768, %s331_s21, [#allocation12], %s8061_s18, %s8061_s18, %s8062_s17  }
  0x6a   : > { %s6063_s22 = sadd.s32 4294967294, %s8052_s12   ;;  %s8241_s23 = sadd.s32 1, %s8052_s12  }
  0x6b   : > { %9096 = sst [smem:[#allocation25_spill]] %s8241_s23  ;;  %s183_s24 = sadd.s32 1, %s8048_s11 }
  0x6c   : > { %s180_s25 = ssub.s32 %s8052_s12, %s8241_s23  ;;  %p190_p1 = scmp.ne.s32.totalorder %s8048_s11, %s8044_s10 }
  0x6d   : > { %p181_p3 = scmp.eq.s32.totalorder %s180_s25, 0  ;;  %p191_p11 = scmp.eq.s32.totalorder %s8052_s12, 0 }
  0x6e   : > { %p196_p12 = scmp.ne.s32.totalorder %s8044_s10, %s8040_s30  ;;  %p246_p13 = scmp.eq.s32.totalorder %s8145_s15, 3 }
  0x6f   : > { %s8253_s26 = scalar_select %p181_p3, %s8048_s11, %s183_s24  }
  0x70   : > { %p192_p0 = por %p191_p11, %p190_p1  ;;  %p9098_p2 = scmp.eq.s32.totalorder %s8145_s15, 0 }
  0x71   : > { %9097 = sst [smem:[#allocation26_spill]] %s8253_s26  ;;  %p8261_p6 = por %p246_p13, %p190_p1 }
  0x72   : > { %p8257_p4 = por %p9098_p2, %p196_p12  ;;  %p252_p8 = scmp.eq.s32.totalorder %s6063_s22, 3 }
  0x73   : > { %s9100_s28 = scalar_select %p8261_p6, 1, 0 }
  0x74   : > { %s9099_s21 = scalar_select %p8257_p4, 1, 0 }
  0x75   : > { %p6952_p9 = scmp.lt.s32.totalorder %s8052_s12, 4  ;;  %s355_s29 = sand.u32 1, %s8052_s12  }
  0x76   : > { %p8267_p10 = por %p252_p8, %p196_p12  ;;  %s9072_s14 = sand.u32 1, %s8048_s11  }
  0x77   : > { %s6806_s18 = smul.u32 384, %s8052_s12  ;;  %p8275_p3 = pnand %p6952_p9, %p192_p0 }
  0x78   : > { %s9101_s13 = scalar_select %p8267_p10, 1, 0 }
  0x79   : > { %s6873_s17 = smul.u32 3072, %s9072_s14  ;;  %s9104_s7 = sld [smem:[#allocation31_spill]] }
  0x7a   : > { %9102 = sst [smem:[#allocation27_spill]] %s9101_s13  ;;  %s8286_s14 = scalar_lea.sflag [#allocation15], %s355_s29 }
  0x7b   : > { %s9103_s9 = scalar_select %p8275_p3, 1, 0 }
  0x7c   : > { %s359_s25 = scalar_lea.vmem [#allocation14], %s6873_s17  ;;  %p9081_p11 = pneg %p8275_p3 }
  0x7d   : > { %s366_s1 = sshll.u32 %s359_s25, 4  ;;  %s8284_s1 = int_to_ptr.vmem [resolvable:$true] %s366_s1 }
  0x7f   : > { %s8282_s22 = scalar_lea.hbm %s9104_s7, %s6806_s18  ;;  %s7803_s24 = scalar_lea.hbm %s9104_s7, 196608 }
  0x80   : > { %s7798_s3 = scalar_lea.hbm %s8282_s22, 49152  ;;  %p7804_p0 = scmp.lt.u32.totalorder %s8282_s22, %s9104_s7 }
  0x81   : > { %p7799_p1 = scmp.ne.s32.totalorder %s8282_s22, %s7798_s3  ;;  %p7805_p2 = scmp.lt.u32.totalorder %s7803_s24, %s7798_s3 }
  0x82   : > { %p7807_p9 = scmp.lt.u32.totalorder %s7798_s3, %s8282_s22 }
  0x83   : > { %p7801_p12 = pnand %p9081_p11, %p7799_p1  ;;  %p7806_p8 = por %p7805_p2, %p7804_p0 }
  0x85   : > { %p7802_p13 = pneg %p7801_p12  ;;  %p7808_p10 = por %p7807_p9, %p7806_p8 }
  0x87   : > { %p7809_p6 = pnand %p7808_p10, %p7802_p13 }
  0x89   : > { %7812 = shalt.err (!%p7809_p6)
}
  0x8a   : > { %s7813_s29 = scalar_lea.vmem %s8284_s1, 49152  ;;  %s8063_s17 = smov [#allocation14]  }
  0x8b   : > { %p7814_p1 = scmp.ne.s32.totalorder %s8284_s1, %s7813_s29  ;;  %s7818_s25 = sshll.u32 %s8063_s17, 4  ;;  %s7819_s25 = int_to_ptr.vmem [resolvable:$false] %s7818_s25 }
  0x8c   : > { %s7820_s5 = scalar_lea.vmem %s7819_s25, 98304  ;;  %p7821_p5 = scmp.lt.s32.totalorder %s8284_s1, %s7819_s25 }
  0x8d   : > { %p7816_p12 = pnand %p7814_p1, %p9081_p11  ;;  %p7822_p0 = scmp.lt.s32.totalorder %s7820_s5, %s7813_s29 }
  0x8f   : > { %p7817_p4 = pneg %p7816_p12  ;;  %p7823_p2 = por %p7822_p0, %p7821_p5 }
  0x91   : > { %p7824_p8 = pnand %p7823_p2, %p7817_p4 }
  0x93   : > { %7827 = shalt.err (!%p7824_p8)
}
  0x94   : > { %s8064_s3 = smov 1536   ;;  %s8065_s26 = smov 384  }
  0x95   : > { %s8066_s18 = smov 24   ;;  %s8067_s20 = smov [#allocation2]  }
  0x96   : > { %6937 = dma.hbm_to_vmem [thread:$0]  (!%p8275_p3), %s8282_s22, 49152, %s8284_s1, %s8286_s14, %s8064_s3, %s8065_s26, %s8066_s18  }
  0x97   : > { %s272_s24 = sshll.u32 %s8067_s20, 4  ;;  %s8068_s17 = smov [#allocation7]   ;;  %s273_s24 = int_to_ptr.vmem [resolvable:$true] %s272_s24 }
  0x98   : > { %s296_s7 = sshll.u32 %s8068_s17, 4  ;;  %s7828_s5 = scalar_lea.hbm %s9059_s0, 64  ;;  %s8314_s7 = int_to_ptr.vmem [resolvable:$true] %s296_s7 }
  0x99   : > { %p7829_p5 = scmp.ne.s32.totalorder %s9059_s0, %s7828_s5  ;;  %p7835_p10 = scmp.lt.u32.totalorder %s7828_s5, %s9059_s0 }
  0x9b   : > { %p7831_p4 = pnand %p7829_p5, %p8176_p7 }
  0x9d   : > { %p7832_p6 = pneg %p7831_p4 }
  0x9f   : > { %p7837_p13 = pnand %p7835_p10, %p7832_p6 }
  0xa1   : > { %7840 = shalt.err (!%p7837_p13)
}
  0xa2   : > { %s7841_s22 = scalar_lea.vmem %s273_s24, 64  ;;  %p7849_p0 = scmp.lt.s32.totalorder %s273_s24, %s273_s24 }
  0xa3   : > { %p7842_p9 = scmp.ne.s32.totalorder %s273_s24, %s7841_s22  ;;  %p7850_p2 = scmp.lt.s32.totalorder %s7841_s22, %s7841_s22 }
  0xa5   : > { %p7844_p1 = pnand %p7842_p9, %p8176_p7  ;;  %p7851_p8 = por %p7850_p2, %p7849_p0 }
  0xa7   : > { %p7845_p12 = pneg %p7844_p1 }
  0xa9   : > { %p7852_p11 = pnand %p7851_p8, %p7845_p12 }
  0xab   : > { %7855 = shalt.err (!%p7852_p11)
}
  0xac   : > { %p9105_p5 = scmp.ne.s32.totalorder %s9091_s19, 0  ;;  %s7856_s26 = scalar_lea.hbm %s9061_s2, 32 }
  0xad   : > { %p7857_p4 = scmp.ne.s32.totalorder %s9061_s2, %s7856_s26  ;;  %p7863_p11 = scmp.lt.u32.totalorder %s7856_s26, %s9061_s2 }
  0xae   : > { %6915 = dma.hbm_to_vmem [thread:$0]  (!%p9105_p5), %s9059_s0, 64, %s273_s24, [#allocation3]  }
  0xaf   : > { %p7859_p6 = pnand %p7857_p4, %p8176_p7 }
  0xb1   : > { %p7860_p10 = pneg %p7859_p6 }
  0xb3   : > { %p7865_p13 = pnand %p7863_p11, %p7860_p10 }
  0xb5   : > { %7868 = shalt.err (!%p7865_p13)
}
  0xb6   : > { %s7869_s24 = scalar_lea.vmem %s8314_s7, 32  ;;  %p7877_p0 = scmp.lt.s32.totalorder %s8314_s7, %s8314_s7 }
  0xb7   : > { %p7870_p9 = scmp.ne.s32.totalorder %s8314_s7, %s7869_s24  ;;  %p7878_p2 = scmp.lt.s32.totalorder %s7869_s24, %s7869_s24 }
  0xb9   : > { %p7872_p1 = pnand %p7870_p9, %p8176_p7  ;;  %p7879_p8 = por %p7878_p2, %p7877_p0 }
  0xbb   : > { %p7873_p12 = pneg %p7872_p1 }
  0xbd   : > { %p7880_p4 = pnand %p7879_p8, %p7873_p12 }
  0xbf   : > { %7883 = shalt.err (!%p7880_p4)
}
  0xc0   : > { %6921 = dma.hbm_to_vmem [thread:$0]  (!%p9105_p5), %s9061_s2, 32, %s8314_s7, [#allocation6]  }
  0xc1   : > { %s8069_s1 = smov [#allocation10]   ;;  %s8070_s23 = smov [#allocation13]  }
  0xc2   : > { %s320_s22 = sshll.u32 %s8069_s1, 4  ;;  %s344_s13 = sshll.u32 %s8070_s23, 4  ;;  %s321_s22 = int_to_ptr.vmem [resolvable:$true] %s320_s22  ;;  %s8357_s13 = int_to_ptr.vmem [resolvable:$true] %s344_s13 }
  0xc3   : > { %s7884_s26 = scalar_lea.hbm %s9063_s4, 64 }
  0xc4   : > { %p7885_p6 = scmp.ne.s32.totalorder %s9063_s4, %s7884_s26  ;;  %p7891_p13 = scmp.lt.u32.totalorder %s7884_s26, %s9063_s4 }
  0xc6   : > { %p7887_p10 = pnand %p7885_p6, %p8176_p7 }
  0xc8   : > { %p7888_p11 = pneg %p7887_p10 }
  0xca   : > { %p7893_p9 = pnand %p7891_p13, %p7888_p11 }
  0xcc   : > { %7896 = shalt.err (!%p7893_p9)
}
  0xcd   : > { %s7897_s29 = scalar_lea.vmem %s321_s22, 64  ;;  %p7905_p2 = scmp.lt.s32.totalorder %s321_s22, %s321_s22 }
  0xce   : > { %p7898_p1 = scmp.ne.s32.totalorder %s321_s22, %s7897_s29  ;;  %p7906_p8 = scmp.lt.s32.totalorder %s7897_s29, %s7897_s29 }
  0xd0   : > { %p7900_p12 = pnand %p7898_p1, %p8176_p7  ;;  %p7907_p4 = por %p7906_p8, %p7905_p2 }
  0xd2   : > { %p7901_p0 = pneg %p7900_p12 }
  0xd4   : > { %p7908_p3 = pnand %p7907_p4, %p7901_p0 }
  0xd6   : > { %7911 = shalt.err (!%p7908_p3)
}
  0xd7   : > { %6927 = dma.hbm_to_vmem [thread:$0]  (!%p9105_p5), %s9063_s4, 64, %s321_s22, [#allocation9]  }
  0xd8   : > { %s7912_s23 = scalar_lea.hbm %s9065_s6, 128 }
  0xd9   : > { %p7913_p6 = scmp.ne.s32.totalorder %s9065_s6, %s7912_s23  ;;  %p7919_p3 = scmp.lt.u32.totalorder %s7912_s23, %s9065_s6 }
  0xdb   : > { %p7915_p10 = pnand %p7913_p6, %p8176_p7 }
  0xdd   : > { %p7916_p11 = pneg %p7915_p10 }
  0xdf   : > { %p7921_p13 = pnand %p7919_p3, %p7916_p11 }
  0xe1   : > { %7924 = shalt.err (!%p7921_p13)
}
  0xe2   : > { %s7925_s22 = scalar_lea.vmem %s8357_s13, 128  ;;  %p7933_p0 = scmp.lt.s32.totalorder %s8357_s13, %s8357_s13 }
  0xe3   : > { %p7926_p9 = scmp.ne.s32.totalorder %s8357_s13, %s7925_s22  ;;  %p7934_p2 = scmp.lt.s32.totalorder %s7925_s22, %s7925_s22 }
  0xe5   : > { %p7928_p1 = pnand %p7926_p9, %p8176_p7  ;;  %p7935_p8 = por %p7934_p2, %p7933_p0 }
  0xe7   : > { %p7929_p12 = pneg %p7928_p1 }
  0xe9   : > { %p7936_p4 = pnand %p7935_p8, %p7929_p12 }
  0xeb   : > { %7939 = shalt.err (!%p7936_p4)
}
  0xec   : > { %6933 = dma.hbm_to_vmem [thread:$0]  (!%p9105_p5), %s9065_s6, 128, %s8357_s13, [#allocation12]  }
  0xed   : > { %s9106_s7 = sand.u32 1, %s8048_s11   ;;  %s6807_s29 = smul.u32 96, %s8052_s12 }
  0xee   : > { %s6874_s27 = smul.u32 6, %s9106_s7  ;;  %p9107_p6 = scmp.ne.s32.totalorder %s9103_s9, 0 }
  0xef   : > { %s8406_s5 = scalar_lea.hbm %s9067_s8, %s6807_s29  ;;  %s7945_s3 = scalar_lea.hbm %s9067_s8, 384 }
  0xf0   : > { %s380_s19 = scalar_lea.vmem [#allocation16], %s6874_s27  ;;  %s7940_s23 = scalar_lea.hbm %s8406_s5, 96 }
  0xf1   : > { %s388_s1 = sshll.u32 %s380_s19, 4  ;;  %p7941_p7 = scmp.ne.s32.totalorder %s8406_s5, %s7940_s23  ;;  %s389_s1 = int_to_ptr.vmem [resolvable:$true] %s388_s1 }
  0xf2   : > { %p9108_p10 = pneg %p9107_p6  ;;  %p7946_p3 = scmp.lt.u32.totalorder %s8406_s5, %s9067_s8 }
  0xf3   : > { %p7947_p13 = scmp.lt.u32.totalorder %s7945_s3, %s7940_s23  ;;  %p7949_p1 = scmp.lt.u32.totalorder %s7940_s23, %s8406_s5 }
  0xf4   : > { %p7943_p5 = pnand %p7941_p7, %p9108_p10 }
  0xf5   : > { %p7948_p9 = por %p7947_p13, %p7946_p3 }
  0xf6   : > { %p7944_p11 = pneg %p7943_p5 }
  0xf7   : > { %p7950_p12 = por %p7949_p1, %p7948_p9 }
  0xf9   : > { %p7951_p0 = pnand %p7950_p12, %p7944_p11 }
  0xfb   : > { %7954 = shalt.err (!%p7951_p0)
}
  0xfc   : > { %s7955_s22 = scalar_lea.vmem %s389_s1, 96  ;;  %p9109_p8 = pmov %p9108_p10 }
  0xfd   : > { %p7956_p2 = scmp.ne.s32.totalorder %s389_s1, %s7955_s22  ;;  %s8071_s20 = smov [#allocation16]  }
  0xfe   : > { %s7960_s17 = sshll.u32 %s8071_s20, 4  ;;  %s7961_s17 = int_to_ptr.vmem [resolvable:$false] %s7960_s17 }
  0xff   : > { %p7958_p4 = pnand %p7956_p2, %p9109_p8  ;;  %s7962_s7 = scalar_lea.vmem %s7961_s17, 192 }
 0x100   : > { %p7963_p10 = scmp.lt.s32.totalorder %s389_s1, %s7961_s17  ;;  %p7964_p5 = scmp.lt.s32.totalorder %s7962_s7, %s7955_s22 }
 0x101   : > { %p7959_p7 = pneg %p7958_p4 }
 0x102   : > { %p7965_p3 = por %p7964_p5, %p7963_p10 }
 0x104   : > { %p7966_p13 = pnand %p7965_p3, %p7959_p7 }
 0x106   : > { %7969 = shalt.err (!%p7966_p13)
}
 0x107   : > { %6940 = dma.hbm_to_vmem [thread:$0]  (!%p9107_p6), %s8406_s5, 96, %s389_s1, %s8286_s14  }
 0x108   : > { %p9110_p11 = scmp.ne.s32.totalorder %s9090_s16, 0 }
 0x109   : > { %p9111_p9 = scmp.eq.s32.totalorder (!%p9110_p11), %s8145_s15, 0 }
 0x10a   : > { %397 = sbr.rel (%p9110_p11) target bundleno = 1731 (0x6c3), region = 56 }
 0x111   : > { %8015 = dma.done.wait (%p9111_p9), [#allocation3], 64   ;;  %p9112_p1 = pmov %p9111_p9 }
 0x113   : > { %8017 = vsyncadd (%p9112_p1), [#allocation3], 4294967232  ;;  %p9113_p12 = pmov %p9112_p1 }
 0x114   : > { %p9114_p0 = pmov %p9112_p1 }
 0x115   : > { %8019 = dma.done.wait (%p9113_p12), [#allocation6], 1696  }
 0x116   : > { %8021 = vsyncadd (%p9114_p0), [#allocation6], 4294965600  ;;  %p9115_p2 = pmov %p9114_p0 }
 0x117   : > { %p9116_p6 = pmov %p9114_p0 }
 0x118   : > { %8023 = dma.done.wait (%p9115_p2), [#allocation9], 8256  }
 0x119   : > { %8025 = vsyncadd (%p9116_p6), [#allocation9], 4294959040  ;;  %p9117_p8 = pmov %p9114_p0 }
 0x11a   : > { %p9118_p4 = pmov %p9114_p0 }
 0x11b   : > { %8027 = dma.done.wait (%p9117_p8), [#allocation12], 32896  }
 0x11c   : > { %8029 = vsyncadd (%p9118_p4), [#allocation12], 4294934400  ;;  %s427_s16 = sand.u32 1, %s8145_s15   ;;  %s8448_s14 = sand.u32 1, %s8044_s10  }
 0x11d   : > { %s6875_s9 = smul.u32 3072, %s8448_s14  ;;  %s428_s27 = scalar_lea.sflag [#allocation15], %s427_s16 }
 0x11e   : > { %p9119_p7 = scmp.ne.s32.totalorder %s9099_s21, 0 }
 0x11f   : > { %s8451_s29 = scalar_lea.vmem [#allocation14], %s6875_s9 }
 0x120   : > { %8031 = dma.done.wait (%p9119_p7), %s428_s27, 49248  }
 0x121   : > { %8033 = vsyncadd (%p9119_p7), %s428_s27, 4294918048  ;;  %v8072_v0 = vmov 0   ;;  %v7010_v1 = vld [vmem:[#allocation5 + $0x4] ss:$8 sps:$4 sm:$0xff]   ;;  %v7012_v2 = vld [vmem:[#allocation5] ss:$8 sps:$4 sm:$0xff]   ;;  %v500_v51 = vlaneseq }
 0x122   : > { %618 = vmatprep.mubr.bf16.mxu0 %v8072_v0  ;;  %586 = vmatprep.subr.bf16.mxu0 %v7010_v1  ;;  %v7013_v3 = vld [vmem:[#allocation5 + $0x14] ss:$8 sps:$4 sm:$0xff]   ;;  %v7015_v4 = vld [vmem:[#allocation5 + $0x10] ss:$8 sps:$4 sm:$0xff]   ;;  %v7016_v5 = vld [vmem:[#allocation5 + $0x24] ss:$8 sps:$4 sm:$0xff]  }
 0x123   : > { %587 = vmatpush1.bf16.msra.mxu0 %v7012_v2  ;;  %v7018_v6 = vld [vmem:[#allocation5 + $0x20] ss:$8 sps:$4 sm:$0xff]   ;;  %v7019_v7 = vld [vmem:[#allocation5 + $0x34] ss:$8 sps:$4 sm:$0xff]   ;;  %v7021_v8 = vld [vmem:[#allocation5 + $0x30] ss:$8 sps:$4 sm:$0xff]  }
 0x124   : > { %588 = vmatprep.subr.bf16.mxu0 %v7013_v3  ;;  %v7022_v9 = vld [vmem:[#allocation5 + $0x44] ss:$8 sps:$4 sm:$0xff]   ;;  %v7024_v10 = vld [vmem:[#allocation5 + $0x40] ss:$8 sps:$4 sm:$0xff]   ;;  %v7025_v11 = vld [vmem:[#allocation5 + $0x54] ss:$8 sps:$4 sm:$0xff]  }
 0x125   : > { %v497_v12 = vld [vmem:[#allocation5 + $0x60] sm:$0x33]  ;;  %v7027_v13 = vld [vmem:[#allocation5 + $0x50] ss:$8 sps:$4 sm:$0xff]   ;;  %vm579_vm0 = vcmask 1041408   ;;  %vm575_vm1 = vcmask 818176  }
 0x126   : > { %v6096_v14 = vcombine.high %v497_v12, %v497_v12  ;;  %v6095_v15 = vcombine.low %v497_v12, %v497_v12  ;;  %v7032_v17 = vld [vmem:[#allocation8 + $0x4] ss:$16 sps:$4 sm:$0xff]   ;;  %v7030_v19 = vld [vmem:[#allocation8] ss:$16 sps:$4 sm:$0xff]   ;;  %v7080_v50 = vld [vmem:[#allocation8 + $0xc] ss:$16 sps:$4 sm:$0xff]  }
 0x127   : > { %589 = vmatpush1.bf16.msra.mxu0 %v7015_v4  ;;  %v484_v18 = vld [vmem:[#allocation2] sm:$0xf]  ;;  %v8457_v52 = vshrl.u32 %v500_v51, 7  ;;  %v498_v54 = vld [vmem:[#allocation7] sm:$0x3]  ;;  %v1163_v51 = vld [vmem:[#allocation11 + $0x120] sm:$0xff] }
 0x128   : > { %590 = vmatprep.subr.bf16.mxu0 %v7016_v5  ;;  %v581_v16 = vsel %vm579_vm0, %v6095_v15, 0  ;;  %v7035_v20 = vld [vmem:[#allocation8 + $0x24] ss:$16 sps:$4 sm:$0xff]   ;;  %v7033_v21 = vld [vmem:[#allocation8 + $0x20] ss:$16 sps:$4 sm:$0xff]   ;;  %s6876_s21 = smul.u32 6, %s8448_s14 }
 0x129   : > { %v7038_v22 = vld [vmem:[#allocation8 + $0x44] ss:$16 sps:$4 sm:$0xff]   ;;  %v7036_v23 = vld [vmem:[#allocation8 + $0x40] ss:$16 sps:$4 sm:$0xff]   ;;  %v8460_v53 = vsub.s32 0, %v8457_v52  ;;  %v8463_v55 = vsub.s32 1, %v8457_v52 }
 0x12a   : > { %v7041_v24 = vld [vmem:[#allocation8 + $0x64] ss:$16 sps:$4 sm:$0xff]   ;;  %v7039_v25 = vld [vmem:[#allocation8 + $0x60] ss:$16 sps:$4 sm:$0xff]   ;;  %v7078_v3 = vld [vmem:[#allocation8 + $0x8] ss:$16 sps:$4 sm:$0xff]  }
 0x12b   : > { %591 = vmatpush1.bf16.msra.mxu0 %v7018_v6  ;;  %v7044_v26 = vld [vmem:[#allocation8 + $0x84] ss:$16 sps:$4 sm:$0xff]   ;;  %v7042_v27 = vld [vmem:[#allocation8 + $0x80] ss:$16 sps:$4 sm:$0xff]   ;;  %v503_v56 = vrot.slane %v498_v54, %v8460_v53  ;;  %v507_v57 = vrot.slane %v498_v54, %v8463_v55  ;;  %v7083_v5 = vld [vmem:[#allocation8 + $0x2c] ss:$16 sps:$4 sm:$0xff]  }
 0x12c   : > { %592 = vmatprep.subr.bf16.mxu0 %v7019_v7  ;;  %v7047_v28 = vld [vmem:[#allocation8 + $0xa4] ss:$16 sps:$4 sm:$0xff]   ;;  %v7045_v29 = vld [vmem:[#allocation8 + $0xa0] ss:$16 sps:$4 sm:$0xff]   ;;  %v7081_v6 = vld [vmem:[#allocation8 + $0x28] ss:$16 sps:$4 sm:$0xff]  }
 0x12d   : > { %v7050_v30 = vld [vmem:[#allocation8 + $0xc4] ss:$16 sps:$4 sm:$0xff]   ;;  %v7048_v31 = vld [vmem:[#allocation8 + $0xc0] ss:$16 sps:$4 sm:$0xff]   ;;  %v7086_v7 = vld [vmem:[#allocation8 + $0x4c] ss:$16 sps:$4 sm:$0xff]  }
 0x12e   : > { %v7053_v32 = vld [vmem:[#allocation8 + $0xe4] ss:$16 sps:$4 sm:$0xff]   ;;  %v7051_v33 = vld [vmem:[#allocation8 + $0xe0] ss:$16 sps:$4 sm:$0xff]   ;;  %v7090_v12 = vld [vmem:[#allocation8 + $0x88] ss:$16 sps:$4 sm:$0xff]  }
 0x12f   : > { %593 = vmatpush1.bf16.msra.mxu0 %v7021_v8  ;;  %v7056_v34 = vld [vmem:[#allocation8 + $0x104] ss:$16 sps:$4 sm:$0xff]   ;;  %v7054_v35 = vld [vmem:[#allocation8 + $0x100] ss:$16 sps:$4 sm:$0xff]   ;;  %v7084_v8 = vld [vmem:[#allocation8 + $0x48] ss:$16 sps:$4 sm:$0xff]  }
 0x130   : > { %594 = vmatprep.subr.bf16.mxu0 %v7022_v9  ;;  %v7059_v36 = vld [vmem:[#allocation8 + $0x124] ss:$16 sps:$4 sm:$0xff]   ;;  %v7057_v37 = vld [vmem:[#allocation8 + $0x120] ss:$16 sps:$4 sm:$0xff]   ;;  %v7089_v9 = vld [vmem:[#allocation8 + $0x6c] ss:$16 sps:$4 sm:$0xff]  }
 0x131   : > { %v7062_v38 = vld [vmem:[#allocation8 + $0x144] ss:$16 sps:$4 sm:$0xff]   ;;  %v7060_v39 = vld [vmem:[#allocation8 + $0x140] ss:$16 sps:$4 sm:$0xff]   ;;  %v7098_v15 = vld [vmem:[#allocation8 + $0xcc] ss:$16 sps:$4 sm:$0xff]  }
 0x132   : > { %v7065_v40 = vld [vmem:[#allocation8 + $0x164] ss:$16 sps:$4 sm:$0xff]   ;;  %v7063_v41 = vld [vmem:[#allocation8 + $0x160] ss:$16 sps:$4 sm:$0xff]   ;;  %s440_s24 = scalar_lea.vmem [#allocation16], %s6876_s21  ;;  %s6877_s25 = smul.u32 48, %s8448_s14 }
 0x133   : > { %595 = vmatpush1.bf16.msra.mxu0 %v7024_v10  ;;  %v7068_v42 = vld [vmem:[#allocation8 + $0x184] ss:$16 sps:$4 sm:$0xff]   ;;  %v7066_v43 = vld [vmem:[#allocation8 + $0x180] ss:$16 sps:$4 sm:$0xff]   ;;  %v7087_v10 = vld [vmem:[#allocation8 + $0x68] ss:$16 sps:$4 sm:$0xff]  }
 0x134   : > { %596 = vmatprep.subr.bf16.mxu0 %v7025_v11  ;;  %v7071_v44 = vld [vmem:[#allocation8 + $0x1a4] ss:$16 sps:$4 sm:$0xff]   ;;  %v7069_v45 = vld [vmem:[#allocation8 + $0x1a0] ss:$16 sps:$4 sm:$0xff]   ;;  %v7092_v11 = vld [vmem:[#allocation8 + $0x8c] ss:$16 sps:$4 sm:$0xff]  }
 0x135   : > { %v7074_v46 = vld [vmem:[#allocation8 + $0x1c4] ss:$16 sps:$4 sm:$0xff]   ;;  %v7072_v47 = vld [vmem:[#allocation8 + $0x1c0] ss:$16 sps:$4 sm:$0xff]   ;;  %s8980_s5 = scalar_lea.vmem [#allocation17], %s6877_s25  ;;  %s6808_s19 = smul.u32 768, %s8145_s15 }
 0x136   : > { %v7077_v48 = vld [vmem:[#allocation8 + $0x1e4] ss:$16 sps:$4 sm:$0xff]   ;;  %v7075_v49 = vld [vmem:[#allocation8 + $0x1e0] ss:$16 sps:$4 sm:$0xff]   ;;  %s5904_s1 = sshll.u32 %s8980_s5, 4  ;;  %s9120_s30 = sld [smem:[#allocation32_spill]]  ;;  %s9016_s1 = int_to_ptr.vmem [resolvable:$true] %s5904_s1 }
 0x137   : > { %597 = vmatpush1.bf16.msra.mxu0 %v7027_v13  ;;  %v7095_v13 = vld [vmem:[#allocation8 + $0xac] ss:$16 sps:$4 sm:$0xff]   ;;  %s5890_s18 = scalar_lea.sflag [#allocation4], %s8448_s14  ;;  %s7970_s22 = scalar_lea.vmem %s9016_s1, 768 }
 0x138   : > { %6097 = vmatprep.subr.msk.bf16.mxu0 %vm579_vm0, %v6096_v14  ;;  %v7093_v14 = vld [vmem:[#allocation8 + $0xa8] ss:$16 sps:$4 sm:$0xff]   ;;  %p7971_p10 = scmp.ne.s32.totalorder %s9016_s1, %s7970_s22  ;;  %p9122_p5 = scmp.ne.s32.totalorder %s9100_s28, 0 }
 0x139   : > { %s8073_s15 = smov [#allocation17]  }
 0x13a   : > { %p7972_p3 = pnand %p7971_p10, %p9122_p5  ;;  %s7974_s20 = sshll.u32 %s8073_s15, 4  ;;  %s7975_s20 = int_to_ptr.vmem [resolvable:$false] %s7974_s20 }
 0x13b   : > { %599 = vmatpush1.bf16.msra.mxu0 %v581_v16  ;;  %v7096_v16 = vld [vmem:[#allocation8 + $0xc8] ss:$16 sps:$4 sm:$0xff]   ;;  %s7976_s17 = scalar_lea.vmem %s7975_s20, 1536  ;;  %p7977_p11 = scmp.lt.s32.totalorder %s9016_s1, %s7975_s20 }
 0x13c   : > { %1037 = vmatprep.subr.bf16.mxu0 %v7032_v17  ;;  %v7101_v17 = vld [vmem:[#allocation8 + $0xec] ss:$16 sps:$4 sm:$0xff]   ;;  %s9121_s3 = smov %s9120_s30  ;;  %s9014_s26 = scalar_lea.hbm %s9120_s30, %s6808_s19 }
 0x13d   : > { %p7973_p13 = pneg %p7972_p3  ;;  %p7978_p9 = scmp.lt.s32.totalorder %s7976_s17, %s7970_s22 }
 0x13e   : > { %6098 = vmatmul.mubr.msk.bf16.vlgmr.msra.gmra.mrb[0].mxu0 %vm575_vm1, %v484_v18  ;;  %v7099_v18 = vld [vmem:[#allocation8 + $0xe8] ss:$16 sps:$4 sm:$0xff]  }
 0x13f   : > { %1038 = vmatpush1.bf16.msra.mxu0 %v7030_v19  ;;  %v7104_v19 = vld [vmem:[#allocation8 + $0x10c] ss:$16 sps:$4 sm:$0xff]   ;;  %p7979_p1 = por %p7978_p9, %p7977_p11 }
 0x140   : > { %1039 = vmatprep.subr.bf16.mxu0 %v7035_v20  ;;  %v7102_v20 = vld [vmem:[#allocation8 + $0x108] ss:$16 sps:$4 sm:$0xff]  }
 0x141   : > { %p7980_p12 = pnand %p7979_p1, %p7973_p13 }
 0x143   : > { %1040 = vmatpush1.bf16.msra.mxu0 %v7033_v21  ;;  %v7107_v21 = vld [vmem:[#allocation8 + $0x12c] ss:$16 sps:$4 sm:$0xff]  }
 0x144   : > { %1041 = vmatprep.subr.bf16.mxu0 %v7038_v22  ;;  %v7105_v22 = vld [vmem:[#allocation8 + $0x128] ss:$16 sps:$4 sm:$0xff]  }
 0x147   : > { %1042 = vmatpush1.bf16.msra.mxu0 %v7036_v23  ;;  %v7110_v23 = vld [vmem:[#allocation8 + $0x14c] ss:$16 sps:$4 sm:$0xff]  }
 0x148   : > { %1043 = vmatprep.subr.bf16.mxu0 %v7041_v24  ;;  %v7108_v24 = vld [vmem:[#allocation8 + $0x148] ss:$16 sps:$4 sm:$0xff]  }
 0x14b   : > { %1044 = vmatpush1.bf16.msra.mxu0 %v7039_v25  ;;  %v7113_v25 = vld [vmem:[#allocation8 + $0x16c] ss:$16 sps:$4 sm:$0xff]  }
 0x14c   : > { %1045 = vmatprep.subr.bf16.mxu0 %v7044_v26  ;;  %v7111_v26 = vld [vmem:[#allocation8 + $0x168] ss:$16 sps:$4 sm:$0xff]  }
 0x14f   : > { %1046 = vmatpush1.bf16.msra.mxu0 %v7042_v27  ;;  %v7116_v27 = vld [vmem:[#allocation8 + $0x18c] ss:$16 sps:$4 sm:$0xff]  }
 0x150   : > { %1047 = vmatprep.subr.bf16.mxu0 %v7047_v28  ;;  %v7114_v28 = vld [vmem:[#allocation8 + $0x188] ss:$16 sps:$4 sm:$0xff]  }
 0x153   : > { %1048 = vmatpush1.bf16.msra.mxu0 %v7045_v29  ;;  %v7119_v29 = vld [vmem:[#allocation8 + $0x1ac] ss:$16 sps:$4 sm:$0xff]  }
 0x154   : > { %1049 = vmatprep.subr.bf16.mxu0 %v7050_v30  ;;  %v7117_v30 = vld [vmem:[#allocation8 + $0x1a8] ss:$16 sps:$4 sm:$0xff]  }
 0x157   : > { %1050 = vmatpush1.bf16.msra.mxu0 %v7048_v31  ;;  %v7122_v31 = vld [vmem:[#allocation8 + $0x1cc] ss:$16 sps:$4 sm:$0xff]  }
 0x158   : > { %1051 = vmatprep.subr.bf16.mxu0 %v7053_v32  ;;  %v7120_v32 = vld [vmem:[#allocation8 + $0x1c8] ss:$16 sps:$4 sm:$0xff]  }
 0x15b   : > { %1052 = vmatpush1.bf16.msra.mxu0 %v7051_v33  ;;  %v7125_v33 = vld [vmem:[#allocation8 + $0x1ec] ss:$16 sps:$4 sm:$0xff]  }
 0x15c   : > { %1053 = vmatprep.subr.bf16.mxu0 %v7056_v34  ;;  %v1127_v34 = vld [vmem:[#allocation11] sm:$0xff] }
 0x15f   : > { %1054 = vmatpush1.bf16.msra.mxu0 %v7054_v35  ;;  %v1131_v35 = vld [vmem:[#allocation11 + $0x20] sm:$0xff] }
 0x160   : > { %1055 = vmatprep.subr.bf16.mxu0 %v7059_v36  ;;  %v7123_v36 = vld [vmem:[#allocation8 + $0x1e8] ss:$16 sps:$4 sm:$0xff]  }
 0x163   : > { %1056 = vmatpush1.bf16.msra.mxu0 %v7057_v37  ;;  %v6164_v37 = vcombine.high %v1127_v34, %v1131_v35 }
 0x164   : > { %1057 = vmatprep.subr.bf16.mxu0 %v7062_v38  ;;  %v1135_v38 = vld [vmem:[#allocation11 + $0x40] sm:$0xff] }
 0x167   : > { %1058 = vmatpush1.bf16.msra.mxu0 %v7060_v39  ;;  %v1139_v39 = vld [vmem:[#allocation11 + $0x60] sm:$0xff] }
 0x168   : > { %1059 = vmatprep.subr.bf16.mxu0 %v7065_v40  ;;  %v6163_v40 = vcombine.low %v1127_v34, %v1131_v35  ;;  %v1279_v34 = vld [vmem:[#allocation11 + $0x4c0] sm:$0xff] }
 0x169   : > { %v1283_v35 = vld [vmem:[#allocation11 + $0x4e0] sm:$0xff] }
 0x16b   : > { %1060 = vmatpush1.bf16.msra.mxu0 %v7063_v41  ;;  %v6172_v41 = vcombine.high %v1135_v38, %v1139_v39 }
 0x16c   : > { %1061 = vmatprep.subr.bf16.mxu0 %v7068_v42  ;;  %v1143_v42 = vld [vmem:[#allocation11 + $0x80] sm:$0xff] }
 0x16f   : > { %1062 = vmatpush1.bf16.msra.mxu0 %v7066_v43  ;;  %v1147_v43 = vld [vmem:[#allocation11 + $0xa0] sm:$0xff] }
 0x170   : > { %1063 = vmatprep.subr.bf16.mxu0 %v7071_v44  ;;  %v6171_v44 = vcombine.low %v1135_v38, %v1139_v39  ;;  %v6315_v38 = vcombine.low %v1279_v34, %v1283_v35 }
 0x173   : > { %1064 = vmatpush1.bf16.msra.mxu0 %v7069_v45  ;;  %v6180_v45 = vcombine.high %v1143_v42, %v1147_v43 }
 0x174   : > { %1065 = vmatprep.subr.bf16.mxu0 %v7074_v46  ;;  %v1151_v46 = vld [vmem:[#allocation11 + $0xc0] sm:$0xff] }
 0x177   : > { %1066 = vmatpush1.bf16.msra.mxu0 %v7072_v47  ;;  %v1155_v47 = vld [vmem:[#allocation11 + $0xe0] sm:$0xff] }
 0x178   : > { %1067 = vmatprep.subr.bf16.mxu0 %v7077_v48  ;;  %v6179_v48 = vcombine.low %v1143_v42, %v1147_v43  ;;  %v6187_v54 = vcombine.low %v1151_v46, %v1155_v47  ;;  %v1287_v42 = vld [vmem:[#allocation11 + $0x500] sm:$0xff] }
 0x179   : > { %v1291_v43 = vld [vmem:[#allocation11 + $0x520] sm:$0xff] }
 0x17b   : > { %1068 = vmatpush1.bf16.msra.mxu0 %v7075_v49  ;;  %v6188_v49 = vcombine.high %v1151_v46, %v1155_v47  ;;  %v6323_v46 = vcombine.low %v1287_v42, %v1291_v43 }
 0x17c   : > { %1078 = vmatprep.subr.bf16.mxu0 %v7080_v50  ;;  %v1159_v50 = vld [vmem:[#allocation11 + $0x100] sm:$0xff] }
 0x211   : > { %v620_v58 = vpop.f32.mrb[0].mxu0 }
 0x212   : > { %v621_v59 = vadd.f32 %v620_v58, %v503_v56  ;;  %v622_v60 = vpop.f32.mrb[1].mxu0  ;;  %v6196_v56 = vcombine.high %v1159_v50, %v1163_v51  ;;  %v1171_v58 = vld [vmem:[#allocation11 + $0x160] sm:$0xff] }
 0x213   : > { %v623_v61 = vadd.f32 %v622_v60, %v507_v57  ;;  %v624_v62 = vpop.f32.mrb[2].mxu0  ;;  %v1167_v57 = vld [vmem:[#allocation11 + $0x140] sm:$0xff] }
 0x214   : > { %v627_v63 = vmax.f32 %v621_v59, 0.0  ;;  %v625_v0 = vpop.f32.mrb[3].mxu0  ;;  %v6195_v59 = vcombine.low %v1159_v50, %v1163_v51  ;;  %v6204_v60 = vcombine.high %v1167_v57, %v1171_v58  ;;  %v1179_v62 = vld [vmem:[#allocation11 + $0x1a0] sm:$0xff] }
 0x215   : > { %v628_v1 = vmax.f32 %v623_v61, 0.0  ;;  %v1175_v61 = vld [vmem:[#allocation11 + $0x180] sm:$0xff] }
 0x216   : > { %v8467_v4 = vpack.c.bf16 %v627_v63, %v627_v63  ;;  %v6203_v63 = vcombine.low %v1167_v57, %v1171_v58  ;;  %v6212_v0 = vcombine.high %v1175_v61, %v1179_v62  ;;  %v1295_v50 = vld [vmem:[#allocation11 + $0x540] sm:$0xff] }
 0x217   : > { %v630_v2 = vpack.c.bf16 %v628_v1, %v628_v1  ;;  %v1183_v1 = vld [vmem:[#allocation11 + $0x1c0] sm:$0xff] }
 0x218   : > { %v1299_v51 = vld [vmem:[#allocation11 + $0x560] sm:$0xff] }
 0x219   : > { %1069 = vmatprep.mubr.bf16.mxu0 %v630_v2  ;;  %v6331_v57 = vcombine.low %v1295_v50, %v1299_v51 }
 0x21a   : > { %1070 = vmatmul.mubr.bf16.vlgmr.msra.gmra.mrb[4].mxu0 %v8467_v4 }
 0x21b   : > { %1079 = vmatpush1.bf16.msra.mxu0 %v7078_v3  ;;  %1110 = vmatprep.mubr.bf16.mxu0 %v630_v2  ;;  %v1187_v2 = vld [vmem:[#allocation11 + $0x1e0] sm:$0xff]  ;;  %v6211_v3 = vcombine.low %v1175_v61, %v1179_v62 }
 0x21c   : > { %1080 = vmatprep.subr.bf16.mxu0 %v7083_v5  ;;  %v1191_v5 = vld [vmem:[#allocation11 + $0x200] sm:$0xff] }
 0x21d   : > { %v1303_v61 = vld [vmem:[#allocation11 + $0x580] sm:$0xff] }
 0x21e   : > { %v1307_v62 = vld [vmem:[#allocation11 + $0x5a0] sm:$0xff] }
 0x21f   : > { %1081 = vmatpush1.bf16.msra.mxu0 %v7081_v6  ;;  %v1195_v6 = vld [vmem:[#allocation11 + $0x220] sm:$0xff] }
 0x220   : > { %1082 = vmatprep.subr.bf16.mxu0 %v7086_v7  ;;  %v1255_v7 = vld [vmem:[#allocation11 + $0x400] sm:$0xff] }
 0x223   : > { %1083 = vmatpush1.bf16.msra.mxu0 %v7084_v8  ;;  %v1259_v8 = vld [vmem:[#allocation11 + $0x420] sm:$0xff] }
 0x224   : > { %1084 = vmatprep.subr.bf16.mxu0 %v7089_v9  ;;  %v6219_v9 = vcombine.low %v1183_v1, %v1187_v2 }
 0x227   : > { %1085 = vmatpush1.bf16.msra.mxu0 %v7087_v10  ;;  %v6292_v10 = vcombine.high %v1255_v7, %v1259_v8 }
 0x228   : > { %1086 = vmatprep.subr.bf16.mxu0 %v7092_v11  ;;  %v8471_v11 = vld [vmem:[#allocation11 + $0x8] sm:$0xff] }
 0x229   : > { %2746 = vmatprep.subr.bf16.mxu1 %v6292_v10 }
 0x22b   : > { %1087 = vmatpush1.bf16.msra.mxu0 %v7090_v12  ;;  %v8473_v12 = vld [vmem:[#allocation11 + $0x28] sm:$0xff] }
 0x22c   : > { %1088 = vmatprep.subr.bf16.mxu0 %v7095_v13  ;;  %v6228_v13 = vcombine.high %v1191_v5, %v1195_v6 }
 0x22f   : > { %1089 = vmatpush1.bf16.msra.mxu0 %v7093_v14  ;;  %v6291_v14 = vcombine.low %v1255_v7, %v1259_v8 }
 0x230   : > { %1090 = vmatprep.subr.bf16.mxu0 %v7098_v15  ;;  %v1199_v15 = vld [vmem:[#allocation11 + $0x240] sm:$0xff] }
 0x231   : > { %2747 = vmatpush1.bf16.msra.mxu1 %v6291_v14  ;;  %v1323_v14 = vld [vmem:[#allocation11 + $0x620] sm:$0xff] }
 0x233   : > { %1091 = vmatpush1.bf16.msra.mxu0 %v7096_v16  ;;  %v1203_v16 = vld [vmem:[#allocation11 + $0x260] sm:$0xff] }
 0x234   : > { %1092 = vmatprep.subr.bf16.mxu0 %v7101_v17  ;;  %v6165_v17 = vcombine.low %v8471_v11, %v8473_v12 }
 0x237   : > { %1093 = vmatpush1.bf16.msra.mxu0 %v7099_v18  ;;  %v1263_v18 = vld [vmem:[#allocation11 + $0x440] sm:$0xff] }
 0x238   : > { %1094 = vmatprep.subr.bf16.mxu0 %v7104_v19  ;;  %v1267_v19 = vld [vmem:[#allocation11 + $0x460] sm:$0xff] }
 0x23b   : > { %1095 = vmatpush1.bf16.msra.mxu0 %v7102_v20  ;;  %v6227_v20 = vcombine.low %v1191_v5, %v1195_v6  ;;  %v1311_v5 = vld [vmem:[#allocation11 + $0x5c0] sm:$0xff] }
 0x23c   : > { %1096 = vmatprep.subr.bf16.mxu0 %v7107_v21  ;;  %v6300_v21 = vcombine.high %v1263_v18, %v1267_v19  ;;  %v1315_v6 = vld [vmem:[#allocation11 + $0x5e0] sm:$0xff] }
 0x23d   : > { %v6348_v8 = vcombine.high %v1311_v5, %v1315_v6 }
 0x23e   : > { %2748 = vmatprep.subr.bf16.mxu1 %v6300_v21  ;;  %v1331_v21 = vld [vmem:[#allocation11 + $0x660] sm:$0xff] }
 0x23f   : > { %1097 = vmatpush1.bf16.msra.mxu0 %v7105_v22  ;;  %v6299_v22 = vcombine.low %v1263_v18, %v1267_v19  ;;  %v6166_v19 = vcombine.high %v8471_v11, %v8473_v12  ;;  %v1172_v11 = vld [vmem:[#allocation11 + $0x168] sm:$0xff] }
 0x240   : > { %1098 = vmatprep.subr.bf16.mxu0 %v7110_v23  ;;  %v6236_v23 = vcombine.high %v1199_v15, %v1203_v16 }
 0x241   : > { %2749 = vmatpush1.bf16.msra.mxu1 %v6299_v22 }
 0x243   : > { %1099 = vmatpush1.bf16.msra.mxu0 %v7108_v24  ;;  %v1207_v24 = vld [vmem:[#allocation11 + $0x280] sm:$0xff] }
 0x244   : > { %1100 = vmatprep.subr.bf16.mxu0 %v7113_v25  ;;  %v1211_v25 = vld [vmem:[#allocation11 + $0x2a0] sm:$0xff] }
 0x247   : > { %1101 = vmatpush1.bf16.msra.mxu0 %v7111_v26  ;;  %v1271_v26 = vld [vmem:[#allocation11 + $0x480] sm:$0xff] }
 0x248   : > { %1102 = vmatprep.subr.bf16.mxu0 %v7116_v27  ;;  %v1275_v27 = vld [vmem:[#allocation11 + $0x4a0] sm:$0xff] }
 0x24b   : > { %1103 = vmatpush1.bf16.msra.mxu0 %v7114_v28  ;;  %v6235_v28 = vcombine.low %v1199_v15, %v1203_v16 }
 0x24c   : > { %1104 = vmatprep.subr.bf16.mxu0 %v7119_v29  ;;  %v6308_v29 = vcombine.high %v1271_v26, %v1275_v27 }
 0x24e   : > { %2750 = vmatprep.subr.bf16.mxu1 %v6308_v29  ;;  %v1347_v29 = vld [vmem:[#allocation11 + $0x6e0] sm:$0xff] }
 0x24f   : > { %1105 = vmatpush1.bf16.msra.mxu0 %v7117_v30  ;;  %v6307_v30 = vcombine.low %v1271_v26, %v1275_v27 }
 0x250   : > { %1106 = vmatprep.subr.bf16.mxu0 %v7122_v31  ;;  %v6244_v31 = vcombine.high %v1207_v24, %v1211_v25 }
 0x251   : > { %2751 = vmatpush1.bf16.msra.mxu1 %v6307_v30 }
 0x253   : > { %1107 = vmatpush1.bf16.msra.mxu0 %v7120_v32  ;;  %v1215_v32 = vld [vmem:[#allocation11 + $0x2c0] sm:$0xff] }
 0x254   : > { %1108 = vmatprep.subr.bf16.mxu0 %v7125_v33  ;;  %v1219_v33 = vld [vmem:[#allocation11 + $0x2e0] sm:$0xff] }
 0x255   : > { %v6252_v39 = vcombine.high %v1215_v32, %v1219_v33 }
 0x257   : > { %1109 = vmatpush1.bf16.msra.mxu0 %v7123_v36  ;;  %v6243_v36 = vcombine.low %v1207_v24, %v1211_v25  ;;  %v1335_v24 = vld [vmem:[#allocation11 + $0x680] sm:$0xff] }
 0x258   : > { %2705 = vmatprep.subr.bf16.mxu0 %v6164_v37  ;;  %v6316_v37 = vcombine.high %v1279_v34, %v1283_v35  ;;  %v1339_v25 = vld [vmem:[#allocation11 + $0x6a0] sm:$0xff] }
 0x259   : > { %v6372_v26 = vcombine.high %v1335_v24, %v1339_v25  ;;  %v6371_v27 = vcombine.low %v1335_v24, %v1339_v25  ;;  %v1180_v24 = vld [vmem:[#allocation11 + $0x1a8] sm:$0xff] }
 0x25a   : > { %1111 = vmatmul.mubr.bf16.vlgmr.msra.gmra.mrb[8].mxu0 %v8467_v4  ;;  %v6220_v4 = vcombine.high %v1183_v1, %v1187_v2  ;;  %2752 = vmatprep.subr.bf16.mxu1 %v6316_v37  ;;  %v6339_v1 = vcombine.low %v1303_v61, %v1307_v62  ;;  %v1363_v37 = vld [vmem:[#allocation11 + $0x760] sm:$0xff] }
 0x25b   : > { %2706 = vmatpush1.bf16.msra.mxu0 %v6163_v40  ;;  %v1223_v40 = vld [vmem:[#allocation11 + $0x300] sm:$0xff]  ;;  %2753 = vmatpush1.bf16.msra.mxu1 %v6315_v38 }
 0x25c   : > { %2707 = vmatprep.subr.bf16.mxu0 %v6172_v41  ;;  %v1227_v41 = vld [vmem:[#allocation11 + $0x320] sm:$0xff] }
 0x25d   : > { %v6260_v47 = vcombine.high %v1223_v40, %v1227_v41 }
 0x25f   : > { %2708 = vmatpush1.bf16.msra.mxu0 %v6171_v44  ;;  %v6251_v44 = vcombine.low %v1215_v32, %v1219_v33  ;;  %v1351_v32 = vld [vmem:[#allocation11 + $0x700] sm:$0xff] }
 0x260   : > { %2709 = vmatprep.subr.bf16.mxu0 %v6180_v45  ;;  %v6324_v45 = vcombine.high %v1287_v42, %v1291_v43  ;;  %v1355_v33 = vld [vmem:[#allocation11 + $0x720] sm:$0xff] }
 0x261   : > { %v6388_v34 = vcombine.high %v1351_v32, %v1355_v33  ;;  %v6387_v35 = vcombine.low %v1351_v32, %v1355_v33  ;;  %v1196_v32 = vld [vmem:[#allocation11 + $0x228] sm:$0xff] }
 0x262   : > { %2754 = vmatprep.subr.bf16.mxu1 %v6324_v45  ;;  %v1379_v45 = vld [vmem:[#allocation11 + $0x7e0] sm:$0xff] }
 0x263   : > { %2710 = vmatpush1.bf16.msra.mxu0 %v6179_v48  ;;  %v1231_v48 = vld [vmem:[#allocation11 + $0x340] sm:$0xff]  ;;  %2755 = vmatpush1.bf16.msra.mxu1 %v6323_v46 }
 0x264   : > { %2711 = vmatprep.subr.bf16.mxu0 %v6188_v49  ;;  %v1235_v49 = vld [vmem:[#allocation11 + $0x360] sm:$0xff] }
 0x265   : > { %v6268_v58 = vcombine.high %v1231_v48, %v1235_v49 }
 0x267   : > { %2712 = vmatpush1.bf16.msra.mxu0 %v6187_v54  ;;  %v6259_v54 = vcombine.low %v1223_v40, %v1227_v41  ;;  %v1367_v40 = vld [vmem:[#allocation11 + $0x780] sm:$0xff] }
 0x268   : > { %2713 = vmatprep.subr.bf16.mxu0 %v6196_v56  ;;  %v6332_v56 = vcombine.high %v1295_v50, %v1299_v51  ;;  %v1371_v41 = vld [vmem:[#allocation11 + $0x7a0] sm:$0xff] }
 0x269   : > { %v6404_v42 = vcombine.high %v1367_v40, %v1371_v41  ;;  %v6403_v43 = vcombine.low %v1367_v40, %v1371_v41  ;;  %v1212_v40 = vld [vmem:[#allocation11 + $0x2a8] sm:$0xff] }
 0x26a   : > { %2756 = vmatprep.subr.bf16.mxu1 %v6332_v56 }
 0x26b   : > { %2714 = vmatpush1.bf16.msra.mxu0 %v6195_v59  ;;  %v1239_v59 = vld [vmem:[#allocation11 + $0x380] sm:$0xff]  ;;  %2757 = vmatpush1.bf16.msra.mxu1 %v6331_v57 }
 0x26c   : > { %2715 = vmatprep.subr.bf16.mxu0 %v6204_v60  ;;  %v1243_v60 = vld [vmem:[#allocation11 + $0x3a0] sm:$0xff] }
 0x26d   : > { %v6276_v2 = vcombine.high %v1239_v59, %v1243_v60  ;;  %v6275_v7 = vcombine.low %v1239_v59, %v1243_v60 }
 0x26f   : > { %2716 = vmatpush1.bf16.msra.mxu0 %v6203_v63  ;;  %v6267_v63 = vcombine.low %v1231_v48, %v1235_v49  ;;  %v8479_v48 = vld [vmem:[#allocation11 + $0x10] sm:$0xff] }
 0x270   : > { %2717 = vmatprep.subr.bf16.mxu0 %v6212_v0  ;;  %v6340_v0 = vcombine.high %v1303_v61, %v1307_v62  ;;  %v8481_v49 = vld [vmem:[#allocation11 + $0x30] sm:$0xff] }
 0x271   : > { %v6168_v50 = vcombine.high %v8479_v48, %v8481_v49  ;;  %v6167_v51 = vcombine.low %v8479_v48, %v8481_v49 }
 0x272   : > { %2758 = vmatprep.subr.bf16.mxu1 %v6340_v0 }
 0x273   : > { %2718 = vmatpush1.bf16.msra.mxu0 %v6211_v3  ;;  %v1247_v3 = vld [vmem:[#allocation11 + $0x3c0] sm:$0xff]  ;;  %2759 = vmatpush1.bf16.msra.mxu1 %v6339_v1 }
 0x274   : > { %2719 = vmatprep.subr.bf16.mxu0 %v6220_v4  ;;  %v1251_v4 = vld [vmem:[#allocation11 + $0x3e0] sm:$0xff]  ;;  %2760 = vmatprep.subr.bf16.mxu1 %v6348_v8  ;;  %v1148_v8 = vld [vmem:[#allocation11 + $0xa8] sm:$0xff] }
 0x275   : > { %v6284_v10 = vcombine.high %v1247_v3, %v1251_v4  ;;  %v6283_v15 = vcombine.low %v1247_v3, %v1251_v4  ;;  %v1140_v3 = vld [vmem:[#allocation11 + $0x68] sm:$0xff] }
 0x277   : > { %2720 = vmatpush1.bf16.msra.mxu0 %v6219_v9  ;;  %v6347_v9 = vcombine.low %v1311_v5, %v1315_v6 }
 0x278   : > { %2721 = vmatprep.subr.bf16.mxu0 %v6228_v13  ;;  %v1319_v13 = vld [vmem:[#allocation11 + $0x600] sm:$0xff] }
 0x279   : > { %2761 = vmatpush1.bf16.msra.mxu1 %v6347_v9  ;;  %v6356_v16 = vcombine.high %v1319_v13, %v1323_v14  ;;  %v6355_v18 = vcombine.low %v1319_v13, %v1323_v14  ;;  %v1152_v13 = vld [vmem:[#allocation11 + $0xc8] sm:$0xff] }
 0x27a   : > { %v1156_v14 = vld [vmem:[#allocation11 + $0xe8] sm:$0xff] }
 0x27b   : > { %2722 = vmatpush1.bf16.msra.mxu0 %v6227_v20  ;;  %2762 = vmatprep.subr.bf16.mxu1 %v6356_v16  ;;  %v1327_v20 = vld [vmem:[#allocation11 + $0x640] sm:$0xff]  ;;  %v6190_v16 = vcombine.high %v1152_v13, %v1156_v14 }
 0x27c   : > { %2723 = vmatprep.subr.bf16.mxu0 %v6236_v23  ;;  %v6364_v22 = vcombine.high %v1327_v20, %v1331_v21  ;;  %v6363_v23 = vcombine.low %v1327_v20, %v1331_v21  ;;  %v6189_v20 = vcombine.low %v1152_v13, %v1156_v14 }
 0x27d   : > { %2763 = vmatpush1.bf16.msra.mxu1 %v6355_v18  ;;  %v1160_v18 = vld [vmem:[#allocation11 + $0x108] sm:$0xff] }
 0x27e   : > { %2764 = vmatprep.subr.bf16.mxu1 %v6364_v22  ;;  %v1168_v22 = vld [vmem:[#allocation11 + $0x148] sm:$0xff] }
 0x27f   : > { %2724 = vmatpush1.bf16.msra.mxu0 %v6235_v28  ;;  %v1343_v28 = vld [vmem:[#allocation11 + $0x6c0] sm:$0xff]  ;;  %v6205_v25 = vcombine.low %v1168_v22, %v1172_v11 }
 0x280   : > { %2725 = vmatprep.subr.bf16.mxu0 %v6244_v31  ;;  %v6380_v30 = vcombine.high %v1343_v28, %v1347_v29  ;;  %v6379_v31 = vcombine.low %v1343_v28, %v1347_v29  ;;  %v1188_v28 = vld [vmem:[#allocation11 + $0x1e8] sm:$0xff] }
 0x281   : > { %2765 = vmatpush1.bf16.msra.mxu1 %v6363_v23  ;;  %v1176_v23 = vld [vmem:[#allocation11 + $0x188] sm:$0xff] }
 0x282   : > { %2766 = vmatprep.subr.bf16.mxu1 %v6372_v26  ;;  %v6214_v26 = vcombine.high %v1176_v23, %v1180_v24  ;;  %v6213_v29 = vcombine.low %v1176_v23, %v1180_v24  ;;  %v1137_v24 = vld [vmem:[#allocation11 + $0x50] sm:$0xff] }
 0x283   : > { %2726 = vmatpush1.bf16.msra.mxu0 %v6243_v36  ;;  %v1359_v36 = vld [vmem:[#allocation11 + $0x740] sm:$0xff] }
 0x284   : > { %2727 = vmatprep.subr.bf16.mxu0 %v6252_v39  ;;  %v6396_v38 = vcombine.high %v1359_v36, %v1363_v37  ;;  %v6395_v39 = vcombine.low %v1359_v36, %v1363_v37  ;;  %v1204_v36 = vld [vmem:[#allocation11 + $0x268] sm:$0xff] }
 0x285   : > { %2767 = vmatpush1.bf16.msra.mxu1 %v6371_v27  ;;  %v1184_v27 = vld [vmem:[#allocation11 + $0x1c8] sm:$0xff] }
 0x286   : > { %2768 = vmatprep.subr.bf16.mxu1 %v6380_v30  ;;  %v6222_v30 = vcombine.high %v1184_v27, %v1188_v28  ;;  %v6221_v33 = vcombine.low %v1184_v27, %v1188_v28 }
 0x287   : > { %2728 = vmatpush1.bf16.msra.mxu0 %v6251_v44  ;;  %v1375_v44 = vld [vmem:[#allocation11 + $0x7c0] sm:$0xff] }
 0x288   : > { %2729 = vmatprep.subr.bf16.mxu0 %v6260_v47  ;;  %v6412_v46 = vcombine.high %v1375_v44, %v1379_v45  ;;  %v6411_v47 = vcombine.low %v1375_v44, %v1379_v45  ;;  %v1220_v44 = vld [vmem:[#allocation11 + $0x2e8] sm:$0xff] }
 0x289   : > { %2769 = vmatpush1.bf16.msra.mxu1 %v6379_v31  ;;  %v1192_v31 = vld [vmem:[#allocation11 + $0x208] sm:$0xff] }
 0x28a   : > { %2770 = vmatprep.subr.bf16.mxu1 %v6388_v34  ;;  %v6230_v34 = vcombine.high %v1192_v31, %v1196_v32  ;;  %v6229_v37 = vcombine.low %v1192_v31, %v1196_v32 }
 0x28b   : > { %2730 = vmatpush1.bf16.msra.mxu0 %v6259_v54  ;;  %v8487_v54 = vld [vmem:[#allocation10] sm:$0xf] }
 0x28c   : > { %2731 = vmatprep.subr.bf16.mxu0 %v6268_v58  ;;  %v700_v56 = vrot.slane %v8487_v54, %v8460_v53  ;;  %v704_v57 = vrot.slane %v8487_v54, %v8463_v55 }
 0x28d   : > { %2771 = vmatpush1.bf16.msra.mxu1 %v6387_v35  ;;  %v1200_v35 = vld [vmem:[#allocation11 + $0x248] sm:$0xff] }
 0x28e   : > { %2772 = vmatprep.subr.bf16.mxu1 %v6396_v38  ;;  %v6238_v38 = vcombine.high %v1200_v35, %v1204_v36  ;;  %v6237_v41 = vcombine.low %v1200_v35, %v1204_v36  ;;  %v1276_v35 = vld [vmem:[#allocation11 + $0x4a8] sm:$0xff] }
 0x28f   : > { %2732 = vmatpush1.bf16.msra.mxu0 %v6267_v63 }
 0x290   : > { %2733 = vmatprep.subr.bf16.mxu0 %v6276_v2  ;;  %v1136_v2 = vld [vmem:[#allocation11 + $0x48] sm:$0xff] }
 0x291   : > { %2773 = vmatpush1.bf16.msra.mxu1 %v6395_v39  ;;  %v6174_v6 = vcombine.high %v1136_v2, %v1140_v3  ;;  %v6173_v9 = vcombine.low %v1136_v2, %v1140_v3  ;;  %v1208_v39 = vld [vmem:[#allocation11 + $0x288] sm:$0xff]  ;;  %v8507_v2 = vsub.s32 3, %v8457_v52 }
 0x292   : > { %2774 = vmatprep.subr.bf16.mxu1 %v6404_v42  ;;  %v6246_v42 = vcombine.high %v1208_v39, %v1212_v40  ;;  %v6245_v45 = vcombine.low %v1208_v39, %v1212_v40  ;;  %v1153_v40 = vld [vmem:[#allocation11 + $0xd0] sm:$0xff] }
 0x293   : > { %2734 = vmatpush1.bf16.msra.mxu0 %v6275_v7  ;;  %v1144_v7 = vld [vmem:[#allocation11 + $0x88] sm:$0xff] }
 0x294   : > { %2735 = vmatprep.subr.bf16.mxu0 %v6284_v10  ;;  %v6182_v10 = vcombine.high %v1144_v7, %v1148_v8 }
 0x295   : > { %2775 = vmatpush1.bf16.msra.mxu1 %v6403_v43  ;;  %v1216_v43 = vld [vmem:[#allocation11 + $0x2c8] sm:$0xff] }
 0x296   : > { %2776 = vmatprep.subr.bf16.mxu1 %v6412_v46  ;;  %v6254_v46 = vcombine.high %v1216_v43, %v1220_v44 }
 0x297   : > { %2736 = vmatpush1.bf16.msra.mxu0 %v6283_v15  ;;  %v6181_v15 = vcombine.low %v1144_v7, %v1148_v8  ;;  %v1252_v7 = vld [vmem:[#allocation11 + $0x3e8] sm:$0xff] }
 0x298   : > { %2787 = vmatprep.subr.bf16.mxu0 %v6166_v19  ;;  %v1164_v19 = vld [vmem:[#allocation11 + $0x128] sm:$0xff] }
 0x299   : > { %2777 = vmatpush1.bf16.msra.mxu1 %v6411_v47  ;;  %v6198_v21 = vcombine.high %v1160_v18, %v1164_v19  ;;  %v6197_v12 = vcombine.low %v1160_v18, %v1164_v19  ;;  %v1224_v47 = vld [vmem:[#allocation11 + $0x308] sm:$0xff] }
 0x29a   : > { %2869 = vmatprep.subr.bf16.mxu1 %v6168_v50  ;;  %v1228_v50 = vld [vmem:[#allocation11 + $0x328] sm:$0xff] }
 0x2ed   : > { %v1071_v58 = vpop.f32.mrb[4].mxu0 }
 0x2ee   : > { %v1072_v59 = vadd.f32 %v1071_v58, %v700_v56  ;;  %v1073_v60 = vpop.f32.mrb[5].mxu0  ;;  %v6253_v56 = vcombine.low %v1216_v43, %v1220_v44  ;;  %v1232_v58 = vld [vmem:[#allocation11 + $0x348] sm:$0xff] }
 0x2ef   : > { %v1074_v61 = vadd.f32 %v1073_v60, %v704_v57  ;;  %v1075_v62 = vpop.f32.mrb[6].mxu0  ;;  %v6262_v57 = vcombine.high %v1224_v47, %v1228_v50  ;;  %v6261_v60 = vcombine.low %v1224_v47, %v1228_v50  ;;  %v1284_v43 = vld [vmem:[#allocation11 + $0x4e8] sm:$0xff] }
 0x2f0   : > { %v1119_v63 = vmax.f32 %v1072_v59, 0.0  ;;  %v1076_v0 = vpop.f32.mrb[7].mxu0  ;;  %v1236_v59 = vld [vmem:[#allocation11 + $0x368] sm:$0xff] }
 0x2f1   : > { %v1120_v1 = vmax.f32 %v1074_v61, 0.0  ;;  %v6270_v61 = vcombine.high %v1232_v58, %v1236_v59  ;;  %v1240_v62 = vld [vmem:[#allocation11 + $0x388] sm:$0xff]  ;;  %v8504_v0 = vsub.s32 2, %v8457_v52 }
 0x2f2   : > { %v8495_v5 = vpack.c.bf16 %v1119_v63, %v1119_v63  ;;  %v1244_v63 = vld [vmem:[#allocation11 + $0x3a8] sm:$0xff] }
 0x2f3   : > { %v8493_v4 = vpack.c.bf16 %v1120_v1, %v1120_v1  ;;  %v6269_v1 = vcombine.low %v1232_v58, %v1236_v59  ;;  %v6278_v3 = vcombine.high %v1240_v62, %v1244_v63  ;;  %v708_v8 = vrot.slane %v8487_v54, %v8504_v0  ;;  %v1288_v47 = vld [vmem:[#allocation11 + $0x508] sm:$0xff] }
 0x2f4   : > { %v1292_v50 = vld [vmem:[#allocation11 + $0x528] sm:$0xff] }
 0x2f5   : > { %2737 = vmatprep.mubr.bf16.mxu0 %v8493_v4  ;;  %v6326_v59 = vcombine.high %v1288_v47, %v1292_v50 }
 0x2f6   : > { %2738 = vmatmul.mubr.bf16.vlgmr.msra.gmra.mrb[12].mxu0 %v8495_v5 }
 0x2f7   : > { %2788 = vmatpush1.bf16.msra.mxu0 %v6165_v17  ;;  %2819 = vmatprep.mubr.bf16.mxu0 %v8493_v4  ;;  %v6206_v17 = vcombine.high %v1168_v22, %v1172_v11 }
 0x2f8   : > { %2789 = vmatprep.subr.bf16.mxu0 %v6174_v6  ;;  %v1248_v6 = vld [vmem:[#allocation11 + $0x3c8] sm:$0xff] }
 0x2f9   : > { %v6286_v13 = vcombine.high %v1248_v6, %v1252_v7  ;;  %v6285_v22 = vcombine.low %v1248_v6, %v1252_v7 }
 0x2fb   : > { %2790 = vmatpush1.bf16.msra.mxu0 %v6173_v9  ;;  %v712_v9 = vrot.slane %v8487_v54, %v8507_v2  ;;  %v1264_v54 = vld [vmem:[#allocation11 + $0x448] sm:$0xff] }
 0x2fc   : > { %2791 = vmatprep.subr.bf16.mxu0 %v6182_v10  ;;  %v6277_v10 = vcombine.low %v1240_v62, %v1244_v63  ;;  %v1296_v62 = vld [vmem:[#allocation11 + $0x548] sm:$0xff] }
 0x2fd   : > { %v1300_v63 = vld [vmem:[#allocation11 + $0x568] sm:$0xff] }
 0x2fe   : > { %v6334_v7 = vcombine.high %v1296_v62, %v1300_v63 }
 0x2ff   : > { %2792 = vmatpush1.bf16.msra.mxu0 %v6181_v15  ;;  %v1256_v15 = vld [vmem:[#allocation11 + $0x408] sm:$0xff] }
 0x300   : > { %2793 = vmatprep.subr.bf16.mxu0 %v6190_v16  ;;  %v1260_v16 = vld [vmem:[#allocation11 + $0x428] sm:$0xff] }
 0x301   : > { %v6293_v28 = vcombine.low %v1256_v15, %v1260_v16 }
 0x303   : > { %2794 = vmatpush1.bf16.msra.mxu0 %v6189_v20 }
 0x304   : > { %2795 = vmatprep.subr.bf16.mxu0 %v6198_v21 }
 0x307   : > { %2796 = vmatpush1.bf16.msra.mxu0 %v6197_v12 }
 0x308   : > { %2797 = vmatprep.subr.bf16.mxu0 %v6206_v17  ;;  %v6294_v17 = vcombine.high %v1256_v15, %v1260_v16  ;;  %v6333_v15 = vcombine.low %v1296_v62, %v1300_v63  ;;  %v1229_v62 = vld [vmem:[#allocation11 + $0x330] sm:$0xff]  ;;  %v1352_v63 = vld [vmem:[#allocation11 + $0x708] sm:$0xff] }
 0x30b   : > { %2798 = vmatpush1.bf16.msra.mxu0 %v6205_v25  ;;  %v1141_v25 = vld [vmem:[#allocation11 + $0x70] sm:$0xff] }
 0x30c   : > { %2799 = vmatprep.subr.bf16.mxu0 %v6214_v26  ;;  %v1268_v26 = vld [vmem:[#allocation11 + $0x468] sm:$0xff]  ;;  %v6176_v31 = vcombine.high %v1137_v24, %v1141_v25  ;;  %v6175_v36 = vcombine.low %v1137_v24, %v1141_v25  ;;  %v1193_v24 = vld [vmem:[#allocation11 + $0x210] sm:$0xff] }
 0x30d   : > { %v6302_v32 = vcombine.high %v1264_v54, %v1268_v26  ;;  %v1197_v25 = vld [vmem:[#allocation11 + $0x230] sm:$0xff] }
 0x30f   : > { %2800 = vmatpush1.bf16.msra.mxu0 %v6213_v29 }
 0x310   : > { %2801 = vmatprep.subr.bf16.mxu0 %v6222_v30  ;;  %v1145_v30 = vld [vmem:[#allocation11 + $0x90] sm:$0xff] }
 0x313   : > { %2802 = vmatpush1.bf16.msra.mxu0 %v6221_v33  ;;  %v1149_v33 = vld [vmem:[#allocation11 + $0xb0] sm:$0xff] }
 0x314   : > { %2803 = vmatprep.subr.bf16.mxu0 %v6230_v34  ;;  %v1272_v34 = vld [vmem:[#allocation11 + $0x488] sm:$0xff]  ;;  %v6183_v44 = vcombine.low %v1145_v30, %v1149_v33 }
 0x315   : > { %v6310_v39 = vcombine.high %v1272_v34, %v1276_v35  ;;  %v6309_v48 = vcombine.low %v1272_v34, %v1276_v35  ;;  %v1205_v34 = vld [vmem:[#allocation11 + $0x270] sm:$0xff]  ;;  %v1328_v35 = vld [vmem:[#allocation11 + $0x648] sm:$0xff] }
 0x317   : > { %2804 = vmatpush1.bf16.msra.mxu0 %v6229_v37  ;;  %v6301_v37 = vcombine.low %v1264_v54, %v1268_v26  ;;  %v1320_v54 = vld [vmem:[#allocation11 + $0x608] sm:$0xff] }
 0x318   : > { %2805 = vmatprep.subr.bf16.mxu0 %v6238_v38  ;;  %v6184_v38 = vcombine.high %v1145_v30, %v1149_v33  ;;  %v1324_v26 = vld [vmem:[#allocation11 + $0x628] sm:$0xff]  ;;  %v1201_v33 = vld [vmem:[#allocation11 + $0x250] sm:$0xff] }
 0x31b   : > { %2806 = vmatpush1.bf16.msra.mxu0 %v6237_v41  ;;  %v1157_v41 = vld [vmem:[#allocation11 + $0xf0] sm:$0xff] }
 0x31c   : > { %2807 = vmatprep.subr.bf16.mxu0 %v6246_v42  ;;  %v1280_v42 = vld [vmem:[#allocation11 + $0x4c8] sm:$0xff]  ;;  %v6192_v49 = vcombine.high %v1153_v40, %v1157_v41 }
 0x31f   : > { %2808 = vmatpush1.bf16.msra.mxu0 %v6245_v45  ;;  %v1161_v45 = vld [vmem:[#allocation11 + $0x110] sm:$0xff] }
 0x320   : > { %2809 = vmatprep.subr.bf16.mxu0 %v6254_v46  ;;  %v1165_v46 = vld [vmem:[#allocation11 + $0x130] sm:$0xff] }
 0x321   : > { %v6200_v58 = vcombine.high %v1161_v45, %v1165_v46 }
 0x323   : > { %2810 = vmatpush1.bf16.msra.mxu0 %v6253_v56  ;;  %v6191_v56 = vcombine.low %v1153_v40, %v1157_v41  ;;  %v1209_v41 = vld [vmem:[#allocation11 + $0x290] sm:$0xff] }
 0x324   : > { %2811 = vmatprep.subr.bf16.mxu0 %v6262_v57  ;;  %v6317_v57 = vcombine.low %v1280_v42, %v1284_v43 }
 0x327   : > { %2812 = vmatpush1.bf16.msra.mxu0 %v6261_v60  ;;  %v1169_v60 = vld [vmem:[#allocation11 + $0x150] sm:$0xff] }
 0x328   : > { %2813 = vmatprep.subr.bf16.mxu0 %v6270_v61  ;;  %v1173_v61 = vld [vmem:[#allocation11 + $0x170] sm:$0xff] }
 0x329   : > { %v6208_v6 = vcombine.high %v1169_v60, %v1173_v61 }
 0x32b   : > { %2814 = vmatpush1.bf16.msra.mxu0 %v6269_v1  ;;  %v6199_v1 = vcombine.low %v1161_v45, %v1165_v46  ;;  %v1217_v46 = vld [vmem:[#allocation11 + $0x2d0] sm:$0xff] }
 0x32c   : > { %2815 = vmatprep.subr.bf16.mxu0 %v6278_v3  ;;  %v6325_v3 = vcombine.low %v1288_v47, %v1292_v50  ;;  %v1221_v47 = vld [vmem:[#allocation11 + $0x2f0] sm:$0xff]  ;;  %v1344_v50 = vld [vmem:[#allocation11 + $0x6c8] sm:$0xff] }
 0x32d   : > { %v1112_v14 = vpop.f32.mrb[8].mxu0 }
 0x32e   : > { %v1113_v18 = vadd.f32 %v1112_v14, %v708_v8  ;;  %v1114_v19 = vpop.f32.mrb[9].mxu0  ;;  %v1177_v8 = vld [vmem:[#allocation11 + $0x190] sm:$0xff]  ;;  %v6207_v14 = vcombine.low %v1169_v60, %v1173_v61 }
 0x32f   : > { %v1115_v20 = vadd.f32 %v1114_v19, %v712_v9  ;;  %v1116_v21 = vpop.f32.mrb[10].mxu0  ;;  %2816 = vmatpush1.bf16.msra.mxu0 %v6277_v10  ;;  %v1181_v9 = vld [vmem:[#allocation11 + $0x1b0] sm:$0xff]  ;;  %v1304_v10 = vld [vmem:[#allocation11 + $0x588] sm:$0xff] }
 0x330   : > { %v1121_v11 = vmax.f32 %v1113_v18, 0.0  ;;  %v1117_v12 = vpop.f32.mrb[11].mxu0  ;;  %2817 = vmatprep.subr.bf16.mxu0 %v6286_v13  ;;  %v1308_v13 = vld [vmem:[#allocation11 + $0x5a8] sm:$0xff]  ;;  %v6216_v16 = vcombine.high %v1177_v8, %v1181_v9  ;;  %v1185_v19 = vld [vmem:[#allocation11 + $0x1d0] sm:$0xff] }
 0x331   : > { %v1122_v23 = vmax.f32 %v1115_v20, 0.0  ;;  %v6342_v18 = vcombine.high %v1304_v10, %v1308_v13  ;;  %v1189_v20 = vld [vmem:[#allocation11 + $0x1f0] sm:$0xff]  ;;  %v1312_v21 = vld [vmem:[#allocation11 + $0x5c8] sm:$0xff]  ;;  %v6341_v12 = vcombine.low %v1304_v10, %v1308_v13 }
 0x332   : > { %v8515_v29 = vpack.c.bf16 %v1121_v11, %v1121_v11  ;;  %v6215_v11 = vcombine.low %v1177_v8, %v1181_v9  ;;  %v1225_v61 = vld [vmem:[#allocation11 + $0x310] sm:$0xff]  ;;  %v1360_v13 = vld [vmem:[#allocation11 + $0x748] sm:$0xff] }
 0x333   : > { %v8513_v27 = vpack.c.bf16 %v1122_v23, %v1122_v23  ;;  %2818 = vmatpush1.bf16.msra.mxu0 %v6285_v22  ;;  %v1316_v22 = vld [vmem:[#allocation11 + $0x5e8] sm:$0xff]  ;;  %v1233_v9 = vld [vmem:[#allocation11 + $0x350] sm:$0xff] }
 0x334   : > { %2828 = vmatprep.subr.bf16.mxu0 %v6294_v17  ;;  %v6224_v17 = vcombine.high %v1185_v19, %v1189_v20  ;;  %v6350_v23 = vcombine.high %v1312_v21, %v1316_v22  ;;  %v6349_v30 = vcombine.low %v1312_v21, %v1316_v22  ;;  %v1237_v10 = vld [vmem:[#allocation11 + $0x370] sm:$0xff]  ;;  %v1368_v22 = vld [vmem:[#allocation11 + $0x788] sm:$0xff] }
 0x335   : > { %2778 = vmatprep.mubr.bf16.mxu1 %v8513_v27  ;;  %v1245_v21 = vld [vmem:[#allocation11 + $0x3b0] sm:$0xff] }
 0x336   : > { %2779 = vmatmul.mubr.bf16.vlgmr.msra.gmra.mrb[0].mxu1 %v8515_v29  ;;  %2820 = vmatmul.mubr.bf16.vlgmr.msra.gmra.mrb[16].mxu0 %v8495_v5 }
 0x337   : > { %2870 = vmatpush1.bf16.msra.mxu1 %v6167_v51  ;;  %2829 = vmatpush1.bf16.msra.mxu0 %v6293_v28  ;;  %v6318_v51 = vcombine.high %v1280_v42, %v1284_v43  ;;  %v6223_v28 = vcombine.low %v1185_v19, %v1189_v20  ;;  %v1213_v42 = vld [vmem:[#allocation11 + $0x2b0] sm:$0xff]  ;;  %v1336_v43 = vld [vmem:[#allocation11 + $0x688] sm:$0xff] }
 0x338   : > { %2860 = vmatprep.mubr.bf16.mxu0 %v8513_v27  ;;  %2901 = vmatprep.mubr.bf16.mxu1 %v8493_v4  ;;  %v1241_v20 = vld [vmem:[#allocation11 + $0x390] sm:$0xff] }
 0x339   : > { %2871 = vmatprep.subr.bf16.mxu1 %v6176_v31  ;;  %2830 = vmatprep.subr.bf16.mxu0 %v6302_v32  ;;  %v6232_v31 = vcombine.high %v1193_v24, %v1197_v25  ;;  %v6358_v32 = vcombine.high %v1320_v54, %v1324_v26 }
 0x33b   : > { %2872 = vmatpush1.bf16.msra.mxu1 %v6175_v36  ;;  %2831 = vmatpush1.bf16.msra.mxu0 %v6301_v37  ;;  %v1332_v36 = vld [vmem:[#allocation11 + $0x668] sm:$0xff]  ;;  %v6231_v37 = vcombine.low %v1193_v24, %v1197_v25  ;;  %v1249_v25 = vld [vmem:[#allocation11 + $0x3d0] sm:$0xff] }
 0x33c   : > { %2873 = vmatprep.subr.bf16.mxu1 %v6184_v38  ;;  %2832 = vmatprep.subr.bf16.mxu0 %v6310_v39  ;;  %v6357_v38 = vcombine.low %v1320_v54, %v1324_v26  ;;  %v6240_v39 = vcombine.high %v1201_v33, %v1205_v34  ;;  %v6366_v40 = vcombine.high %v1328_v35, %v1332_v36  ;;  %v1253_v54 = vld [vmem:[#allocation11 + $0x3f0] sm:$0xff]  ;;  %v1376_v26 = vld [vmem:[#allocation11 + $0x7c8] sm:$0xff] }
 0x33f   : > { %2874 = vmatpush1.bf16.msra.mxu1 %v6183_v44  ;;  %2833 = vmatpush1.bf16.msra.mxu0 %v6309_v48  ;;  %v1340_v44 = vld [vmem:[#allocation11 + $0x6a8] sm:$0xff]  ;;  %v6239_v48 = vcombine.low %v1201_v33, %v1205_v34  ;;  %v1257_v34 = vld [vmem:[#allocation11 + $0x410] sm:$0xff] }
 0x340   : > { %2875 = vmatprep.subr.bf16.mxu1 %v6192_v49  ;;  %2834 = vmatprep.subr.bf16.mxu0 %v6318_v51  ;;  %v6365_v49 = vcombine.low %v1328_v35, %v1332_v36  ;;  %v6248_v51 = vcombine.high %v1209_v41, %v1213_v42  ;;  %v6374_v45 = vcombine.high %v1336_v43, %v1340_v44  ;;  %v1261_v35 = vld [vmem:[#allocation11 + $0x430] sm:$0xff]  ;;  %v1130_v36 = vld [vmem:[#allocation11 + $0x18] sm:$0xff] }
 0x343   : > { %2876 = vmatpush1.bf16.msra.mxu1 %v6191_v56  ;;  %2835 = vmatpush1.bf16.msra.mxu0 %v6317_v57  ;;  %v1348_v56 = vld [vmem:[#allocation11 + $0x6e8] sm:$0xff]  ;;  %v6247_v57 = vcombine.low %v1209_v41, %v1213_v42  ;;  %v1265_v42 = vld [vmem:[#allocation11 + $0x450] sm:$0xff] }
 0x344   : > { %2877 = vmatprep.subr.bf16.mxu1 %v6200_v58  ;;  %2836 = vmatprep.subr.bf16.mxu0 %v6326_v59  ;;  %v6373_v58 = vcombine.low %v1336_v43, %v1340_v44  ;;  %v6256_v59 = vcombine.high %v1217_v46, %v1221_v47  ;;  %v6382_v60 = vcombine.high %v1344_v50, %v1348_v56  ;;  %v1269_v43 = vld [vmem:[#allocation11 + $0x470] sm:$0xff]  ;;  %v1138_v44 = vld [vmem:[#allocation11 + $0x58] sm:$0xff] }
 0x347   : > { %2878 = vmatpush1.bf16.msra.mxu1 %v6199_v1  ;;  %2837 = vmatpush1.bf16.msra.mxu0 %v6325_v3  ;;  %v1356_v1 = vld [vmem:[#allocation11 + $0x728] sm:$0xff]  ;;  %v6255_v3 = vcombine.low %v1217_v46, %v1221_v47  ;;  %v1273_v47 = vld [vmem:[#allocation11 + $0x490] sm:$0xff] }
 0x348   : > { %2879 = vmatprep.subr.bf16.mxu1 %v6208_v6  ;;  %2838 = vmatprep.subr.bf16.mxu0 %v6334_v7  ;;  %v6381_v6 = vcombine.low %v1344_v50, %v1348_v56  ;;  %v6264_v7 = vcombine.high %v1225_v61, %v1229_v62  ;;  %v6390_v8 = vcombine.high %v1352_v63, %v1356_v1  ;;  %v1277_v50 = vld [vmem:[#allocation11 + $0x4b0] sm:$0xff]  ;;  %v1146_v56 = vld [vmem:[#allocation11 + $0x98] sm:$0xff] }
 0x34b   : > { %2880 = vmatpush1.bf16.msra.mxu1 %v6207_v14  ;;  %2839 = vmatpush1.bf16.msra.mxu0 %v6333_v15  ;;  %v1364_v14 = vld [vmem:[#allocation11 + $0x768] sm:$0xff]  ;;  %v6263_v15 = vcombine.low %v1225_v61, %v1229_v62  ;;  %v1281_v62 = vld [vmem:[#allocation11 + $0x4d0] sm:$0xff] }
 0x34c   : > { %2881 = vmatprep.subr.bf16.mxu1 %v6216_v16  ;;  %2840 = vmatprep.subr.bf16.mxu0 %v6342_v18  ;;  %v6389_v16 = vcombine.low %v1352_v63, %v1356_v1  ;;  %v6272_v18 = vcombine.high %v1233_v9, %v1237_v10  ;;  %v6398_v19 = vcombine.high %v1360_v13, %v1364_v14  ;;  %v1285_v63 = vld [vmem:[#allocation11 + $0x4f0] sm:$0xff]  ;;  %v1154_v1 = vld [vmem:[#allocation11 + $0xd8] sm:$0xff] }
 0x34f   : > { %2882 = vmatpush1.bf16.msra.mxu1 %v6215_v11  ;;  %2841 = vmatpush1.bf16.msra.mxu0 %v6341_v12  ;;  %v1372_v11 = vld [vmem:[#allocation11 + $0x7a8] sm:$0xff]  ;;  %v6271_v12 = vcombine.low %v1233_v9, %v1237_v10  ;;  %v1289_v10 = vld [vmem:[#allocation11 + $0x510] sm:$0xff] }
 0x350   : > { %2883 = vmatprep.subr.bf16.mxu1 %v6224_v17  ;;  %2842 = vmatprep.subr.bf16.mxu0 %v6350_v23  ;;  %v6397_v17 = vcombine.low %v1360_v13, %v1364_v14  ;;  %v6280_v23 = vcombine.high %v1241_v20, %v1245_v21  ;;  %v6406_v24 = vcombine.high %v1368_v22, %v1372_v11  ;;  %v1293_v13 = vld [vmem:[#allocation11 + $0x530] sm:$0xff]  ;;  %v1166_v14 = vld [vmem:[#allocation11 + $0x138] sm:$0xff] }
 0x353   : > { %2884 = vmatpush1.bf16.msra.mxu1 %v6223_v28  ;;  %2843 = vmatpush1.bf16.msra.mxu0 %v6349_v30  ;;  %v1380_v28 = vld [vmem:[#allocation11 + $0x7e8] sm:$0xff]  ;;  %v6279_v30 = vcombine.low %v1241_v20, %v1245_v21  ;;  %v1297_v20 = vld [vmem:[#allocation11 + $0x550] sm:$0xff] }
 0x354   : > { %2885 = vmatprep.subr.bf16.mxu1 %v6232_v31  ;;  %2844 = vmatprep.subr.bf16.mxu0 %v6358_v32  ;;  %v6405_v31 = vcombine.low %v1368_v22, %v1372_v11  ;;  %v6288_v32 = vcombine.high %v1249_v25, %v1253_v54  ;;  %v6414_v33 = vcombine.high %v1376_v26, %v1380_v28  ;;  %v1301_v21 = vld [vmem:[#allocation11 + $0x570] sm:$0xff]  ;;  %v1170_v22 = vld [vmem:[#allocation11 + $0x158] sm:$0xff] }
 0x355   : > { %v1174_v11 = vld [vmem:[#allocation11 + $0x178] sm:$0xff] }
 0x357   : > { %2886 = vmatpush1.bf16.msra.mxu1 %v6231_v37  ;;  %2845 = vmatpush1.bf16.msra.mxu0 %v6357_v38  ;;  %v1134_v37 = vld [vmem:[#allocation11 + $0x38] sm:$0xff]  ;;  %v6287_v38 = vcombine.low %v1249_v25, %v1253_v54  ;;  %v1305_v25 = vld [vmem:[#allocation11 + $0x590] sm:$0xff] }
 0x358   : > { %2887 = vmatprep.subr.bf16.mxu1 %v6240_v39  ;;  %2846 = vmatprep.subr.bf16.mxu0 %v6366_v40  ;;  %v6413_v39 = vcombine.low %v1376_v26, %v1380_v28  ;;  %v6296_v40 = vcombine.high %v1257_v34, %v1261_v35  ;;  %v6170_v41 = vcombine.high %v1130_v36, %v1134_v37  ;;  %v1309_v54 = vld [vmem:[#allocation11 + $0x5b0] sm:$0xff]  ;;  %v1178_v26 = vld [vmem:[#allocation11 + $0x198] sm:$0xff] }
 0x359   : > { %v1182_v28 = vld [vmem:[#allocation11 + $0x1b8] sm:$0xff] }
 0x35b   : > { %2888 = vmatpush1.bf16.msra.mxu1 %v6239_v48  ;;  %2847 = vmatpush1.bf16.msra.mxu0 %v6365_v49  ;;  %v1142_v48 = vld [vmem:[#allocation11 + $0x78] sm:$0xff]  ;;  %v6295_v49 = vcombine.low %v1257_v34, %v1261_v35  ;;  %v1313_v34 = vld [vmem:[#allocation11 + $0x5d0] sm:$0xff] }
 0x35c   : > { %2889 = vmatprep.subr.bf16.mxu1 %v6248_v51  ;;  %2848 = vmatprep.subr.bf16.mxu0 %v6374_v45  ;;  %v6169_v51 = vcombine.low %v1130_v36, %v1134_v37  ;;  %v6304_v45 = vcombine.high %v1265_v42, %v1269_v43  ;;  %v6178_v46 = vcombine.high %v1138_v44, %v1142_v48  ;;  %v1317_v35 = vld [vmem:[#allocation11 + $0x5f0] sm:$0xff]  ;;  %v1186_v36 = vld [vmem:[#allocation11 + $0x1d8] sm:$0xff] }
 0x35d   : > { %v1190_v37 = vld [vmem:[#allocation11 + $0x1f8] sm:$0xff] }
 0x35f   : > { %2890 = vmatpush1.bf16.msra.mxu1 %v6247_v57  ;;  %2849 = vmatpush1.bf16.msra.mxu0 %v6373_v58  ;;  %v1150_v57 = vld [vmem:[#allocation11 + $0xb8] sm:$0xff]  ;;  %v6303_v58 = vcombine.low %v1265_v42, %v1269_v43  ;;  %v1321_v42 = vld [vmem:[#allocation11 + $0x610] sm:$0xff] }
 0x360   : > { %2891 = vmatprep.subr.bf16.mxu1 %v6256_v59  ;;  %2850 = vmatprep.subr.bf16.mxu0 %v6382_v60  ;;  %v6177_v59 = vcombine.low %v1138_v44, %v1142_v48  ;;  %v6312_v60 = vcombine.high %v1273_v47, %v1277_v50  ;;  %v6186_v61 = vcombine.high %v1146_v56, %v1150_v57  ;;  %v1325_v43 = vld [vmem:[#allocation11 + $0x630] sm:$0xff]  ;;  %v1194_v44 = vld [vmem:[#allocation11 + $0x218] sm:$0xff] }
 0x361   : > { %v1198_v48 = vld [vmem:[#allocation11 + $0x238] sm:$0xff] }
 0x363   : > { %2892 = vmatpush1.bf16.msra.mxu1 %v6255_v3  ;;  %2851 = vmatpush1.bf16.msra.mxu0 %v6381_v6  ;;  %v1158_v3 = vld [vmem:[#allocation11 + $0xf8] sm:$0xff]  ;;  %v6311_v6 = vcombine.low %v1273_v47, %v1277_v50  ;;  %v1329_v47 = vld [vmem:[#allocation11 + $0x650] sm:$0xff] }
 0x364   : > { %2893 = vmatprep.subr.bf16.mxu1 %v6264_v7  ;;  %2852 = vmatprep.subr.bf16.mxu0 %v6390_v8  ;;  %v6185_v7 = vcombine.low %v1146_v56, %v1150_v57  ;;  %v6320_v8 = vcombine.high %v1281_v62, %v1285_v63  ;;  %v6194_v9 = vcombine.high %v1154_v1, %v1158_v3  ;;  %v1333_v50 = vld [vmem:[#allocation11 + $0x670] sm:$0xff]  ;;  %v1202_v56 = vld [vmem:[#allocation11 + $0x258] sm:$0xff] }
 0x365   : > { %v1206_v57 = vld [vmem:[#allocation11 + $0x278] sm:$0xff] }
 0x367   : > { %2894 = vmatpush1.bf16.msra.mxu1 %v6263_v15  ;;  %2853 = vmatpush1.bf16.msra.mxu0 %v6389_v16  ;;  %v6319_v15 = vcombine.low %v1281_v62, %v1285_v63  ;;  %v6193_v16 = vcombine.low %v1154_v1, %v1158_v3  ;;  %v1337_v62 = vld [vmem:[#allocation11 + $0x690] sm:$0xff]  ;;  %v1210_v1 = vld [vmem:[#allocation11 + $0x298] sm:$0xff] }
 0x368   : > { %2895 = vmatprep.subr.bf16.mxu1 %v6272_v18  ;;  %2854 = vmatprep.subr.bf16.mxu0 %v6398_v19  ;;  %v6328_v18 = vcombine.high %v1289_v10, %v1293_v13  ;;  %v1341_v63 = vld [vmem:[#allocation11 + $0x6b0] sm:$0xff]  ;;  %v1214_v3 = vld [vmem:[#allocation11 + $0x2b8] sm:$0xff] }
 0x36b   : > { %2896 = vmatpush1.bf16.msra.mxu1 %v6271_v12  ;;  %2855 = vmatpush1.bf16.msra.mxu0 %v6397_v17  ;;  %v6327_v12 = vcombine.low %v1289_v10, %v1293_v13  ;;  %v1345_v10 = vld [vmem:[#allocation11 + $0x6d0] sm:$0xff] }
 0x36c   : > { %2897 = vmatprep.subr.bf16.mxu1 %v6280_v23  ;;  %2856 = vmatprep.subr.bf16.mxu0 %v6406_v24  ;;  %v6336_v23 = vcombine.high %v1297_v20, %v1301_v21  ;;  %v6210_v24 = vcombine.high %v1170_v22, %v1174_v11  ;;  %v1349_v13 = vld [vmem:[#allocation11 + $0x6f0] sm:$0xff] }
 0x36f   : > { %2898 = vmatpush1.bf16.msra.mxu1 %v6279_v30  ;;  %2857 = vmatpush1.bf16.msra.mxu0 %v6405_v31  ;;  %v6335_v30 = vcombine.low %v1297_v20, %v1301_v21  ;;  %v6209_v31 = vcombine.low %v1170_v22, %v1174_v11  ;;  %v1353_v20 = vld [vmem:[#allocation11 + $0x710] sm:$0xff]  ;;  %v1226_v22 = vld [vmem:[#allocation11 + $0x318] sm:$0xff] }
 0x370   : > { %2899 = vmatprep.subr.bf16.mxu1 %v6288_v32  ;;  %2858 = vmatprep.subr.bf16.mxu0 %v6414_v33  ;;  %v6344_v32 = vcombine.high %v1305_v25, %v1309_v54  ;;  %v6218_v33 = vcombine.high %v1178_v26, %v1182_v28  ;;  %v1357_v21 = vld [vmem:[#allocation11 + $0x730] sm:$0xff]  ;;  %v1230_v11 = vld [vmem:[#allocation11 + $0x338] sm:$0xff] }
 0x373   : > { %2900 = vmatpush1.bf16.msra.mxu1 %v6287_v38  ;;  %2859 = vmatpush1.bf16.msra.mxu0 %v6413_v39  ;;  %v6343_v38 = vcombine.low %v1305_v25, %v1309_v54  ;;  %v6217_v39 = vcombine.low %v1178_v26, %v1182_v28  ;;  %v1361_v25 = vld [vmem:[#allocation11 + $0x750] sm:$0xff]  ;;  %v1234_v26 = vld [vmem:[#allocation11 + $0x358] sm:$0xff] }
 0x374   : > { %2910 = vmatprep.subr.bf16.mxu1 %v6296_v40  ;;  %2951 = vmatprep.subr.bf16.mxu0 %v6170_v41  ;;  %v6352_v40 = vcombine.high %v1313_v34, %v1317_v35  ;;  %v6226_v41 = vcombine.high %v1186_v36, %v1190_v37  ;;  %v1365_v54 = vld [vmem:[#allocation11 + $0x770] sm:$0xff]  ;;  %v1238_v28 = vld [vmem:[#allocation11 + $0x378] sm:$0xff] }
 0x376   : > { %2902 = vmatmul.mubr.bf16.vlgmr.msra.gmra.mrb[4].mxu1 %v8495_v5  ;;  %2861 = vmatmul.mubr.bf16.vlgmr.msra.gmra.mrb[16].mxu0 %v8515_v29 }
 0x377   : > { %2911 = vmatpush1.bf16.msra.mxu1 %v6295_v49  ;;  %2942 = vmatprep.mubr.bf16.mxu1 %v8513_v27  ;;  %v6351_v49 = vcombine.low %v1313_v34, %v1317_v35  ;;  %v1369_v34 = vld [vmem:[#allocation11 + $0x790] sm:$0xff] }
 0x378   : > { %2952 = vmatpush1.bf16.msra.mxu0 %v6169_v51  ;;  %2983 = vmatprep.mubr.bf16.mxu0 %v8493_v4  ;;  %v1162_v4 = vld [vmem:[#allocation11 + $0x118] sm:$0xff]  ;;  %v6225_v51 = vcombine.low %v1186_v36, %v1190_v37  ;;  %v1373_v35 = vld [vmem:[#allocation11 + $0x7b0] sm:$0xff] }
 0x379   : > { %2912 = vmatprep.subr.bf16.mxu1 %v6304_v45  ;;  %2953 = vmatprep.subr.bf16.mxu0 %v6178_v46  ;;  %v6202_v19 = vcombine.high %v1162_v4, %v1166_v14  ;;  %v6201_v17 = vcombine.low %v1162_v4, %v1166_v14  ;;  %v6360_v45 = vcombine.high %v1321_v42, %v1325_v43  ;;  %v1218_v4 = vld [vmem:[#allocation11 + $0x2d8] sm:$0xff] }
 0x37a   : > { %v6234_v46 = vcombine.high %v1194_v44, %v1198_v48  ;;  %v1222_v14 = vld [vmem:[#allocation11 + $0x2f8] sm:$0xff] }
 0x37b   : > { %2913 = vmatpush1.bf16.msra.mxu1 %v6303_v58  ;;  %v6359_v58 = vcombine.low %v1321_v42, %v1325_v43  ;;  %v1242_v36 = vld [vmem:[#allocation11 + $0x398] sm:$0xff]  ;;  %v1377_v42 = vld [vmem:[#allocation11 + $0x7d0] sm:$0xff] }
 0x37c   : > { %2954 = vmatpush1.bf16.msra.mxu0 %v6177_v59  ;;  %2914 = vmatprep.subr.bf16.mxu1 %v6312_v60  ;;  %v6233_v59 = vcombine.low %v1194_v44, %v1198_v48  ;;  %v6368_v60 = vcombine.high %v1329_v47, %v1333_v50  ;;  %v1246_v37 = vld [vmem:[#allocation11 + $0x3b8] sm:$0xff]  ;;  %v1381_v43 = vld [vmem:[#allocation11 + $0x7f0] sm:$0xff] }
 0x37d   : > { %2955 = vmatprep.subr.bf16.mxu0 %v6186_v61  ;;  %v6242_v61 = vcombine.high %v1202_v56, %v1206_v57  ;;  %v1250_v44 = vld [vmem:[#allocation11 + $0x3d8] sm:$0xff] }
 0x37e   : > { %v1254_v48 = vld [vmem:[#allocation11 + $0x3f8] sm:$0xff] }
 0x37f   : > { %2915 = vmatpush1.bf16.msra.mxu1 %v6311_v6  ;;  %v6367_v6 = vcombine.low %v1329_v47, %v1333_v50  ;;  %v1258_v47 = vld [vmem:[#allocation11 + $0x418] sm:$0xff] }
 0x380   : > { %2956 = vmatpush1.bf16.msra.mxu0 %v6185_v7  ;;  %2916 = vmatprep.subr.bf16.mxu1 %v6320_v8  ;;  %v6241_v7 = vcombine.low %v1202_v56, %v1206_v57  ;;  %v6376_v8 = vcombine.high %v1337_v62, %v1341_v63  ;;  %v1262_v50 = vld [vmem:[#allocation11 + $0x438] sm:$0xff]  ;;  %v6415_v56 = vcombine.low %v1377_v42, %v1381_v43 }
 0x381   : > { %2957 = vmatprep.subr.bf16.mxu0 %v6194_v9  ;;  %v6250_v9 = vcombine.high %v1210_v1, %v1214_v3  ;;  %v6289_v57 = vcombine.low %v1250_v44, %v1254_v48 }
 0x383   : > { %2917 = vmatpush1.bf16.msra.mxu1 %v6319_v15  ;;  %v6375_v15 = vcombine.low %v1337_v62, %v1341_v63  ;;  %v7126_v62 = vld [vmem:[%s8451_s29] ss:$24 sps:$4 sm:$0xff]   ;;  %v6297_v63 = vcombine.low %v1258_v47, %v1262_v50 }
 0x384   : > { %2958 = vmatpush1.bf16.msra.mxu0 %v6193_v16  ;;  %2918 = vmatprep.subr.bf16.mxu1 %v6328_v18  ;;  %v6249_v16 = vcombine.low %v1210_v1, %v1214_v3  ;;  %v6384_v18 = vcombine.high %v1345_v10, %v1349_v13  ;;  %v7131_v3 = vld [vmem:[%s8451_s29 + $0x34] ss:$24 sps:$4 sm:$0xff]  }
 0x385   : > { %2959 = vmatprep.subr.bf16.mxu0 %v6202_v19  ;;  %v6258_v19 = vcombine.high %v1218_v4, %v1222_v14 }
 0x387   : > { %2919 = vmatpush1.bf16.msra.mxu1 %v6327_v12  ;;  %v6383_v12 = vcombine.low %v1345_v10, %v1349_v13  ;;  %v7134_v10 = vld [vmem:[%s8451_s29 + $0x64] ss:$24 sps:$4 sm:$0xff]  }
 0x388   : > { %2960 = vmatpush1.bf16.msra.mxu0 %v6201_v17  ;;  %2920 = vmatprep.subr.bf16.mxu1 %v6336_v23  ;;  %v6257_v17 = vcombine.low %v1218_v4, %v1222_v14  ;;  %v6392_v23 = vcombine.high %v1353_v20, %v1357_v21  ;;  %v1282_v4 = vld [vmem:[#allocation11 + $0x4d8] sm:$0xff] }
 0x389   : > { %2961 = vmatprep.subr.bf16.mxu0 %v6210_v24  ;;  %v6266_v24 = vcombine.high %v1226_v22, %v1230_v11  ;;  %v1286_v14 = vld [vmem:[#allocation11 + $0x4f8] sm:$0xff] }
 0x38b   : > { %2921 = vmatpush1.bf16.msra.mxu1 %v6335_v30  ;;  %v6391_v30 = vcombine.low %v1353_v20, %v1357_v21  ;;  %v7135_v20 = vld [vmem:[%s8451_s29 + $0x90] ss:$24 sps:$4 sm:$0xff]   ;;  %v6321_v21 = vcombine.low %v1282_v4, %v1286_v14 }
 0x38c   : > { %2962 = vmatpush1.bf16.msra.mxu0 %v6209_v31  ;;  %2922 = vmatprep.subr.bf16.mxu1 %v6344_v32  ;;  %v6265_v31 = vcombine.low %v1226_v22, %v1230_v11  ;;  %v6400_v32 = vcombine.high %v1361_v25, %v1365_v54  ;;  %v7140_v22 = vld [vmem:[%s8451_s29 + $0xc4] ss:$24 sps:$4 sm:$0xff]  }
 0x38d   : > { %2963 = vmatprep.subr.bf16.mxu0 %v6218_v33  ;;  %v6274_v33 = vcombine.high %v1234_v26, %v1238_v28 }
 0x38f   : > { %2923 = vmatpush1.bf16.msra.mxu1 %v6343_v38  ;;  %v6399_v38 = vcombine.low %v1361_v25, %v1365_v54  ;;  %v7143_v25 = vld [vmem:[%s8451_s29 + $0xf4] ss:$24 sps:$4 sm:$0xff]  }
 0x390   : > { %2964 = vmatpush1.bf16.msra.mxu0 %v6217_v39  ;;  %2924 = vmatprep.subr.bf16.mxu1 %v6352_v40  ;;  %v6273_v39 = vcombine.low %v1234_v26, %v1238_v28  ;;  %v6408_v40 = vcombine.high %v1369_v34, %v1373_v35  ;;  %v1306_v26 = vld [vmem:[#allocation11 + $0x598] sm:$0xff] }
 0x391   : > { %2965 = vmatprep.subr.bf16.mxu0 %v6226_v41  ;;  %v6282_v41 = vcombine.high %v1242_v36, %v1246_v37  ;;  %v1310_v28 = vld [vmem:[#allocation11 + $0x5b8] sm:$0xff] }
 0x393   : > { %2925 = vmatpush1.bf16.msra.mxu1 %v6351_v49  ;;  %v6407_v49 = vcombine.low %v1369_v34, %v1373_v35  ;;  %v6346_v34 = vcombine.high %v1306_v26, %v1310_v28 }
 0x394   : > { %2966 = vmatpush1.bf16.msra.mxu0 %v6225_v51  ;;  %2926 = vmatprep.subr.bf16.mxu1 %v6360_v45  ;;  %v6281_v51 = vcombine.low %v1242_v36, %v1246_v37  ;;  %v6416_v45 = vcombine.high %v1377_v42, %v1381_v43  ;;  %v1314_v36 = vld [vmem:[#allocation11 + $0x5d8] sm:$0xff] }
 0x395   : > { %2967 = vmatprep.subr.bf16.mxu0 %v6234_v46  ;;  %v6290_v46 = vcombine.high %v1250_v44, %v1254_v48  ;;  %v1318_v37 = vld [vmem:[#allocation11 + $0x5f8] sm:$0xff] }
 0x396   : > { %v7149_v42 = vld [vmem:[%s8451_s29 + $0x154] ss:$24 sps:$4 sm:$0xff]   ;;  %v6354_v43 = vcombine.high %v1314_v36, %v1318_v37 }
 0x397   : > { %2927 = vmatpush1.bf16.msra.mxu1 %v6359_v58  ;;  %v7128_v58 = vld [vmem:[%s8451_s29 + $0x4] ss:$24 sps:$4 sm:$0xff]   ;;  %v1322_v44 = vld [vmem:[#allocation11 + $0x618] sm:$0xff] }
 0x398   : > { %2968 = vmatpush1.bf16.msra.mxu0 %v6233_v59  ;;  %2928 = vmatprep.subr.bf16.mxu1 %v6368_v60  ;;  %v6298_v59 = vcombine.high %v1258_v47, %v1262_v50  ;;  %v1266_v60 = vld [vmem:[#allocation11 + $0x458] sm:$0xff] }
 0x399   : > { %2969 = vmatprep.subr.bf16.mxu0 %v6242_v61  ;;  %v1270_v61 = vld [vmem:[#allocation11 + $0x478] sm:$0xff] }
 0x39a   : > { %v6306_v1 = vcombine.high %v1266_v60, %v1270_v61  ;;  %v1326_v48 = vld [vmem:[#allocation11 + $0x638] sm:$0xff] }
 0x39b   : > { %2929 = vmatpush1.bf16.msra.mxu1 %v6367_v6  ;;  %v1274_v6 = vld [vmem:[#allocation11 + $0x498] sm:$0xff] }
 0x39c   : > { %2970 = vmatpush1.bf16.msra.mxu0 %v6241_v7  ;;  %2930 = vmatprep.subr.bf16.mxu1 %v6376_v8  ;;  %v1278_v7 = vld [vmem:[#allocation11 + $0x4b8] sm:$0xff] }
 0x39d   : > { %2971 = vmatprep.subr.bf16.mxu0 %v6250_v9  ;;  %v7129_v8 = vld [vmem:[%s8451_s29 + $0x30] ss:$24 sps:$4 sm:$0xff]   ;;  %v6305_v9 = vcombine.low %v1266_v60, %v1270_v61  ;;  %v6314_v13 = vcombine.high %v1274_v6, %v1278_v7 }
 0x39e   : > { %v1330_v47 = vld [vmem:[#allocation11 + $0x658] sm:$0xff] }
 0x39f   : > { %2931 = vmatpush1.bf16.msra.mxu1 %v6375_v15  ;;  %v7132_v15 = vld [vmem:[%s8451_s29 + $0x60] ss:$24 sps:$4 sm:$0xff]   ;;  %v1334_v50 = vld [vmem:[#allocation11 + $0x678] sm:$0xff] }
 0x3a0   : > { %2972 = vmatpush1.bf16.msra.mxu0 %v6249_v16  ;;  %2932 = vmatprep.subr.bf16.mxu1 %v6384_v18  ;;  %v6313_v16 = vcombine.low %v1274_v6, %v1278_v7  ;;  %v6322_v18 = vcombine.high %v1282_v4, %v1286_v14  ;;  %v1338_v60 = vld [vmem:[#allocation11 + $0x698] sm:$0xff] }
 0x3a1   : > { %2973 = vmatprep.subr.bf16.mxu0 %v6258_v19  ;;  %v1290_v19 = vld [vmem:[#allocation11 + $0x518] sm:$0xff] }
 0x3a2   : > { %v1342_v61 = vld [vmem:[#allocation11 + $0x6b8] sm:$0xff] }
 0x3a3   : > { %2933 = vmatpush1.bf16.msra.mxu1 %v6383_v12  ;;  %v1298_v12 = vld [vmem:[#allocation11 + $0x558] sm:$0xff] }
 0x3a4   : > { %2974 = vmatpush1.bf16.msra.mxu0 %v6257_v17  ;;  %2934 = vmatprep.subr.bf16.mxu1 %v6392_v23  ;;  %v1302_v17 = vld [vmem:[#allocation11 + $0x578] sm:$0xff]  ;;  %v7138_v23 = vld [vmem:[%s8451_s29 + $0xc0] ss:$24 sps:$4 sm:$0xff]  }
 0x3a5   : > { %2975 = vmatprep.subr.bf16.mxu0 %v6266_v24  ;;  %v6338_v54 = vcombine.high %v1298_v12, %v1302_v17  ;;  %v1346_v6 = vld [vmem:[#allocation11 + $0x6d8] sm:$0xff] }
 0x3a6   : > { %v1350_v7 = vld [vmem:[#allocation11 + $0x6f8] sm:$0xff] }
 0x3a7   : > { %2935 = vmatpush1.bf16.msra.mxu1 %v6391_v30  ;;  %v7141_v30 = vld [vmem:[%s8451_s29 + $0xf0] ss:$24 sps:$4 sm:$0xff]  }
 0x3a8   : > { %2976 = vmatpush1.bf16.msra.mxu0 %v6265_v31  ;;  %2936 = vmatprep.subr.bf16.mxu1 %v6400_v32  ;;  %v6337_v31 = vcombine.low %v1298_v12, %v1302_v17  ;;  %v7146_v32 = vld [vmem:[%s8451_s29 + $0x124] ss:$24 sps:$4 sm:$0xff]   ;;  %v1354_v4 = vld [vmem:[#allocation11 + $0x718] sm:$0xff] }
 0x3a9   : > { %2977 = vmatprep.subr.bf16.mxu0 %v6274_v33  ;;  %v1358_v14 = vld [vmem:[#allocation11 + $0x738] sm:$0xff] }
 0x3aa   : > { %v1370_v12 = vld [vmem:[#allocation11 + $0x798] sm:$0xff] }
 0x3ab   : > { %2937 = vmatpush1.bf16.msra.mxu1 %v6399_v38  ;;  %v1374_v17 = vld [vmem:[#allocation11 + $0x7b8] sm:$0xff] }
 0x3ac   : > { %2978 = vmatpush1.bf16.msra.mxu0 %v6273_v39  ;;  %2938 = vmatprep.subr.bf16.mxu1 %v6408_v40  ;;  %v7144_v39 = vld [vmem:[%s8451_s29 + $0x120] ss:$24 sps:$4 sm:$0xff]  }
 0x3ad   : > { %2979 = vmatprep.subr.bf16.mxu0 %v6282_v41  ;;  %v6345_v41 = vcombine.low %v1306_v26, %v1310_v28  ;;  %v1378_v26 = vld [vmem:[#allocation11 + $0x7d8] sm:$0xff] }
 0x3ae   : > { %v1382_v28 = vld [vmem:[#allocation11 + $0x7f8] sm:$0xff] }
 0x3af   : > { %2939 = vmatpush1.bf16.msra.mxu1 %v6407_v49  ;;  %v7147_v49 = vld [vmem:[%s8451_s29 + $0x150] ss:$24 sps:$4 sm:$0xff]  }
 0x3b0   : > { %2980 = vmatpush1.bf16.msra.mxu0 %v6281_v51  ;;  %2940 = vmatprep.subr.bf16.mxu1 %v6416_v45  ;;  %v6353_v51 = vcombine.low %v1314_v36, %v1318_v37  ;;  %v7152_v45 = vld [vmem:[%s8451_s29 + $0x184] ss:$24 sps:$4 sm:$0xff]   ;;  %v7189_v36 = vld [vmem:[%s8451_s29 + $0x2d0] ss:$24 sps:$4 sm:$0xff]   ;;  %v6417_v37 = vcombine.low %v1378_v26, %v1382_v28 }
 0x3b1   : > { %2981 = vmatprep.subr.bf16.mxu0 %v6290_v46  ;;  %v6362_v46 = vcombine.high %v1322_v44, %v1326_v48 }
 0x3b3   : > { %2941 = vmatpush1.bf16.msra.mxu1 %v6415_v56  ;;  %v7150_v56 = vld [vmem:[%s8451_s29 + $0x180] ss:$24 sps:$4 sm:$0xff]  }
 0x3b4   : > { %2982 = vmatpush1.bf16.msra.mxu0 %v6289_v57  ;;  %5385 = vmatprep.subr.bf16.mxu1 %v7128_v58  ;;  %v6361_v57 = vcombine.low %v1322_v44, %v1326_v48  ;;  %v7155_v58 = vld [vmem:[%s8451_s29 + $0x1b4] ss:$24 sps:$4 sm:$0xff]   ;;  %v7168_v44 = vld [vmem:[%s8451_s29 + $0x68] ss:$24 sps:$4 sm:$0xff]  }
 0x3b5   : > { %2992 = vmatprep.subr.bf16.mxu0 %v6298_v59  ;;  %v6370_v59 = vcombine.high %v1330_v47, %v1334_v50  ;;  %v7176_v48 = vld [vmem:[%s8451_s29 + $0x9c] ss:$24 sps:$4 sm:$0xff]  }
 0x3b6   : > { %2943 = vmatmul.mubr.bf16.vlgmr.msra.gmra.mrb[4].mxu1 %v8515_v29 }
 0x3b7   : > { %2984 = vmatmul.mubr.bf16.vlgmr.msra.gmra.mrb[20].mxu0 %v8495_v5  ;;  %5386 = vmatpush1.bf16.msra.mxu1 %v7126_v62  ;;  %v7137_v5 = vld [vmem:[%s8451_s29 + $0x94] ss:$24 sps:$4 sm:$0xff]   ;;  %v7153_v62 = vld [vmem:[%s8451_s29 + $0x1b0] ss:$24 sps:$4 sm:$0xff]  }
 0x3b8   : > { %2993 = vmatpush1.bf16.msra.mxu0 %v6297_v63  ;;  %3024 = vmatprep.mubr.bf16.mxu0 %v8513_v27  ;;  %v1294_v27 = vld [vmem:[#allocation11 + $0x538] sm:$0xff]  ;;  %v6369_v63 = vcombine.low %v1330_v47, %v1334_v50 }
 0x3b9   : > { %2994 = vmatprep.subr.bf16.mxu0 %v6306_v1  ;;  %5387 = vmatprep.subr.bf16.mxu1 %v7131_v3  ;;  %v6330_v11 = vcombine.high %v1290_v19, %v1294_v27  ;;  %v6329_v24 = vcombine.low %v1290_v19, %v1294_v27  ;;  %v7161_v1 = vld [vmem:[%s8451_s29 + $0x1e4] ss:$24 sps:$4 sm:$0xff]   ;;  %v6378_v3 = vcombine.high %v1338_v60, %v1342_v61  ;;  %v1362_v19 = vld [vmem:[#allocation11 + $0x758] sm:$0xff] }
 0x3ba   : > { %v1366_v27 = vld [vmem:[#allocation11 + $0x778] sm:$0xff] }
 0x3bb   : > { %5388 = vmatpush1.bf16.msra.mxu1 %v7129_v8  ;;  %v7159_v8 = vld [vmem:[%s8451_s29 + $0x1e0] ss:$24 sps:$4 sm:$0xff]   ;;  %v7188_v50 = vld [vmem:[%s8451_s29 + $0xfc] ss:$24 sps:$4 sm:$0xff]  }
 0x3bc   : > { %2995 = vmatpush1.bf16.msra.mxu0 %v6305_v9  ;;  %5389 = vmatprep.subr.bf16.mxu1 %v7134_v10  ;;  %v6377_v9 = vcombine.low %v1338_v60, %v1342_v61  ;;  %v7167_v10 = vld [vmem:[%s8451_s29 + $0x214] ss:$24 sps:$4 sm:$0xff]  }
 0x3bd   : > { %2996 = vmatprep.subr.bf16.mxu0 %v6314_v13  ;;  %v6386_v13 = vcombine.high %v1346_v6, %v1350_v7  ;;  %v7194_v60 = vld [vmem:[%s8451_s29 + $0x12c] ss:$24 sps:$4 sm:$0xff]  }
 0x3bf   : > { %5390 = vmatpush1.bf16.msra.mxu1 %v7132_v15  ;;  %v7165_v15 = vld [vmem:[%s8451_s29 + $0x210] ss:$24 sps:$4 sm:$0xff]  }
 0x3c0   : > { %2997 = vmatpush1.bf16.msra.mxu0 %v6313_v16  ;;  %5391 = vmatprep.subr.bf16.mxu1 %v7137_v5  ;;  %v6385_v16 = vcombine.low %v1346_v6, %v1350_v7  ;;  %v7173_v5 = vld [vmem:[%s8451_s29 + $0x244] ss:$24 sps:$4 sm:$0xff]  }
 0x3c1   : > { %2998 = vmatprep.subr.bf16.mxu0 %v6322_v18  ;;  %v6394_v18 = vcombine.high %v1354_v4, %v1358_v14 }
 0x3c3   : > { %5392 = vmatpush1.bf16.msra.mxu1 %v7135_v20  ;;  %v7171_v20 = vld [vmem:[%s8451_s29 + $0x240] ss:$24 sps:$4 sm:$0xff]  }
 0x3c4   : > { %2999 = vmatpush1.bf16.msra.mxu0 %v6321_v21  ;;  %5393 = vmatprep.subr.bf16.mxu1 %v7140_v22  ;;  %v6393_v21 = vcombine.low %v1354_v4, %v1358_v14  ;;  %v7179_v22 = vld [vmem:[%s8451_s29 + $0x274] ss:$24 sps:$4 sm:$0xff]  }
 0x3c5   : > { %3000 = vmatprep.subr.bf16.mxu0 %v6330_v11  ;;  %v6402_v11 = vcombine.high %v1362_v19, %v1366_v27  ;;  %v7203_v4 = vld [vmem:[%s8451_s29 + $0x334] ss:$24 sps:$4 sm:$0xff]  }
 0x3c6   : > { %v7206_v14 = vld [vmem:[%s8451_s29 + $0x18c] ss:$24 sps:$4 sm:$0xff]  }
 0x3c7   : > { %5394 = vmatpush1.bf16.msra.mxu1 %v7138_v23  ;;  %v7177_v23 = vld [vmem:[%s8451_s29 + $0x270] ss:$24 sps:$4 sm:$0xff]  }
 0x3c8   : > { %3001 = vmatpush1.bf16.msra.mxu0 %v6329_v24  ;;  %5395 = vmatprep.subr.bf16.mxu1 %v7143_v25  ;;  %v6401_v24 = vcombine.low %v1362_v19, %v1366_v27  ;;  %v7185_v25 = vld [vmem:[%s8451_s29 + $0x2a4] ss:$24 sps:$4 sm:$0xff]   ;;  %v7207_v19 = vld [vmem:[%s8451_s29 + $0x360] ss:$24 sps:$4 sm:$0xff]  }
 0x3c9   : > { %v8545_v33 = vpop.f32.mrb[12].mxu0  ;;  %3002 = vmatprep.subr.bf16.mxu0 %v6338_v54  ;;  %v6410_v54 = vcombine.high %v1370_v12, %v1374_v17  ;;  %v7210_v27 = vld [vmem:[%s8451_s29 + $0x1b8] ss:$24 sps:$4 sm:$0xff]  }
 0x3ca   : > { %v8547_v35 = vpop.f32.mrb[13].mxu0 }
 0x3cb   : > { %v2743_v38 = vpop.f32.mrb[14].mxu0  ;;  %5396 = vmatpush1.bf16.msra.mxu1 %v7141_v30  ;;  %v7183_v30 = vld [vmem:[%s8451_s29 + $0x2a0] ss:$24 sps:$4 sm:$0xff]  }
 0x3cc   : > { %3003 = vmatpush1.bf16.msra.mxu0 %v6337_v31  ;;  %v2744_v40 = vpop.f32.mrb[15].mxu0  ;;  %5397 = vmatprep.subr.bf16.mxu1 %v7146_v32  ;;  %v6409_v31 = vcombine.low %v1370_v12, %v1374_v17  ;;  %v7191_v32 = vld [vmem:[%s8451_s29 + $0x2d4] ss:$24 sps:$4 sm:$0xff]   ;;  %v7197_v38 = vld [vmem:[%s8451_s29 + $0x304] ss:$24 sps:$4 sm:$0xff]  }
 0x3cd   : > { %3004 = vmatprep.subr.bf16.mxu0 %v6346_v34  ;;  %v6418_v34 = vcombine.high %v1378_v26, %v1382_v28  ;;  %v7156_v40 = vld [vmem:[%s8451_s29 + $0x8] ss:$24 sps:$4 sm:$0xff]   ;;  %v7221_v12 = vld [vmem:[%s8451_s29 + $0x3c4] ss:$24 sps:$4 sm:$0xff]  }
 0x3ce   : > { %v7224_v17 = vld [vmem:[%s8451_s29 + $0x21c] ss:$24 sps:$4 sm:$0xff]   ;;  %v7225_v26 = vld [vmem:[%s8451_s29 + $0x3f0] ss:$24 sps:$4 sm:$0xff]  }
 0x3cf   : > { %5398 = vmatpush1.bf16.msra.mxu1 %v7144_v39  ;;  %v7158_v39 = vld [vmem:[%s8451_s29 + $0xc] ss:$24 sps:$4 sm:$0xff]   ;;  %v7228_v28 = vld [vmem:[%s8451_s29 + $0x248] ss:$24 sps:$4 sm:$0xff]  }
 0x3d0   : > { %3005 = vmatpush1.bf16.msra.mxu0 %v6345_v41  ;;  %5399 = vmatprep.subr.bf16.mxu1 %v7149_v42  ;;  %v7164_v41 = vld [vmem:[%s8451_s29 + $0x3c] ss:$24 sps:$4 sm:$0xff]   ;;  %v7162_v42 = vld [vmem:[%s8451_s29 + $0x38] ss:$24 sps:$4 sm:$0xff]  }
 0x3d1   : > { %3006 = vmatprep.subr.bf16.mxu0 %v6354_v43  ;;  %v7170_v43 = vld [vmem:[%s8451_s29 + $0x6c] ss:$24 sps:$4 sm:$0xff]  }
 0x3d3   : > { %5400 = vmatpush1.bf16.msra.mxu1 %v7147_v49  ;;  %v7174_v49 = vld [vmem:[%s8451_s29 + $0x98] ss:$24 sps:$4 sm:$0xff]  }
 0x3d4   : > { %3007 = vmatpush1.bf16.msra.mxu0 %v6353_v51  ;;  %5401 = vmatprep.subr.bf16.mxu1 %v7152_v45  ;;  %v8578_v51 = vld [vmem:[#allocation13] sm:$0xff]  ;;  %v7182_v45 = vld [vmem:[%s8451_s29 + $0xcc] ss:$24 sps:$4 sm:$0xff]  }
 0x3d5   : > { %3008 = vmatprep.subr.bf16.mxu0 %v6362_v46  ;;  %v7180_v46 = vld [vmem:[%s8451_s29 + $0xc8] ss:$24 sps:$4 sm:$0xff]   ;;  %v1392_v47 = vrot.slane %v8578_v51, %v8463_v55 }
 0x3d7   : > { %5402 = vmatpush1.bf16.msra.mxu1 %v7150_v56 }
 0x3d8   : > { %3009 = vmatpush1.bf16.msra.mxu0 %v6361_v57  ;;  %5403 = vmatprep.subr.bf16.mxu1 %v7155_v58  ;;  %v7186_v57 = vld [vmem:[%s8451_s29 + $0xf8] ss:$24 sps:$4 sm:$0xff]   ;;  %v2742_v58 = vadd.f32 %v8547_v35, %v1392_v47 }
 0x3d9   : > { %3010 = vmatprep.subr.bf16.mxu0 %v6370_v59  ;;  %v7255_v47 = vld [vmem:[%s8451_s29 + $0x4e0] ss:$24 sps:$4 sm:$0xff]  }
 0x3db   : > { %5404 = vmatpush1.bf16.msra.mxu1 %v7153_v62 }
 0x3dc   : > { %3011 = vmatpush1.bf16.msra.mxu0 %v6369_v63  ;;  %5405 = vmatprep.subr.bf16.mxu1 %v7161_v1 }
 0x3dd   : > { %3012 = vmatprep.subr.bf16.mxu0 %v6378_v3 }
 0x3df   : > { %5406 = vmatpush1.bf16.msra.mxu1 %v7159_v8  ;;  %v7200_v8 = vld [vmem:[%s8451_s29 + $0x15c] ss:$24 sps:$4 sm:$0xff]  }
 0x3e0   : > { %3013 = vmatpush1.bf16.msra.mxu0 %v6377_v9  ;;  %5407 = vmatprep.subr.bf16.mxu1 %v7167_v10  ;;  %v7195_v9 = vld [vmem:[%s8451_s29 + $0x300] ss:$24 sps:$4 sm:$0xff]  }
 0x3e1   : > { %3014 = vmatprep.subr.bf16.mxu0 %v6386_v13  ;;  %v7198_v13 = vld [vmem:[%s8451_s29 + $0x158] ss:$24 sps:$4 sm:$0xff]  }
 0x3e3   : > { %5408 = vmatpush1.bf16.msra.mxu1 %v7165_v15  ;;  %v7201_v15 = vld [vmem:[%s8451_s29 + $0x330] ss:$24 sps:$4 sm:$0xff]  }
 0x3e4   : > { %3015 = vmatpush1.bf16.msra.mxu0 %v6385_v16  ;;  %5409 = vmatprep.subr.bf16.mxu1 %v7173_v5  ;;  %v7204_v16 = vld [vmem:[%s8451_s29 + $0x188] ss:$24 sps:$4 sm:$0xff]   ;;  %v7209_v5 = vld [vmem:[%s8451_s29 + $0x364] ss:$24 sps:$4 sm:$0xff]  }
 0x3e5   : > { %3016 = vmatprep.subr.bf16.mxu0 %v6394_v18  ;;  %v7212_v18 = vld [vmem:[%s8451_s29 + $0x1bc] ss:$24 sps:$4 sm:$0xff]  }
 0x3e7   : > { %5410 = vmatpush1.bf16.msra.mxu1 %v7171_v20  ;;  %v7215_v20 = vld [vmem:[%s8451_s29 + $0x394] ss:$24 sps:$4 sm:$0xff]  }
 0x3e8   : > { %3017 = vmatpush1.bf16.msra.mxu0 %v6393_v21  ;;  %5411 = vmatprep.subr.bf16.mxu1 %v7179_v22  ;;  %v7218_v21 = vld [vmem:[%s8451_s29 + $0x1ec] ss:$24 sps:$4 sm:$0xff]   ;;  %v7213_v22 = vld [vmem:[%s8451_s29 + $0x390] ss:$24 sps:$4 sm:$0xff]  }
 0x3e9   : > { %3018 = vmatprep.subr.bf16.mxu0 %v6402_v11  ;;  %v7216_v11 = vld [vmem:[%s8451_s29 + $0x1e8] ss:$24 sps:$4 sm:$0xff]  }
 0x3eb   : > { %5412 = vmatpush1.bf16.msra.mxu1 %v7177_v23  ;;  %v7219_v23 = vld [vmem:[%s8451_s29 + $0x3c0] ss:$24 sps:$4 sm:$0xff]  }
 0x3ec   : > { %3019 = vmatpush1.bf16.msra.mxu0 %v6401_v24  ;;  %5413 = vmatprep.subr.bf16.mxu1 %v7185_v25  ;;  %v7222_v24 = vld [vmem:[%s8451_s29 + $0x218] ss:$24 sps:$4 sm:$0xff]   ;;  %v7227_v25 = vld [vmem:[%s8451_s29 + $0x3f4] ss:$24 sps:$4 sm:$0xff]  }
 0x3ed   : > { %3020 = vmatprep.subr.bf16.mxu0 %v6410_v54  ;;  %v7230_v54 = vld [vmem:[%s8451_s29 + $0x24c] ss:$24 sps:$4 sm:$0xff]  }
 0x3ef   : > { %5414 = vmatpush1.bf16.msra.mxu1 %v7183_v30  ;;  %v7233_v30 = vld [vmem:[%s8451_s29 + $0x424] ss:$24 sps:$4 sm:$0xff]  }
 0x3f0   : > { %3021 = vmatpush1.bf16.msra.mxu0 %v6409_v31  ;;  %5415 = vmatprep.subr.bf16.mxu1 %v7191_v32  ;;  %v7236_v31 = vld [vmem:[%s8451_s29 + $0x27c] ss:$24 sps:$4 sm:$0xff]   ;;  %v7231_v32 = vld [vmem:[%s8451_s29 + $0x420] ss:$24 sps:$4 sm:$0xff]  }
 0x3f1   : > { %3022 = vmatprep.subr.bf16.mxu0 %v6418_v34  ;;  %v7234_v34 = vld [vmem:[%s8451_s29 + $0x278] ss:$24 sps:$4 sm:$0xff]  }
 0x3f3   : > { %5416 = vmatpush1.bf16.msra.mxu1 %v7189_v36  ;;  %v7239_v36 = vld [vmem:[%s8451_s29 + $0x454] ss:$24 sps:$4 sm:$0xff]  }
 0x3f4   : > { %3023 = vmatpush1.bf16.msra.mxu0 %v6417_v37  ;;  %5426 = vmatprep.subr.bf16.mxu1 %v7197_v38  ;;  %v7242_v37 = vld [vmem:[%s8451_s29 + $0x2ac] ss:$24 sps:$4 sm:$0xff]   ;;  %v7237_v38 = vld [vmem:[%s8451_s29 + $0x450] ss:$24 sps:$4 sm:$0xff]  }
 0x3f5   : > { %5549 = vmatprep.subr.bf16.mxu0 %v7158_v39  ;;  %v7240_v39 = vld [vmem:[%s8451_s29 + $0x2a8] ss:$24 sps:$4 sm:$0xff]  }
 0x3f7   : > { %3025 = vmatmul.mubr.bf16.vlgmr.msra.gmra.mrb[20].mxu0 %v8515_v29  ;;  %v1388_v29 = vrot.slane %v8578_v51, %v8460_v53 }
 0x3f8   : > { %5550 = vmatpush1.bf16.msra.mxu0 %v7156_v40  ;;  %v7245_v40 = vld [vmem:[%s8451_s29 + $0x484] ss:$24 sps:$4 sm:$0xff]  }
 0x3f9   : > { %5551 = vmatprep.subr.bf16.mxu0 %v7164_v41  ;;  %v2740_v56 = vadd.f32 %v8545_v33, %v1388_v29  ;;  %v7192_v33 = vld [vmem:[%s8451_s29 + $0x128] ss:$24 sps:$4 sm:$0xff]   ;;  %v7248_v41 = vld [vmem:[%s8451_s29 + $0x2dc] ss:$24 sps:$4 sm:$0xff]  }
 0x3fa   : > { %v7257_v29 = vld [vmem:[%s8451_s29 + $0x4e4] ss:$24 sps:$4 sm:$0xff]  }
 0x3fc   : > { %5552 = vmatpush1.bf16.msra.mxu0 %v7162_v42  ;;  %v7243_v42 = vld [vmem:[%s8451_s29 + $0x480] ss:$24 sps:$4 sm:$0xff]  }
 0x3fd   : > { %5553 = vmatprep.subr.bf16.mxu0 %v7170_v43  ;;  %v7246_v43 = vld [vmem:[%s8451_s29 + $0x2d8] ss:$24 sps:$4 sm:$0xff]  }
 0x400   : > { %5554 = vmatpush1.bf16.msra.mxu0 %v7168_v44  ;;  %v7251_v44 = vld [vmem:[%s8451_s29 + $0x4b4] ss:$24 sps:$4 sm:$0xff]  }
 0x401   : > { %5555 = vmatprep.subr.bf16.mxu0 %v7176_v48  ;;  %v7254_v48 = vld [vmem:[%s8451_s29 + $0x30c] ss:$24 sps:$4 sm:$0xff]  }
 0x404   : > { %5556 = vmatpush1.bf16.msra.mxu0 %v7174_v49  ;;  %v7249_v49 = vld [vmem:[%s8451_s29 + $0x4b0] ss:$24 sps:$4 sm:$0xff]  }
 0x405   : > { %5557 = vmatprep.subr.bf16.mxu0 %v7182_v45  ;;  %v7252_v45 = vld [vmem:[%s8451_s29 + $0x308] ss:$24 sps:$4 sm:$0xff]  }
 0x408   : > { %5558 = vmatpush1.bf16.msra.mxu0 %v7180_v46  ;;  %v7260_v46 = vld [vmem:[%s8451_s29 + $0x33c] ss:$24 sps:$4 sm:$0xff]  }
 0x409   : > { %v2780_v59 = vpop.f32.mrb[0].mxu1  ;;  %5559 = vmatprep.subr.bf16.mxu0 %v7188_v50  ;;  %v7258_v50 = vld [vmem:[%s8451_s29 + $0x338] ss:$24 sps:$4 sm:$0xff]  }
 0x40a   : > { %v2781_v61 = vadd.f32 %v2780_v59, %v2740_v56  ;;  %v2782_v62 = vpop.f32.mrb[1].mxu1  ;;  %v7263_v56 = vld [vmem:[%s8451_s29 + $0x514] ss:$24 sps:$4 sm:$0xff]   ;;  %v7264_v59 = vld [vmem:[%s8451_s29 + $0x368] ss:$24 sps:$4 sm:$0xff]  }
 0x40b   : > { %v2783_v63 = vadd.f32 %v2782_v62, %v2742_v58  ;;  %v2784_v1 = vpop.f32.mrb[2].mxu1  ;;  %v7261_v58 = vld [vmem:[%s8451_s29 + $0x510] ss:$24 sps:$4 sm:$0xff]   ;;  %v7267_v62 = vld [vmem:[%s8451_s29 + $0x540] ss:$24 sps:$4 sm:$0xff]  }
 0x40c   : > { %v3033_v3 = vmax.f32 %v2781_v61, 0.0  ;;  %5560 = vmatpush1.bf16.msra.mxu0 %v7186_v57  ;;  %v2785_v6 = vpop.f32.mrb[3].mxu1  ;;  %v7266_v57 = vld [vmem:[%s8451_s29 + $0x36c] ss:$24 sps:$4 sm:$0xff]   ;;  %v7272_v61 = vld [vmem:[%s8451_s29 + $0x39c] ss:$24 sps:$4 sm:$0xff]  }
 0x40d   : > { %v3034_v7 = vmax.f32 %v2783_v63, 0.0  ;;  %5561 = vmatprep.subr.bf16.mxu0 %v7194_v60  ;;  %v7269_v60 = vld [vmem:[%s8451_s29 + $0x544] ss:$24 sps:$4 sm:$0xff]   ;;  %v7270_v63 = vld [vmem:[%s8451_s29 + $0x398] ss:$24 sps:$4 sm:$0xff]  }
 0x40e   : > { %v8596_v10 = vpack.c.bf16 %v3033_v3, %v3033_v3  ;;  %v7275_v1 = vld [vmem:[%s8451_s29 + $0x574] ss:$24 sps:$4 sm:$0xff]   ;;  %v7273_v6 = vld [vmem:[%s8451_s29 + $0x570] ss:$24 sps:$4 sm:$0xff]  }
 0x40f   : > { %v8593_v35 = vpack.c.bf16 %v3034_v7, %v3034_v7  ;;  %v7278_v3 = vld [vmem:[%s8451_s29 + $0x3cc] ss:$24 sps:$4 sm:$0xff]  }
 0x410   : > { %5562 = vmatpush1.bf16.msra.mxu0 %v7192_v33  ;;  %v7276_v33 = vld [vmem:[%s8451_s29 + $0x3c8] ss:$24 sps:$4 sm:$0xff]   ;;  %v7281_v7 = vld [vmem:[%s8451_s29 + $0x5a4] ss:$24 sps:$4 sm:$0xff]  }
 0x411   : > { %5417 = vmatprep.mubr.bf16.mxu1 %v8593_v35  ;;  %5581 = vmatprep.mubr.bf16.mxu0 %v8593_v35 }
 0x412   : > { %5418 = vmatmul.mubr.bf16.vlgmr.msra.gmra.mrb[8].mxu1 %v8596_v10  ;;  %5563 = vmatprep.subr.bf16.mxu0 %v7200_v8  ;;  %v7284_v8 = vld [vmem:[%s8451_s29 + $0x3fc] ss:$24 sps:$4 sm:$0xff]  }
 0x413   : > { %5427 = vmatpush1.bf16.msra.mxu1 %v7195_v9  ;;  %v1396_v9 = vrot.slane %v8578_v51, %v8504_v0 }
 0x414   : > { %5564 = vmatpush1.bf16.msra.mxu0 %v7198_v13  ;;  %5428 = vmatprep.subr.bf16.mxu1 %v7203_v4  ;;  %v7279_v13 = vld [vmem:[%s8451_s29 + $0x5a0] ss:$24 sps:$4 sm:$0xff]   ;;  %v1400_v4 = vrot.slane %v8578_v51, %v8507_v2 }
 0x415   : > { %5565 = vmatprep.subr.bf16.mxu0 %v7206_v14  ;;  %v7282_v14 = vld [vmem:[%s8451_s29 + $0x3f8] ss:$24 sps:$4 sm:$0xff]  }
 0x417   : > { %5429 = vmatpush1.bf16.msra.mxu1 %v7201_v15  ;;  %v7287_v15 = vld [vmem:[%s8451_s29 + $0x5d4] ss:$24 sps:$4 sm:$0xff]  }
 0x418   : > { %5566 = vmatpush1.bf16.msra.mxu0 %v7204_v16  ;;  %5430 = vmatprep.subr.bf16.mxu1 %v7209_v5  ;;  %v7290_v5 = vld [vmem:[%s8451_s29 + $0x42c] ss:$24 sps:$4 sm:$0xff]  }
 0x419   : > { %5567 = vmatprep.subr.bf16.mxu0 %v7212_v18 }
 0x41b   : > { %5431 = vmatpush1.bf16.msra.mxu1 %v7207_v19 }
 0x41c   : > { %5568 = vmatpush1.bf16.msra.mxu0 %v7210_v27  ;;  %5432 = vmatprep.subr.bf16.mxu1 %v7215_v20 }
 0x41d   : > { %5569 = vmatprep.subr.bf16.mxu0 %v7218_v21  ;;  %v7285_v21 = vld [vmem:[%s8451_s29 + $0x5d0] ss:$24 sps:$4 sm:$0xff]  }
 0x41f   : > { %5433 = vmatpush1.bf16.msra.mxu1 %v7213_v22 }
 0x420   : > { %5570 = vmatpush1.bf16.msra.mxu0 %v7216_v11  ;;  %5434 = vmatprep.subr.bf16.mxu1 %v7221_v12  ;;  %v7288_v12 = vld [vmem:[%s8451_s29 + $0x428] ss:$24 sps:$4 sm:$0xff]  }
 0x421   : > { %5571 = vmatprep.subr.bf16.mxu0 %v7224_v17  ;;  %v7293_v17 = vld [vmem:[%s8451_s29 + $0x604] ss:$24 sps:$4 sm:$0xff]  }
 0x423   : > { %5435 = vmatpush1.bf16.msra.mxu1 %v7219_v23 }
 0x424   : > { %5572 = vmatpush1.bf16.msra.mxu0 %v7222_v24  ;;  %5436 = vmatprep.subr.bf16.mxu1 %v7227_v25  ;;  %v7296_v24 = vld [vmem:[%s8451_s29 + $0x45c] ss:$24 sps:$4 sm:$0xff]  }
 0x425   : > { %5573 = vmatprep.subr.bf16.mxu0 %v7230_v54  ;;  %v7291_v54 = vld [vmem:[%s8451_s29 + $0x600] ss:$24 sps:$4 sm:$0xff]  }
 0x427   : > { %5437 = vmatpush1.bf16.msra.mxu1 %v7225_v26 }
 0x428   : > { %5574 = vmatpush1.bf16.msra.mxu0 %v7228_v28  ;;  %5438 = vmatprep.subr.bf16.mxu1 %v7233_v30  ;;  %v7294_v28 = vld [vmem:[%s8451_s29 + $0x458] ss:$24 sps:$4 sm:$0xff]   ;;  %v7299_v30 = vld [vmem:[%s8451_s29 + $0x634] ss:$24 sps:$4 sm:$0xff]  }
 0x429   : > { %5575 = vmatprep.subr.bf16.mxu0 %v7236_v31  ;;  %v7302_v31 = vld [vmem:[%s8451_s29 + $0x48c] ss:$24 sps:$4 sm:$0xff]  }
 0x42b   : > { %5439 = vmatpush1.bf16.msra.mxu1 %v7231_v32  ;;  %v7297_v32 = vld [vmem:[%s8451_s29 + $0x630] ss:$24 sps:$4 sm:$0xff]  }
 0x42c   : > { %5576 = vmatpush1.bf16.msra.mxu0 %v7234_v34  ;;  %5440 = vmatprep.subr.bf16.mxu1 %v7239_v36  ;;  %v7300_v34 = vld [vmem:[%s8451_s29 + $0x488] ss:$24 sps:$4 sm:$0xff]   ;;  %v7305_v36 = vld [vmem:[%s8451_s29 + $0x664] ss:$24 sps:$4 sm:$0xff]  }
 0x42d   : > { %5577 = vmatprep.subr.bf16.mxu0 %v7242_v37  ;;  %v7308_v37 = vld [vmem:[%s8451_s29 + $0x4bc] ss:$24 sps:$4 sm:$0xff]  }
 0x42f   : > { %5441 = vmatpush1.bf16.msra.mxu1 %v7237_v38  ;;  %v7303_v38 = vld [vmem:[%s8451_s29 + $0x660] ss:$24 sps:$4 sm:$0xff]  }
 0x430   : > { %5578 = vmatpush1.bf16.msra.mxu0 %v7240_v39  ;;  %5442 = vmatprep.subr.bf16.mxu1 %v7245_v40  ;;  %v7306_v39 = vld [vmem:[%s8451_s29 + $0x4b8] ss:$24 sps:$4 sm:$0xff]   ;;  %v7311_v40 = vld [vmem:[%s8451_s29 + $0x694] ss:$24 sps:$4 sm:$0xff]  }
 0x431   : > { %5579 = vmatprep.subr.bf16.mxu0 %v7248_v41  ;;  %v7314_v41 = vld [vmem:[%s8451_s29 + $0x4ec] ss:$24 sps:$4 sm:$0xff]  }
 0x433   : > { %5443 = vmatpush1.bf16.msra.mxu1 %v7243_v42  ;;  %v7309_v42 = vld [vmem:[%s8451_s29 + $0x690] ss:$24 sps:$4 sm:$0xff]  }
 0x434   : > { %5580 = vmatpush1.bf16.msra.mxu0 %v7246_v43  ;;  %5444 = vmatprep.subr.bf16.mxu1 %v7251_v44  ;;  %v7312_v43 = vld [vmem:[%s8451_s29 + $0x4e8] ss:$24 sps:$4 sm:$0xff]   ;;  %v7317_v44 = vld [vmem:[%s8451_s29 + $0x6c4] ss:$24 sps:$4 sm:$0xff]  }
 0x435   : > { %5590 = vmatprep.subr.bf16.mxu0 %v7254_v48  ;;  %v7320_v48 = vld [vmem:[%s8451_s29 + $0x51c] ss:$24 sps:$4 sm:$0xff]  }
 0x437   : > { %5445 = vmatpush1.bf16.msra.mxu1 %v7249_v49  ;;  %5582 = vmatmul.mubr.bf16.vlgmr.msra.gmra.mrb[24].mxu0 %v8596_v10  ;;  %v7315_v49 = vld [vmem:[%s8451_s29 + $0x6c0] ss:$24 sps:$4 sm:$0xff]  }
 0x438   : > { %5591 = vmatpush1.bf16.msra.mxu0 %v7252_v45  ;;  %5446 = vmatprep.subr.bf16.mxu1 %v7257_v29  ;;  %v7318_v45 = vld [vmem:[%s8451_s29 + $0x518] ss:$24 sps:$4 sm:$0xff]   ;;  %v7323_v29 = vld [vmem:[%s8451_s29 + $0x6f4] ss:$24 sps:$4 sm:$0xff]  }
 0x439   : > { %5592 = vmatprep.subr.bf16.mxu0 %v7260_v46  ;;  %v7326_v46 = vld [vmem:[%s8451_s29 + $0x54c] ss:$24 sps:$4 sm:$0xff]  }
 0x43b   : > { %5447 = vmatpush1.bf16.msra.mxu1 %v7255_v47  ;;  %v7321_v47 = vld [vmem:[%s8451_s29 + $0x6f0] ss:$24 sps:$4 sm:$0xff]  }
 0x43c   : > { %5593 = vmatpush1.bf16.msra.mxu0 %v7258_v50  ;;  %5448 = vmatprep.subr.bf16.mxu1 %v7263_v56  ;;  %v7324_v50 = vld [vmem:[%s8451_s29 + $0x548] ss:$24 sps:$4 sm:$0xff]   ;;  %v7329_v56 = vld [vmem:[%s8451_s29 + $0x724] ss:$24 sps:$4 sm:$0xff]  }
 0x43d   : > { %5594 = vmatprep.subr.bf16.mxu0 %v7266_v57  ;;  %v7332_v57 = vld [vmem:[%s8451_s29 + $0x57c] ss:$24 sps:$4 sm:$0xff]  }
 0x43f   : > { %5449 = vmatpush1.bf16.msra.mxu1 %v7261_v58  ;;  %v7327_v58 = vld [vmem:[%s8451_s29 + $0x720] ss:$24 sps:$4 sm:$0xff]  }
 0x440   : > { %5595 = vmatpush1.bf16.msra.mxu0 %v7264_v59  ;;  %5450 = vmatprep.subr.bf16.mxu1 %v7269_v60  ;;  %v7330_v59 = vld [vmem:[%s8451_s29 + $0x578] ss:$24 sps:$4 sm:$0xff]   ;;  %v7335_v60 = vld [vmem:[%s8451_s29 + $0x754] ss:$24 sps:$4 sm:$0xff]  }
 0x441   : > { %5596 = vmatprep.subr.bf16.mxu0 %v7272_v61  ;;  %v7338_v61 = vld [vmem:[%s8451_s29 + $0x5ac] ss:$24 sps:$4 sm:$0xff]  }
 0x443   : > { %5451 = vmatpush1.bf16.msra.mxu1 %v7267_v62  ;;  %v7333_v62 = vld [vmem:[%s8451_s29 + $0x750] ss:$24 sps:$4 sm:$0xff]  }
 0x444   : > { %5597 = vmatpush1.bf16.msra.mxu0 %v7270_v63  ;;  %5452 = vmatprep.subr.bf16.mxu1 %v7275_v1  ;;  %v7336_v63 = vld [vmem:[%s8451_s29 + $0x5a8] ss:$24 sps:$4 sm:$0xff]   ;;  %v7341_v1 = vld [vmem:[%s8451_s29 + $0x784] ss:$24 sps:$4 sm:$0xff]  }
 0x445   : > { %5598 = vmatprep.subr.bf16.mxu0 %v7278_v3  ;;  %v7344_v3 = vld [vmem:[%s8451_s29 + $0x5dc] ss:$24 sps:$4 sm:$0xff]  }
 0x447   : > { %5453 = vmatpush1.bf16.msra.mxu1 %v7273_v6  ;;  %v7339_v6 = vld [vmem:[%s8451_s29 + $0x780] ss:$24 sps:$4 sm:$0xff]  }
 0x448   : > { %5599 = vmatpush1.bf16.msra.mxu0 %v7276_v33  ;;  %5454 = vmatprep.subr.bf16.mxu1 %v7281_v7  ;;  %v7342_v33 = vld [vmem:[%s8451_s29 + $0x5d8] ss:$24 sps:$4 sm:$0xff]   ;;  %v7347_v7 = vld [vmem:[%s8451_s29 + $0x7b4] ss:$24 sps:$4 sm:$0xff]  }
 0x449   : > { %v2862_v16 = vpop.f32.mrb[16].mxu0  ;;  %5600 = vmatprep.subr.bf16.mxu0 %v7284_v8  ;;  %v7350_v8 = vld [vmem:[%s8451_s29 + $0x60c] ss:$24 sps:$4 sm:$0xff]  }
 0x44a   : > { %v6813_v18 = vadd.f32 %v2862_v16, %v1396_v9  ;;  %v2864_v19 = vpop.f32.mrb[17].mxu0  ;;  %v7345_v9 = vld [vmem:[%s8451_s29 + $0x7b0] ss:$24 sps:$4 sm:$0xff]  }
 0x44b   : > { %v6814_v27 = vadd.f32 %v2864_v19, %v1400_v4  ;;  %5455 = vmatpush1.bf16.msra.mxu1 %v7279_v13  ;;  %v2866_v20 = vpop.f32.mrb[18].mxu0  ;;  %v7348_v13 = vld [vmem:[%s8451_s29 + $0x608] ss:$24 sps:$4 sm:$0xff]   ;;  %v7353_v4 = vld [vmem:[%s8451_s29 + $0x7e4] ss:$24 sps:$4 sm:$0xff]  }
 0x44c   : > { %v3035_v22 = vmax.f32 %v6813_v18, 0.0  ;;  %5601 = vmatpush1.bf16.msra.mxu0 %v7282_v14  ;;  %v2867_v11 = vpop.f32.mrb[19].mxu0  ;;  %5456 = vmatprep.subr.bf16.mxu1 %v7287_v15  ;;  %v7356_v14 = vld [vmem:[%s8451_s29 + $0x63c] ss:$24 sps:$4 sm:$0xff]   ;;  %v7351_v15 = vld [vmem:[%s8451_s29 + $0x7e0] ss:$24 sps:$4 sm:$0xff]  }
 0x44d   : > { %v3036_v23 = vmax.f32 %v6814_v27, 0.0  ;;  %5602 = vmatprep.subr.bf16.mxu0 %v7290_v5  ;;  %v7354_v16 = vld [vmem:[%s8451_s29 + $0x638] ss:$24 sps:$4 sm:$0xff]   ;;  %v7359_v5 = vld [vmem:[%s8451_s29 + $0x814] ss:$24 sps:$4 sm:$0xff]  }
 0x44e   : > { %v8672_v26 = vpack.c.bf16 %v3035_v22, %v3035_v22  ;;  %v7362_v18 = vld [vmem:[%s8451_s29 + $0x66c] ss:$24 sps:$4 sm:$0xff]   ;;  %v7357_v19 = vld [vmem:[%s8451_s29 + $0x810] ss:$24 sps:$4 sm:$0xff]   ;;  %v7363_v22 = vld [vmem:[%s8451_s29 + $0x840] ss:$24 sps:$4 sm:$0xff]  }
 0x44f   : > { %v8669_v25 = vpack.c.bf16 %v3036_v23, %v3036_v23  ;;  %5457 = vmatpush1.bf16.msra.mxu1 %v7285_v21  ;;  %v7360_v27 = vld [vmem:[%s8451_s29 + $0x668] ss:$24 sps:$4 sm:$0xff]   ;;  %v7365_v20 = vld [vmem:[%s8451_s29 + $0x844] ss:$24 sps:$4 sm:$0xff]   ;;  %v7366_v11 = vld [vmem:[%s8451_s29 + $0x698] ss:$24 sps:$4 sm:$0xff]  }
 0x450   : > { %5603 = vmatpush1.bf16.msra.mxu0 %v7288_v12  ;;  %5467 = vmatprep.subr.bf16.mxu1 %v7293_v17  ;;  %v7368_v21 = vld [vmem:[%s8451_s29 + $0x69c] ss:$24 sps:$4 sm:$0xff]   ;;  %v7374_v17 = vld [vmem:[%s8451_s29 + $0x6cc] ss:$24 sps:$4 sm:$0xff]   ;;  %v1403_v23 = vsub.s32 4, %v8457_v52 }
 0x451   : > { %5458 = vmatprep.mubr.bf16.mxu1 %v8669_v25  ;;  %5622 = vmatprep.mubr.bf16.mxu0 %v8669_v25  ;;  %v7371_v12 = vld [vmem:[%s8451_s29 + $0x874] ss:$24 sps:$4 sm:$0xff]  }
 0x452   : > { %5459 = vmatmul.mubr.bf16.vlgmr.msra.gmra.mrb[8].mxu1 %v8672_v26  ;;  %5604 = vmatprep.subr.bf16.mxu0 %v7296_v24  ;;  %v7369_v24 = vld [vmem:[%s8451_s29 + $0x870] ss:$24 sps:$4 sm:$0xff]  }
 0x453   : > { %5468 = vmatpush1.bf16.msra.mxu1 %v7291_v54  ;;  %v1407_v54 = vsub.s32 5, %v8457_v52 }
 0x454   : > { %5605 = vmatpush1.bf16.msra.mxu0 %v7294_v28  ;;  %5469 = vmatprep.subr.bf16.mxu1 %v7299_v30  ;;  %v7372_v28 = vld [vmem:[%s8451_s29 + $0x6c8] ss:$24 sps:$4 sm:$0xff]   ;;  %v7377_v30 = vld [vmem:[%s8451_s29 + $0x8a4] ss:$24 sps:$4 sm:$0xff]  }
 0x455   : > { %5606 = vmatprep.subr.bf16.mxu0 %v7302_v31  ;;  %v7380_v31 = vld [vmem:[%s8451_s29 + $0x6fc] ss:$24 sps:$4 sm:$0xff]  }
 0x457   : > { %5470 = vmatpush1.bf16.msra.mxu1 %v7297_v32  ;;  %v1404_v32 = vrot.slane %v8578_v51, %v1403_v23 }
 0x458   : > { %5607 = vmatpush1.bf16.msra.mxu0 %v7300_v34  ;;  %5471 = vmatprep.subr.bf16.mxu1 %v7305_v36  ;;  %v1408_v34 = vrot.slane %v8578_v51, %v1407_v54  ;;  %v7375_v36 = vld [vmem:[%s8451_s29 + $0x8a0] ss:$24 sps:$4 sm:$0xff]  }
 0x459   : > { %5608 = vmatprep.subr.bf16.mxu0 %v7308_v37  ;;  %v7378_v37 = vld [vmem:[%s8451_s29 + $0x6f8] ss:$24 sps:$4 sm:$0xff]  }
 0x45b   : > { %5472 = vmatpush1.bf16.msra.mxu1 %v7303_v38  ;;  %v7383_v38 = vld [vmem:[%s8451_s29 + $0x8d4] ss:$24 sps:$4 sm:$0xff]  }
 0x45c   : > { %5609 = vmatpush1.bf16.msra.mxu0 %v7306_v39  ;;  %5473 = vmatprep.subr.bf16.mxu1 %v7311_v40  ;;  %v7386_v40 = vld [vmem:[%s8451_s29 + $0x72c] ss:$24 sps:$4 sm:$0xff]  }
 0x45d   : > { %5610 = vmatprep.subr.bf16.mxu0 %v7314_v41 }
 0x45f   : > { %5474 = vmatpush1.bf16.msra.mxu1 %v7309_v42 }
 0x460   : > { %5611 = vmatpush1.bf16.msra.mxu0 %v7312_v43  ;;  %5475 = vmatprep.subr.bf16.mxu1 %v7317_v44 }
 0x461   : > { %5612 = vmatprep.subr.bf16.mxu0 %v7320_v48  ;;  %v7381_v48 = vld [vmem:[%s8451_s29 + $0x8d0] ss:$24 sps:$4 sm:$0xff]  }
 0x463   : > { %5476 = vmatpush1.bf16.msra.mxu1 %v7315_v49 }
 0x464   : > { %5613 = vmatpush1.bf16.msra.mxu0 %v7318_v45  ;;  %5477 = vmatprep.subr.bf16.mxu1 %v7323_v29  ;;  %v7384_v29 = vld [vmem:[%s8451_s29 + $0x728] ss:$24 sps:$4 sm:$0xff]  }
 0x465   : > { %5614 = vmatprep.subr.bf16.mxu0 %v7326_v46  ;;  %v7389_v46 = vld [vmem:[%s8451_s29 + $0x904] ss:$24 sps:$4 sm:$0xff]  }
 0x467   : > { %5478 = vmatpush1.bf16.msra.mxu1 %v7321_v47 }
 0x468   : > { %5615 = vmatpush1.bf16.msra.mxu0 %v7324_v50  ;;  %5479 = vmatprep.subr.bf16.mxu1 %v7329_v56  ;;  %v7392_v50 = vld [vmem:[%s8451_s29 + $0x75c] ss:$24 sps:$4 sm:$0xff]  }
 0x469   : > { %5616 = vmatprep.subr.bf16.mxu0 %v7332_v57  ;;  %v7387_v57 = vld [vmem:[%s8451_s29 + $0x900] ss:$24 sps:$4 sm:$0xff]  }
 0x46b   : > { %5480 = vmatpush1.bf16.msra.mxu1 %v7327_v58 }
 0x46c   : > { %5617 = vmatpush1.bf16.msra.mxu0 %v7330_v59  ;;  %5481 = vmatprep.subr.bf16.mxu1 %v7335_v60  ;;  %v7390_v59 = vld [vmem:[%s8451_s29 + $0x758] ss:$24 sps:$4 sm:$0xff]   ;;  %v7395_v60 = vld [vmem:[%s8451_s29 + $0x934] ss:$24 sps:$4 sm:$0xff]  }
 0x46d   : > { %5618 = vmatprep.subr.bf16.mxu0 %v7338_v61  ;;  %v7398_v61 = vld [vmem:[%s8451_s29 + $0x78c] ss:$24 sps:$4 sm:$0xff]  }
 0x46f   : > { %5482 = vmatpush1.bf16.msra.mxu1 %v7333_v62  ;;  %v7393_v62 = vld [vmem:[%s8451_s29 + $0x930] ss:$24 sps:$4 sm:$0xff]  }
 0x470   : > { %5619 = vmatpush1.bf16.msra.mxu0 %v7336_v63  ;;  %5483 = vmatprep.subr.bf16.mxu1 %v7341_v1  ;;  %v7396_v63 = vld [vmem:[%s8451_s29 + $0x788] ss:$24 sps:$4 sm:$0xff]   ;;  %v7401_v1 = vld [vmem:[%s8451_s29 + $0x964] ss:$24 sps:$4 sm:$0xff]  }
 0x471   : > { %5620 = vmatprep.subr.bf16.mxu0 %v7344_v3  ;;  %v7404_v3 = vld [vmem:[%s8451_s29 + $0x7bc] ss:$24 sps:$4 sm:$0xff]  }
 0x473   : > { %5484 = vmatpush1.bf16.msra.mxu1 %v7339_v6  ;;  %v7399_v6 = vld [vmem:[%s8451_s29 + $0x960] ss:$24 sps:$4 sm:$0xff]  }
 0x474   : > { %5621 = vmatpush1.bf16.msra.mxu0 %v7342_v33  ;;  %5485 = vmatprep.subr.bf16.mxu1 %v7347_v7  ;;  %v7402_v33 = vld [vmem:[%s8451_s29 + $0x7b8] ss:$24 sps:$4 sm:$0xff]   ;;  %v7407_v7 = vld [vmem:[%s8451_s29 + $0x994] ss:$24 sps:$4 sm:$0xff]  }
 0x475   : > { %5631 = vmatprep.subr.bf16.mxu0 %v7350_v8  ;;  %v7410_v8 = vld [vmem:[%s8451_s29 + $0x7ec] ss:$24 sps:$4 sm:$0xff]  }
 0x477   : > { %5486 = vmatpush1.bf16.msra.mxu1 %v7345_v9  ;;  %5623 = vmatmul.mubr.bf16.vlgmr.msra.gmra.mrb[24].mxu0 %v8672_v26  ;;  %v7405_v9 = vld [vmem:[%s8451_s29 + $0x990] ss:$24 sps:$4 sm:$0xff]  }
 0x478   : > { %5632 = vmatpush1.bf16.msra.mxu0 %v7348_v13  ;;  %5487 = vmatprep.subr.bf16.mxu1 %v7353_v4  ;;  %v7408_v13 = vld [vmem:[%s8451_s29 + $0x7e8] ss:$24 sps:$4 sm:$0xff]   ;;  %v7413_v4 = vld [vmem:[%s8451_s29 + $0x9c4] ss:$24 sps:$4 sm:$0xff]  }
 0x479   : > { %5633 = vmatprep.subr.bf16.mxu0 %v7356_v14  ;;  %v7416_v14 = vld [vmem:[%s8451_s29 + $0x81c] ss:$24 sps:$4 sm:$0xff]  }
 0x47b   : > { %5488 = vmatpush1.bf16.msra.mxu1 %v7351_v15  ;;  %v7411_v15 = vld [vmem:[%s8451_s29 + $0x9c0] ss:$24 sps:$4 sm:$0xff]  }
 0x47c   : > { %5634 = vmatpush1.bf16.msra.mxu0 %v7354_v16  ;;  %5489 = vmatprep.subr.bf16.mxu1 %v7359_v5  ;;  %v7414_v16 = vld [vmem:[%s8451_s29 + $0x818] ss:$24 sps:$4 sm:$0xff]   ;;  %v7419_v5 = vld [vmem:[%s8451_s29 + $0x9f4] ss:$24 sps:$4 sm:$0xff]  }
 0x47d   : > { %5635 = vmatprep.subr.bf16.mxu0 %v7362_v18  ;;  %v7422_v18 = vld [vmem:[%s8451_s29 + $0x84c] ss:$24 sps:$4 sm:$0xff]  }
 0x47f   : > { %5490 = vmatpush1.bf16.msra.mxu1 %v7357_v19  ;;  %v7417_v19 = vld [vmem:[%s8451_s29 + $0x9f0] ss:$24 sps:$4 sm:$0xff]  }
 0x480   : > { %5636 = vmatpush1.bf16.msra.mxu0 %v7360_v27  ;;  %5491 = vmatprep.subr.bf16.mxu1 %v7365_v20  ;;  %v7420_v27 = vld [vmem:[%s8451_s29 + $0x848] ss:$24 sps:$4 sm:$0xff]   ;;  %v7425_v20 = vld [vmem:[%s8451_s29 + $0xa24] ss:$24 sps:$4 sm:$0xff]  }
 0x481   : > { %5637 = vmatprep.subr.bf16.mxu0 %v7368_v21  ;;  %v7428_v21 = vld [vmem:[%s8451_s29 + $0x87c] ss:$24 sps:$4 sm:$0xff]  }
 0x483   : > { %5492 = vmatpush1.bf16.msra.mxu1 %v7363_v22  ;;  %v7423_v22 = vld [vmem:[%s8451_s29 + $0xa20] ss:$24 sps:$4 sm:$0xff]  }
 0x484   : > { %5638 = vmatpush1.bf16.msra.mxu0 %v7366_v11  ;;  %5493 = vmatprep.subr.bf16.mxu1 %v7371_v12  ;;  %v7426_v11 = vld [vmem:[%s8451_s29 + $0x878] ss:$24 sps:$4 sm:$0xff]   ;;  %v7431_v12 = vld [vmem:[%s8451_s29 + $0xa54] ss:$24 sps:$4 sm:$0xff]  }
 0x485   : > { %5639 = vmatprep.subr.bf16.mxu0 %v7374_v17  ;;  %v7434_v17 = vld [vmem:[%s8451_s29 + $0x8ac] ss:$24 sps:$4 sm:$0xff]  }
 0x487   : > { %5494 = vmatpush1.bf16.msra.mxu1 %v7369_v24  ;;  %v7429_v24 = vld [vmem:[%s8451_s29 + $0xa50] ss:$24 sps:$4 sm:$0xff]  }
 0x488   : > { %5640 = vmatpush1.bf16.msra.mxu0 %v7372_v28  ;;  %5495 = vmatprep.subr.bf16.mxu1 %v7377_v30  ;;  %v7432_v28 = vld [vmem:[%s8451_s29 + $0x8a8] ss:$24 sps:$4 sm:$0xff]   ;;  %v7437_v30 = vld [vmem:[%s8451_s29 + $0xa84] ss:$24 sps:$4 sm:$0xff]  }
 0x489   : > { %v2944_v39 = vpop.f32.mrb[4].mxu1  ;;  %5641 = vmatprep.subr.bf16.mxu0 %v7380_v31  ;;  %v7440_v31 = vld [vmem:[%s8451_s29 + $0x8dc] ss:$24 sps:$4 sm:$0xff]  }
 0x48a   : > { %v6815_v41 = vadd.f32 %v2944_v39, %v1404_v32  ;;  %v2946_v42 = vpop.f32.mrb[5].mxu1  ;;  %v7435_v32 = vld [vmem:[%s8451_s29 + $0xa80] ss:$24 sps:$4 sm:$0xff]  }
 0x48b   : > { %v6816_v43 = vadd.f32 %v2946_v42, %v1408_v34  ;;  %v2948_v44 = vpop.f32.mrb[6].mxu1  ;;  %5496 = vmatpush1.bf16.msra.mxu1 %v7375_v36  ;;  %v7438_v34 = vld [vmem:[%s8451_s29 + $0x8d8] ss:$24 sps:$4 sm:$0xff]   ;;  %v7443_v36 = vld [vmem:[%s8451_s29 + $0xab4] ss:$24 sps:$4 sm:$0xff]  }
 0x48c   : > { %v3037_v49 = vmax.f32 %v6815_v41, 0.0  ;;  %v2949_v45 = vpop.f32.mrb[7].mxu1  ;;  %5642 = vmatpush1.bf16.msra.mxu0 %v7378_v37  ;;  %5497 = vmatprep.subr.bf16.mxu1 %v7383_v38  ;;  %v7446_v37 = vld [vmem:[%s8451_s29 + $0x90c] ss:$24 sps:$4 sm:$0xff]   ;;  %v7441_v38 = vld [vmem:[%s8451_s29 + $0xab0] ss:$24 sps:$4 sm:$0xff]  }
 0x48d   : > { %v3038_v47 = vmax.f32 %v6816_v43, 0.0  ;;  %5643 = vmatprep.subr.bf16.mxu0 %v7386_v40  ;;  %v7444_v39 = vld [vmem:[%s8451_s29 + $0x908] ss:$24 sps:$4 sm:$0xff]   ;;  %v7449_v40 = vld [vmem:[%s8451_s29 + $0xae4] ss:$24 sps:$4 sm:$0xff]  }
 0x48e   : > { %v8752_v58 = vpack.c.bf16 %v3037_v49, %v3037_v49  ;;  %v7452_v41 = vld [vmem:[%s8451_s29 + $0x93c] ss:$24 sps:$4 sm:$0xff]   ;;  %v7447_v42 = vld [vmem:[%s8451_s29 + $0xae0] ss:$24 sps:$4 sm:$0xff]   ;;  %v7453_v49 = vld [vmem:[%s8451_s29 + $0xb10] ss:$24 sps:$4 sm:$0xff]  }
 0x48f   : > { %v8749_v56 = vpack.c.bf16 %v3038_v47, %v3038_v47  ;;  %5498 = vmatpush1.bf16.msra.mxu1 %v7381_v48  ;;  %v7450_v43 = vld [vmem:[%s8451_s29 + $0x938] ss:$24 sps:$4 sm:$0xff]   ;;  %v7455_v44 = vld [vmem:[%s8451_s29 + $0xb14] ss:$24 sps:$4 sm:$0xff]   ;;  %v7456_v45 = vld [vmem:[%s8451_s29 + $0x968] ss:$24 sps:$4 sm:$0xff]  }
 0x490   : > { %5644 = vmatpush1.bf16.msra.mxu0 %v7384_v29  ;;  %5508 = vmatprep.subr.bf16.mxu1 %v7389_v46  ;;  %v7458_v48 = vld [vmem:[%s8451_s29 + $0x96c] ss:$24 sps:$4 sm:$0xff]   ;;  %v7464_v46 = vld [vmem:[%s8451_s29 + $0x99c] ss:$24 sps:$4 sm:$0xff]   ;;  %v7459_v47 = vld [vmem:[%s8451_s29 + $0xb40] ss:$24 sps:$4 sm:$0xff]  }
 0x491   : > { %5499 = vmatprep.mubr.bf16.mxu1 %v8749_v56  ;;  %5663 = vmatprep.mubr.bf16.mxu0 %v8749_v56  ;;  %v7461_v29 = vld [vmem:[%s8451_s29 + $0xb44] ss:$24 sps:$4 sm:$0xff]  }
 0x492   : > { %5500 = vmatmul.mubr.bf16.vlgmr.msra.gmra.mrb[8].mxu1 %v8752_v58  ;;  %5645 = vmatprep.subr.bf16.mxu0 %v7392_v50  ;;  %v7462_v50 = vld [vmem:[%s8451_s29 + $0x998] ss:$24 sps:$4 sm:$0xff]  }
 0x493   : > { %5509 = vmatpush1.bf16.msra.mxu1 %v7387_v57  ;;  %v7467_v57 = vld [vmem:[%s8451_s29 + $0xb74] ss:$24 sps:$4 sm:$0xff]  }
 0x494   : > { %5646 = vmatpush1.bf16.msra.mxu0 %v7390_v59  ;;  %5510 = vmatprep.subr.bf16.mxu1 %v7395_v60  ;;  %v7470_v59 = vld [vmem:[%s8451_s29 + $0x9cc] ss:$24 sps:$4 sm:$0xff]   ;;  %v7465_v60 = vld [vmem:[%s8451_s29 + $0xb70] ss:$24 sps:$4 sm:$0xff]  }
 0x495   : > { %5647 = vmatprep.subr.bf16.mxu0 %v7398_v61  ;;  %v1411_v61 = vsub.s32 6, %v8457_v52 }
 0x497   : > { %5511 = vmatpush1.bf16.msra.mxu1 %v7393_v62  ;;  %v7468_v62 = vld [vmem:[%s8451_s29 + $0x9c8] ss:$24 sps:$4 sm:$0xff]  }
 0x498   : > { %5648 = vmatpush1.bf16.msra.mxu0 %v7396_v63  ;;  %5512 = vmatprep.subr.bf16.mxu1 %v7401_v1  ;;  %v7473_v63 = vld [vmem:[%s8451_s29 + $0xba4] ss:$24 sps:$4 sm:$0xff]   ;;  %v1415_v1 = vsub.s32 7, %v8457_v52 }
 0x499   : > { %5649 = vmatprep.subr.bf16.mxu0 %v7404_v3  ;;  %v7476_v3 = vld [vmem:[%s8451_s29 + $0x9fc] ss:$24 sps:$4 sm:$0xff]  }
 0x49b   : > { %5513 = vmatpush1.bf16.msra.mxu1 %v7399_v6  ;;  %v1412_v6 = vrot.slane %v8578_v51, %v1411_v61  ;;  %v7530_v61 = vld [vmem:[%s8451_s29 + $0xbac] ss:$24 sps:$4 sm:$0xff]  }
 0x49c   : > { %5650 = vmatpush1.bf16.msra.mxu0 %v7402_v33  ;;  %5514 = vmatprep.subr.bf16.mxu1 %v7407_v7  ;;  %v7471_v33 = vld [vmem:[%s8451_s29 + $0xba0] ss:$24 sps:$4 sm:$0xff]   ;;  %v1416_v7 = vrot.slane %v8578_v51, %v1415_v1  ;;  %v7533_v1 = vld [vmem:[%s8451_s29 + $0x194] ss:$24 sps:$4 sm:$0xff]  }
 0x49d   : > { %5651 = vmatprep.subr.bf16.mxu0 %v7410_v8  ;;  %v7474_v8 = vld [vmem:[%s8451_s29 + $0x9f8] ss:$24 sps:$4 sm:$0xff]  }
 0x49f   : > { %5515 = vmatpush1.bf16.msra.mxu1 %v7405_v9  ;;  %v7479_v9 = vld [vmem:[%s8451_s29 + $0xbd4] ss:$24 sps:$4 sm:$0xff]  }
 0x4a0   : > { %5652 = vmatpush1.bf16.msra.mxu0 %v7408_v13  ;;  %5516 = vmatprep.subr.bf16.mxu1 %v7413_v4  ;;  %v7482_v13 = vld [vmem:[%s8451_s29 + $0xa2c] ss:$24 sps:$4 sm:$0xff]  }
 0x4a1   : > { %5653 = vmatprep.subr.bf16.mxu0 %v7416_v14 }
 0x4a3   : > { %5517 = vmatpush1.bf16.msra.mxu1 %v7411_v15 }
 0x4a4   : > { %5654 = vmatpush1.bf16.msra.mxu0 %v7414_v16  ;;  %5518 = vmatprep.subr.bf16.mxu1 %v7419_v5  ;;  %v7477_v16 = vld [vmem:[%s8451_s29 + $0xbd0] ss:$24 sps:$4 sm:$0xff]  }
 0x4a5   : > { %5655 = vmatprep.subr.bf16.mxu0 %v7422_v18 }
 0x4a7   : > { %5519 = vmatpush1.bf16.msra.mxu1 %v7417_v19  ;;  %v7480_v19 = vld [vmem:[%s8451_s29 + $0xa28] ss:$24 sps:$4 sm:$0xff]  }
 0x4a8   : > { %5656 = vmatpush1.bf16.msra.mxu0 %v7420_v27  ;;  %5520 = vmatprep.subr.bf16.mxu1 %v7425_v20  ;;  %v7485_v27 = vld [vmem:[%s8451_s29 + $0x14] ss:$24 sps:$4 sm:$0xff]  }
 0x4a9   : > { %5657 = vmatprep.subr.bf16.mxu0 %v7428_v21  ;;  %v7488_v21 = vld [vmem:[%s8451_s29 + $0xa5c] ss:$24 sps:$4 sm:$0xff]  }
 0x4ab   : > { %5521 = vmatpush1.bf16.msra.mxu1 %v7423_v22 }
 0x4ac   : > { %5658 = vmatpush1.bf16.msra.mxu0 %v7426_v11  ;;  %5522 = vmatprep.subr.bf16.mxu1 %v7431_v12  ;;  %v7483_v12 = vld [vmem:[%s8451_s29 + $0x10] ss:$24 sps:$4 sm:$0xff]  }
 0x4ad   : > { %5659 = vmatprep.subr.bf16.mxu0 %v7434_v17  ;;  %v7486_v17 = vld [vmem:[%s8451_s29 + $0xa58] ss:$24 sps:$4 sm:$0xff]  }
 0x4af   : > { %5523 = vmatpush1.bf16.msra.mxu1 %v7429_v24 }
 0x4b0   : > { %5660 = vmatpush1.bf16.msra.mxu0 %v7432_v28  ;;  %5524 = vmatprep.subr.bf16.mxu1 %v7437_v30  ;;  %v7491_v28 = vld [vmem:[%s8451_s29 + $0x44] ss:$24 sps:$4 sm:$0xff]  }
 0x4b1   : > { %5661 = vmatprep.subr.bf16.mxu0 %v7440_v31  ;;  %v7494_v30 = vld [vmem:[%s8451_s29 + $0xa8c] ss:$24 sps:$4 sm:$0xff]   ;;  %v7489_v31 = vld [vmem:[%s8451_s29 + $0x40] ss:$24 sps:$4 sm:$0xff]  }
 0x4b3   : > { %5525 = vmatpush1.bf16.msra.mxu1 %v7435_v32  ;;  %v7492_v32 = vld [vmem:[%s8451_s29 + $0xa88] ss:$24 sps:$4 sm:$0xff]  }
 0x4b4   : > { %5662 = vmatpush1.bf16.msra.mxu0 %v7438_v34  ;;  %5526 = vmatprep.subr.bf16.mxu1 %v7443_v36  ;;  %v7497_v34 = vld [vmem:[%s8451_s29 + $0x74] ss:$24 sps:$4 sm:$0xff]  }
 0x4b5   : > { %5672 = vmatprep.subr.bf16.mxu0 %v7446_v37  ;;  %v7500_v36 = vld [vmem:[%s8451_s29 + $0xabc] ss:$24 sps:$4 sm:$0xff]   ;;  %v7495_v37 = vld [vmem:[%s8451_s29 + $0x70] ss:$24 sps:$4 sm:$0xff]  }
 0x4b7   : > { %5527 = vmatpush1.bf16.msra.mxu1 %v7441_v38  ;;  %5664 = vmatmul.mubr.bf16.vlgmr.msra.gmra.mrb[24].mxu0 %v8752_v58  ;;  %v7498_v38 = vld [vmem:[%s8451_s29 + $0xab8] ss:$24 sps:$4 sm:$0xff]  }
 0x4b8   : > { %5673 = vmatpush1.bf16.msra.mxu0 %v7444_v39  ;;  %5528 = vmatprep.subr.bf16.mxu1 %v7449_v40  ;;  %v7503_v39 = vld [vmem:[%s8451_s29 + $0xa4] ss:$24 sps:$4 sm:$0xff]  }
 0x4b9   : > { %5674 = vmatprep.subr.bf16.mxu0 %v7452_v41  ;;  %v7506_v40 = vld [vmem:[%s8451_s29 + $0xaec] ss:$24 sps:$4 sm:$0xff]   ;;  %v7504_v41 = vld [vmem:[%s8451_s29 + $0xae8] ss:$24 sps:$4 sm:$0xff]  }
 0x4bb   : > { %5529 = vmatpush1.bf16.msra.mxu1 %v7447_v42  ;;  %v7509_v42 = vld [vmem:[%s8451_s29 + $0xd4] ss:$24 sps:$4 sm:$0xff]  }
 0x4bc   : > { %5675 = vmatpush1.bf16.msra.mxu0 %v7450_v43  ;;  %5530 = vmatprep.subr.bf16.mxu1 %v7455_v44  ;;  %v7512_v43 = vld [vmem:[%s8451_s29 + $0xb1c] ss:$24 sps:$4 sm:$0xff]   ;;  %v7507_v44 = vld [vmem:[%s8451_s29 + $0xd0] ss:$24 sps:$4 sm:$0xff]  }
 0x4bd   : > { %5676 = vmatprep.subr.bf16.mxu0 %v7458_v48  ;;  %v7510_v48 = vld [vmem:[%s8451_s29 + $0xb18] ss:$24 sps:$4 sm:$0xff]  }
 0x4bf   : > { %5531 = vmatpush1.bf16.msra.mxu1 %v7453_v49  ;;  %v7515_v49 = vld [vmem:[%s8451_s29 + $0x104] ss:$24 sps:$4 sm:$0xff]  }
 0x4c0   : > { %5677 = vmatpush1.bf16.msra.mxu0 %v7456_v45  ;;  %5532 = vmatprep.subr.bf16.mxu1 %v7461_v29  ;;  %v7518_v45 = vld [vmem:[%s8451_s29 + $0xb4c] ss:$24 sps:$4 sm:$0xff]   ;;  %v7513_v29 = vld [vmem:[%s8451_s29 + $0x100] ss:$24 sps:$4 sm:$0xff]  }
 0x4c1   : > { %5678 = vmatprep.subr.bf16.mxu0 %v7464_v46  ;;  %v7516_v46 = vld [vmem:[%s8451_s29 + $0xb48] ss:$24 sps:$4 sm:$0xff]  }
 0x4c3   : > { %5533 = vmatpush1.bf16.msra.mxu1 %v7459_v47  ;;  %v7521_v47 = vld [vmem:[%s8451_s29 + $0x134] ss:$24 sps:$4 sm:$0xff]  }
 0x4c4   : > { %5679 = vmatpush1.bf16.msra.mxu0 %v7462_v50  ;;  %5534 = vmatprep.subr.bf16.mxu1 %v7467_v57  ;;  %v7524_v50 = vld [vmem:[%s8451_s29 + $0xb7c] ss:$24 sps:$4 sm:$0xff]   ;;  %v7519_v57 = vld [vmem:[%s8451_s29 + $0x130] ss:$24 sps:$4 sm:$0xff]  }
 0x4c5   : > { %5680 = vmatprep.subr.bf16.mxu0 %v7470_v59  ;;  %v7522_v59 = vld [vmem:[%s8451_s29 + $0xb78] ss:$24 sps:$4 sm:$0xff]  }
 0x4c7   : > { %5535 = vmatpush1.bf16.msra.mxu1 %v7465_v60  ;;  %v7527_v60 = vld [vmem:[%s8451_s29 + $0x164] ss:$24 sps:$4 sm:$0xff]  }
 0x4c8   : > { %5681 = vmatpush1.bf16.msra.mxu0 %v7468_v62  ;;  %5536 = vmatprep.subr.bf16.mxu1 %v7473_v63  ;;  %v7525_v62 = vld [vmem:[%s8451_s29 + $0x160] ss:$24 sps:$4 sm:$0xff]  }
 0x4c9   : > { %5682 = vmatprep.subr.bf16.mxu0 %v7476_v3  ;;  %v7528_v63 = vld [vmem:[%s8451_s29 + $0xba8] ss:$24 sps:$4 sm:$0xff]   ;;  %v7536_v3 = vld [vmem:[%s8451_s29 + $0xbdc] ss:$24 sps:$4 sm:$0xff]  }
 0x4ca   : > { %v3026_v4 = vpop.f32.mrb[20].mxu0 }
 0x4cb   : > { %v6817_v14 = vadd.f32 %v3026_v4, %v1412_v6  ;;  %v3028_v15 = vpop.f32.mrb[21].mxu0  ;;  %5537 = vmatpush1.bf16.msra.mxu1 %v7471_v33  ;;  %v7531_v6 = vld [vmem:[%s8451_s29 + $0x190] ss:$24 sps:$4 sm:$0xff]   ;;  %v7545_v4 = vld [vmem:[%s8451_s29 + $0x224] ss:$24 sps:$4 sm:$0xff]  }
 0x4cc   : > { %v6818_v5 = vadd.f32 %v3028_v15, %v1416_v7  ;;  %v3030_v18 = vpop.f32.mrb[22].mxu0  ;;  %5683 = vmatpush1.bf16.msra.mxu0 %v7474_v8  ;;  %5538 = vmatprep.subr.bf16.mxu1 %v7479_v9  ;;  %v7534_v33 = vld [vmem:[%s8451_s29 + $0xbd8] ss:$24 sps:$4 sm:$0xff]   ;;  %v7539_v7 = vld [vmem:[%s8451_s29 + $0x1c4] ss:$24 sps:$4 sm:$0xff]  }
 0x4cd   : > { %v3039_v51 = vmax.f32 %v6817_v14, 0.0  ;;  %v3031_v20 = vpop.f32.mrb[23].mxu0  ;;  %5684 = vmatprep.subr.bf16.mxu0 %v7482_v13  ;;  %v7537_v8 = vld [vmem:[%s8451_s29 + $0x1c0] ss:$24 sps:$4 sm:$0xff]   ;;  %v7542_v9 = vld [vmem:[%s8451_s29 + $0x1f4] ss:$24 sps:$4 sm:$0xff]  }
 0x4ce   : > { %v3040_v22 = vmax.f32 %v6818_v5, 0.0  ;;  %v7540_v13 = vld [vmem:[%s8451_s29 + $0x1f0] ss:$24 sps:$4 sm:$0xff]   ;;  %v7543_v14 = vld [vmem:[%s8451_s29 + $0x220] ss:$24 sps:$4 sm:$0xff]  }
 0x4cf   : > { %5539 = vmatpush1.bf16.msra.mxu1 %v7477_v16  ;;  %v8829_v24 = vpack.c.bf16 %v3039_v51, %v3039_v51  ;;  %v7548_v15 = vld [vmem:[%s8451_s29 + $0x254] ss:$24 sps:$4 sm:$0xff]   ;;  %v7546_v16 = vld [vmem:[%s8451_s29 + $0x250] ss:$24 sps:$4 sm:$0xff]   ;;  %v7551_v5 = vld [vmem:[%s8451_s29 + $0x284] ss:$24 sps:$4 sm:$0xff]  }
 0x4d0   : > { %v8825_v11 = vpack.c.bf16 %v3040_v22, %v3040_v22  ;;  %5685 = vmatpush1.bf16.msra.mxu0 %v7480_v19  ;;  %5713 = vmatprep.subr.bf16.mxu1 %v7485_v27  ;;  %v7549_v18 = vld [vmem:[%s8451_s29 + $0x280] ss:$24 sps:$4 sm:$0xff]   ;;  %v7554_v19 = vld [vmem:[%s8451_s29 + $0x2b4] ss:$24 sps:$4 sm:$0xff]   ;;  %v7552_v27 = vld [vmem:[%s8451_s29 + $0x2b0] ss:$24 sps:$4 sm:$0xff]  }
 0x4d1   : > { %5686 = vmatprep.subr.bf16.mxu0 %v7488_v21  ;;  %v7557_v51 = vld [vmem:[%s8451_s29 + $0x2e4] ss:$24 sps:$4 sm:$0xff]   ;;  %v7555_v20 = vld [vmem:[%s8451_s29 + $0x2e0] ss:$24 sps:$4 sm:$0xff]   ;;  %v7560_v21 = vld [vmem:[%s8451_s29 + $0x314] ss:$24 sps:$4 sm:$0xff]  }
 0x4d2   : > { %5540 = vmatprep.mubr.bf16.mxu1 %v8825_v11  ;;  %5704 = vmatprep.mubr.bf16.mxu0 %v8825_v11  ;;  %v7558_v22 = vld [vmem:[%s8451_s29 + $0x310] ss:$24 sps:$4 sm:$0xff]  }
 0x4d3   : > { %5541 = vmatmul.mubr.bf16.vlgmr.msra.gmra.mrb[8].mxu1 %v8829_v24 }
 0x4d4   : > { %5714 = vmatpush1.bf16.msra.mxu1 %v7483_v12  ;;  %5687 = vmatpush1.bf16.msra.mxu0 %v7486_v17  ;;  %v7563_v12 = vld [vmem:[%s8451_s29 + $0x344] ss:$24 sps:$4 sm:$0xff]   ;;  %v7561_v17 = vld [vmem:[%s8451_s29 + $0x340] ss:$24 sps:$4 sm:$0xff]  }
 0x4d5   : > { %5745 = vmatprep.mubr.bf16.mxu1 %v8593_v35  ;;  %5715 = vmatprep.subr.bf16.mxu1 %v7491_v28  ;;  %v7501_v35 = vld [vmem:[%s8451_s29 + $0xa0] ss:$24 sps:$4 sm:$0xff]   ;;  %v7566_v28 = vld [vmem:[%s8451_s29 + $0x374] ss:$24 sps:$4 sm:$0xff]  }
 0x4d6   : > { %5688 = vmatprep.subr.bf16.mxu0 %v7494_v30  ;;  %v7564_v30 = vld [vmem:[%s8451_s29 + $0x370] ss:$24 sps:$4 sm:$0xff]  }
 0x4d8   : > { %5716 = vmatpush1.bf16.msra.mxu1 %v7489_v31  ;;  %5689 = vmatpush1.bf16.msra.mxu0 %v7492_v32  ;;  %v7569_v31 = vld [vmem:[%s8451_s29 + $0x3a4] ss:$24 sps:$4 sm:$0xff]   ;;  %v7567_v32 = vld [vmem:[%s8451_s29 + $0x3a0] ss:$24 sps:$4 sm:$0xff]  }
 0x4d9   : > { %5717 = vmatprep.subr.bf16.mxu1 %v7497_v34  ;;  %5690 = vmatprep.subr.bf16.mxu0 %v7500_v36  ;;  %v7570_v34 = vld [vmem:[%s8451_s29 + $0x3d0] ss:$24 sps:$4 sm:$0xff]   ;;  %v7573_v36 = vld [vmem:[%s8451_s29 + $0x400] ss:$24 sps:$4 sm:$0xff]  }
 0x4dc   : > { %5718 = vmatpush1.bf16.msra.mxu1 %v7495_v37  ;;  %5691 = vmatpush1.bf16.msra.mxu0 %v7498_v38  ;;  %v7578_v37 = vld [vmem:[%s8451_s29 + $0x434] ss:$24 sps:$4 sm:$0xff]   ;;  %v7576_v38 = vld [vmem:[%s8451_s29 + $0x430] ss:$24 sps:$4 sm:$0xff]  }
 0x4dd   : > { %5719 = vmatprep.subr.bf16.mxu1 %v7503_v39  ;;  %5692 = vmatprep.subr.bf16.mxu0 %v7506_v40  ;;  %v7581_v39 = vld [vmem:[%s8451_s29 + $0x464] ss:$24 sps:$4 sm:$0xff]   ;;  %v7579_v40 = vld [vmem:[%s8451_s29 + $0x460] ss:$24 sps:$4 sm:$0xff]  }
 0x4e0   : > { %5720 = vmatpush1.bf16.msra.mxu1 %v7501_v35  ;;  %5693 = vmatpush1.bf16.msra.mxu0 %v7504_v41  ;;  %v7584_v35 = vld [vmem:[%s8451_s29 + $0x494] ss:$24 sps:$4 sm:$0xff]   ;;  %v7582_v41 = vld [vmem:[%s8451_s29 + $0x490] ss:$24 sps:$4 sm:$0xff]  }
 0x4e1   : > { %5721 = vmatprep.subr.bf16.mxu1 %v7509_v42  ;;  %5694 = vmatprep.subr.bf16.mxu0 %v7512_v43  ;;  %v7587_v42 = vld [vmem:[%s8451_s29 + $0x4c4] ss:$24 sps:$4 sm:$0xff]   ;;  %v7585_v43 = vld [vmem:[%s8451_s29 + $0x4c0] ss:$24 sps:$4 sm:$0xff]  }
 0x4e4   : > { %5722 = vmatpush1.bf16.msra.mxu1 %v7507_v44  ;;  %5695 = vmatpush1.bf16.msra.mxu0 %v7510_v48  ;;  %v7590_v44 = vld [vmem:[%s8451_s29 + $0x4f4] ss:$24 sps:$4 sm:$0xff]   ;;  %v7588_v48 = vld [vmem:[%s8451_s29 + $0x4f0] ss:$24 sps:$4 sm:$0xff]  }
 0x4e5   : > { %5723 = vmatprep.subr.bf16.mxu1 %v7515_v49  ;;  %5696 = vmatprep.subr.bf16.mxu0 %v7518_v45  ;;  %v7593_v49 = vld [vmem:[%s8451_s29 + $0x524] ss:$24 sps:$4 sm:$0xff]   ;;  %v7591_v45 = vld [vmem:[%s8451_s29 + $0x520] ss:$24 sps:$4 sm:$0xff]  }
 0x4e8   : > { %5724 = vmatpush1.bf16.msra.mxu1 %v7513_v29  ;;  %5697 = vmatpush1.bf16.msra.mxu0 %v7516_v46  ;;  %v7596_v29 = vld [vmem:[%s8451_s29 + $0x554] ss:$24 sps:$4 sm:$0xff]   ;;  %v7594_v46 = vld [vmem:[%s8451_s29 + $0x550] ss:$24 sps:$4 sm:$0xff]  }
 0x4e9   : > { %5725 = vmatprep.subr.bf16.mxu1 %v7521_v47  ;;  %5698 = vmatprep.subr.bf16.mxu0 %v7524_v50  ;;  %v7599_v47 = vld [vmem:[%s8451_s29 + $0x584] ss:$24 sps:$4 sm:$0xff]   ;;  %v7597_v50 = vld [vmem:[%s8451_s29 + $0x580] ss:$24 sps:$4 sm:$0xff]  }
 0x4ec   : > { %5726 = vmatpush1.bf16.msra.mxu1 %v7519_v57  ;;  %5699 = vmatpush1.bf16.msra.mxu0 %v7522_v59  ;;  %v7602_v57 = vld [vmem:[%s8451_s29 + $0x5b4] ss:$24 sps:$4 sm:$0xff]   ;;  %v7600_v59 = vld [vmem:[%s8451_s29 + $0x5b0] ss:$24 sps:$4 sm:$0xff]  }
 0x4ed   : > { %5727 = vmatprep.subr.bf16.mxu1 %v7527_v60  ;;  %5700 = vmatprep.subr.bf16.mxu0 %v7530_v61  ;;  %v7605_v60 = vld [vmem:[%s8451_s29 + $0x5e4] ss:$24 sps:$4 sm:$0xff]   ;;  %v7603_v61 = vld [vmem:[%s8451_s29 + $0x5e0] ss:$24 sps:$4 sm:$0xff]  }
 0x4f0   : > { %5728 = vmatpush1.bf16.msra.mxu1 %v7525_v62  ;;  %5701 = vmatpush1.bf16.msra.mxu0 %v7528_v63  ;;  %v7608_v62 = vld [vmem:[%s8451_s29 + $0x614] ss:$24 sps:$4 sm:$0xff]   ;;  %v7606_v63 = vld [vmem:[%s8451_s29 + $0x610] ss:$24 sps:$4 sm:$0xff]  }
 0x4f1   : > { %5729 = vmatprep.subr.bf16.mxu1 %v7533_v1  ;;  %5702 = vmatprep.subr.bf16.mxu0 %v7536_v3  ;;  %v7611_v1 = vld [vmem:[%s8451_s29 + $0x644] ss:$24 sps:$4 sm:$0xff]   ;;  %v7609_v3 = vld [vmem:[%s8451_s29 + $0x640] ss:$24 sps:$4 sm:$0xff]  }
 0x4f4   : > { %5730 = vmatpush1.bf16.msra.mxu1 %v7531_v6  ;;  %5703 = vmatpush1.bf16.msra.mxu0 %v7534_v33  ;;  %v7614_v6 = vld [vmem:[%s8451_s29 + $0x674] ss:$24 sps:$4 sm:$0xff]   ;;  %v7612_v33 = vld [vmem:[%s8451_s29 + $0x670] ss:$24 sps:$4 sm:$0xff]  }
 0x4f5   : > { %5731 = vmatprep.subr.bf16.mxu1 %v7539_v7  ;;  %v7617_v7 = vld [vmem:[%s8451_s29 + $0x6a4] ss:$24 sps:$4 sm:$0xff]  }
 0x4f7   : > { %5705 = vmatmul.mubr.bf16.vlgmr.msra.gmra.mrb[24].mxu0 %v8829_v24 }
 0x4f8   : > { %5732 = vmatpush1.bf16.msra.mxu1 %v7537_v8  ;;  %v7615_v8 = vld [vmem:[%s8451_s29 + $0x6a0] ss:$24 sps:$4 sm:$0xff]  }
 0x4f9   : > { %5733 = vmatprep.subr.bf16.mxu1 %v7542_v9  ;;  %v7618_v9 = vld [vmem:[%s8451_s29 + $0x6d0] ss:$24 sps:$4 sm:$0xff]  }
 0x4fc   : > { %5734 = vmatpush1.bf16.msra.mxu1 %v7540_v13  ;;  %v7621_v13 = vld [vmem:[%s8451_s29 + $0x700] ss:$24 sps:$4 sm:$0xff]  }
 0x4fd   : > { %5735 = vmatprep.subr.bf16.mxu1 %v7545_v4  ;;  %v7626_v4 = vld [vmem:[%s8451_s29 + $0x734] ss:$24 sps:$4 sm:$0xff]  }
 0x500   : > { %5736 = vmatpush1.bf16.msra.mxu1 %v7543_v14  ;;  %v7624_v14 = vld [vmem:[%s8451_s29 + $0x730] ss:$24 sps:$4 sm:$0xff]  }
 0x501   : > { %5737 = vmatprep.subr.bf16.mxu1 %v7548_v15  ;;  %v7629_v15 = vld [vmem:[%s8451_s29 + $0x764] ss:$24 sps:$4 sm:$0xff]  }
 0x504   : > { %5738 = vmatpush1.bf16.msra.mxu1 %v7546_v16  ;;  %v7627_v16 = vld [vmem:[%s8451_s29 + $0x760] ss:$24 sps:$4 sm:$0xff]  }
 0x505   : > { %5739 = vmatprep.subr.bf16.mxu1 %v7551_v5  ;;  %v7632_v5 = vld [vmem:[%s8451_s29 + $0x794] ss:$24 sps:$4 sm:$0xff]  }
 0x508   : > { %5740 = vmatpush1.bf16.msra.mxu1 %v7549_v18  ;;  %v7630_v18 = vld [vmem:[%s8451_s29 + $0x790] ss:$24 sps:$4 sm:$0xff]  }
 0x509   : > { %5741 = vmatprep.subr.bf16.mxu1 %v7554_v19  ;;  %v7635_v19 = vld [vmem:[%s8451_s29 + $0x7c4] ss:$24 sps:$4 sm:$0xff]  }
 0x50c   : > { %5742 = vmatpush1.bf16.msra.mxu1 %v7552_v27  ;;  %v7633_v27 = vld [vmem:[%s8451_s29 + $0x7c0] ss:$24 sps:$4 sm:$0xff]  }
 0x50d   : > { %5743 = vmatprep.subr.bf16.mxu1 %v7557_v51  ;;  %v7638_v51 = vld [vmem:[%s8451_s29 + $0x7f4] ss:$24 sps:$4 sm:$0xff]  }
 0x510   : > { %5744 = vmatpush1.bf16.msra.mxu1 %v7555_v20  ;;  %v7636_v20 = vld [vmem:[%s8451_s29 + $0x7f0] ss:$24 sps:$4 sm:$0xff]  }
 0x511   : > { %5754 = vmatprep.subr.bf16.mxu1 %v7560_v21  ;;  %v7641_v21 = vld [vmem:[%s8451_s29 + $0x824] ss:$24 sps:$4 sm:$0xff]  }
 0x513   : > { %5746 = vmatmul.mubr.bf16.vlgmr.msra.gmra.mrb[12].mxu1 %v8596_v10  ;;  %v7572_v10 = vld [vmem:[%s8451_s29 + $0x3d4] ss:$24 sps:$4 sm:$0xff]  }
 0x514   : > { %5755 = vmatpush1.bf16.msra.mxu1 %v7558_v22  ;;  %5786 = vmatprep.mubr.bf16.mxu1 %v8669_v25  ;;  %v7575_v25 = vld [vmem:[%s8451_s29 + $0x404] ss:$24 sps:$4 sm:$0xff]   ;;  %v7639_v22 = vld [vmem:[%s8451_s29 + $0x820] ss:$24 sps:$4 sm:$0xff]  }
 0x515   : > { %5756 = vmatprep.subr.bf16.mxu1 %v7563_v12  ;;  %v7644_v12 = vld [vmem:[%s8451_s29 + $0x854] ss:$24 sps:$4 sm:$0xff]  }
 0x518   : > { %5757 = vmatpush1.bf16.msra.mxu1 %v7561_v17  ;;  %v7642_v17 = vld [vmem:[%s8451_s29 + $0x850] ss:$24 sps:$4 sm:$0xff]  }
 0x519   : > { %5758 = vmatprep.subr.bf16.mxu1 %v7566_v28  ;;  %v7647_v28 = vld [vmem:[%s8451_s29 + $0x884] ss:$24 sps:$4 sm:$0xff]  }
 0x51c   : > { %5759 = vmatpush1.bf16.msra.mxu1 %v7564_v30  ;;  %v7645_v30 = vld [vmem:[%s8451_s29 + $0x880] ss:$24 sps:$4 sm:$0xff]  }
 0x51d   : > { %5760 = vmatprep.subr.bf16.mxu1 %v7569_v31  ;;  %v7650_v31 = vld [vmem:[%s8451_s29 + $0x8b4] ss:$24 sps:$4 sm:$0xff]  }
 0x520   : > { %5761 = vmatpush1.bf16.msra.mxu1 %v7567_v32  ;;  %v7648_v32 = vld [vmem:[%s8451_s29 + $0x8b0] ss:$24 sps:$4 sm:$0xff]  }
 0x521   : > { %5762 = vmatprep.subr.bf16.mxu1 %v7572_v10  ;;  %v7653_v10 = vld [vmem:[%s8451_s29 + $0x8e4] ss:$24 sps:$4 sm:$0xff]  }
 0x524   : > { %5763 = vmatpush1.bf16.msra.mxu1 %v7570_v34  ;;  %v7651_v34 = vld [vmem:[%s8451_s29 + $0x8e0] ss:$24 sps:$4 sm:$0xff]  }
 0x525   : > { %5764 = vmatprep.subr.bf16.mxu1 %v7575_v25  ;;  %v7656_v25 = vld [vmem:[%s8451_s29 + $0x914] ss:$24 sps:$4 sm:$0xff]  }
 0x528   : > { %5765 = vmatpush1.bf16.msra.mxu1 %v7573_v36  ;;  %v7654_v36 = vld [vmem:[%s8451_s29 + $0x910] ss:$24 sps:$4 sm:$0xff]  }
 0x529   : > { %5766 = vmatprep.subr.bf16.mxu1 %v7578_v37  ;;  %v7659_v37 = vld [vmem:[%s8451_s29 + $0x944] ss:$24 sps:$4 sm:$0xff]  }
 0x52c   : > { %5767 = vmatpush1.bf16.msra.mxu1 %v7576_v38  ;;  %v7657_v38 = vld [vmem:[%s8451_s29 + $0x940] ss:$24 sps:$4 sm:$0xff]  }
 0x52d   : > { %5768 = vmatprep.subr.bf16.mxu1 %v7581_v39  ;;  %v7662_v39 = vld [vmem:[%s8451_s29 + $0x974] ss:$24 sps:$4 sm:$0xff]  }
 0x530   : > { %5769 = vmatpush1.bf16.msra.mxu1 %v7579_v40  ;;  %v7660_v40 = vld [vmem:[%s8451_s29 + $0x970] ss:$24 sps:$4 sm:$0xff]  }
 0x531   : > { %5770 = vmatprep.subr.bf16.mxu1 %v7584_v35  ;;  %v7665_v35 = vld [vmem:[%s8451_s29 + $0x9a4] ss:$24 sps:$4 sm:$0xff]  }
 0x534   : > { %5771 = vmatpush1.bf16.msra.mxu1 %v7582_v41  ;;  %v7663_v41 = vld [vmem:[%s8451_s29 + $0x9a0] ss:$24 sps:$4 sm:$0xff]  }
 0x535   : > { %5772 = vmatprep.subr.bf16.mxu1 %v7587_v42  ;;  %v7668_v42 = vld [vmem:[%s8451_s29 + $0x9d4] ss:$24 sps:$4 sm:$0xff]  }
 0x538   : > { %5773 = vmatpush1.bf16.msra.mxu1 %v7585_v43  ;;  %v7671_v43 = vld [vmem:[%s8451_s29 + $0xa04] ss:$24 sps:$4 sm:$0xff]  }
 0x539   : > { %5774 = vmatprep.subr.bf16.mxu1 %v7590_v44 }
 0x53c   : > { %5775 = vmatpush1.bf16.msra.mxu1 %v7588_v48  ;;  %v7669_v48 = vld [vmem:[%s8451_s29 + $0xa00] ss:$24 sps:$4 sm:$0xff]  }
 0x53d   : > { %5776 = vmatprep.subr.bf16.mxu1 %v7593_v49 }
 0x540   : > { %5777 = vmatpush1.bf16.msra.mxu1 %v7591_v45  ;;  %v7674_v45 = vld [vmem:[%s8451_s29 + $0xa34] ss:$24 sps:$4 sm:$0xff]  }
 0x541   : > { %5778 = vmatprep.subr.bf16.mxu1 %v7596_v29 }
 0x544   : > { %5779 = vmatpush1.bf16.msra.mxu1 %v7594_v46 }
 0x545   : > { %5780 = vmatprep.subr.bf16.mxu1 %v7599_v47 }
 0x548   : > { %5781 = vmatpush1.bf16.msra.mxu1 %v7597_v50 }
 0x549   : > { %5782 = vmatprep.subr.bf16.mxu1 %v7602_v57 }
 0x54c   : > { %5783 = vmatpush1.bf16.msra.mxu1 %v7600_v59 }
 0x54d   : > { %5784 = vmatprep.subr.bf16.mxu1 %v7605_v60  ;;  %v7677_v60 = vld [vmem:[%s8451_s29 + $0xa64] ss:$24 sps:$4 sm:$0xff]  }
 0x550   : > { %5785 = vmatpush1.bf16.msra.mxu1 %v7603_v61  ;;  %v7680_v61 = vld [vmem:[%s8451_s29 + $0xa94] ss:$24 sps:$4 sm:$0xff]  }
 0x551   : > { %5795 = vmatprep.subr.bf16.mxu1 %v7608_v62  ;;  %v7678_v62 = vld [vmem:[%s8451_s29 + $0xa90] ss:$24 sps:$4 sm:$0xff]  }
 0x553   : > { %5787 = vmatmul.mubr.bf16.vlgmr.msra.gmra.mrb[12].mxu1 %v8672_v26  ;;  %v7620_v26 = vld [vmem:[%s8451_s29 + $0x6d4] ss:$24 sps:$4 sm:$0xff]  }
 0x554   : > { %5796 = vmatpush1.bf16.msra.mxu1 %v7606_v63  ;;  %5827 = vmatprep.mubr.bf16.mxu1 %v8749_v56  ;;  %v7623_v56 = vld [vmem:[%s8451_s29 + $0x704] ss:$24 sps:$4 sm:$0xff]  }
 0x555   : > { %5797 = vmatprep.subr.bf16.mxu1 %v7611_v1  ;;  %v7683_v63 = vld [vmem:[%s8451_s29 + $0xac4] ss:$24 sps:$4 sm:$0xff]  }
 0x558   : > { %5798 = vmatpush1.bf16.msra.mxu1 %v7609_v3 }
 0x559   : > { %5799 = vmatprep.subr.bf16.mxu1 %v7614_v6  ;;  %v7681_v6 = vld [vmem:[%s8451_s29 + $0xac0] ss:$24 sps:$4 sm:$0xff]  }
 0x55c   : > { %5800 = vmatpush1.bf16.msra.mxu1 %v7612_v33  ;;  %v7686_v33 = vld [vmem:[%s8451_s29 + $0xaf4] ss:$24 sps:$4 sm:$0xff]  }
 0x55d   : > { %5801 = vmatprep.subr.bf16.mxu1 %v7617_v7  ;;  %v7684_v7 = vld [vmem:[%s8451_s29 + $0xaf0] ss:$24 sps:$4 sm:$0xff]  }
 0x560   : > { %5802 = vmatpush1.bf16.msra.mxu1 %v7615_v8  ;;  %v7689_v8 = vld [vmem:[%s8451_s29 + $0xb24] ss:$24 sps:$4 sm:$0xff]  }
 0x561   : > { %5803 = vmatprep.subr.bf16.mxu1 %v7620_v26  ;;  %v7687_v26 = vld [vmem:[%s8451_s29 + $0xb20] ss:$24 sps:$4 sm:$0xff]  }
 0x564   : > { %5804 = vmatpush1.bf16.msra.mxu1 %v7618_v9  ;;  %v7692_v9 = vld [vmem:[%s8451_s29 + $0xb54] ss:$24 sps:$4 sm:$0xff]  }
 0x565   : > { %5805 = vmatprep.subr.bf16.mxu1 %v7623_v56  ;;  %v7690_v56 = vld [vmem:[%s8451_s29 + $0xb50] ss:$24 sps:$4 sm:$0xff]  }
 0x568   : > { %5806 = vmatpush1.bf16.msra.mxu1 %v7621_v13  ;;  %v7695_v13 = vld [vmem:[%s8451_s29 + $0xb84] ss:$24 sps:$4 sm:$0xff]  }
 0x569   : > { %5807 = vmatprep.subr.bf16.mxu1 %v7626_v4  ;;  %v7693_v4 = vld [vmem:[%s8451_s29 + $0xb80] ss:$24 sps:$4 sm:$0xff]  }
 0x56c   : > { %5808 = vmatpush1.bf16.msra.mxu1 %v7624_v14  ;;  %v7698_v14 = vld [vmem:[%s8451_s29 + $0xbb4] ss:$24 sps:$4 sm:$0xff]  }
 0x56d   : > { %5809 = vmatprep.subr.bf16.mxu1 %v7629_v15 }
 0x570   : > { %5810 = vmatpush1.bf16.msra.mxu1 %v7627_v16  ;;  %v7696_v16 = vld [vmem:[%s8451_s29 + $0xbb0] ss:$24 sps:$4 sm:$0xff]  }
 0x571   : > { %5811 = vmatprep.subr.bf16.mxu1 %v7632_v5 }
 0x574   : > { %5812 = vmatpush1.bf16.msra.mxu1 %v7630_v18  ;;  %v7701_v18 = vld [vmem:[%s8451_s29 + $0xbe4] ss:$24 sps:$4 sm:$0xff]  }
 0x575   : > { %5813 = vmatprep.subr.bf16.mxu1 %v7635_v19 }
 0x578   : > { %5814 = vmatpush1.bf16.msra.mxu1 %v7633_v27 }
 0x579   : > { %5815 = vmatprep.subr.bf16.mxu1 %v7638_v51 }
 0x57c   : > { %5816 = vmatpush1.bf16.msra.mxu1 %v7636_v20 }
 0x57d   : > { %5817 = vmatprep.subr.bf16.mxu1 %v7641_v21 }
 0x580   : > { %5818 = vmatpush1.bf16.msra.mxu1 %v7639_v22  ;;  %v7699_v22 = vld [vmem:[%s8451_s29 + $0xbe0] ss:$24 sps:$4 sm:$0xff]  }
 0x581   : > { %5819 = vmatprep.subr.bf16.mxu1 %v7644_v12 }
 0x584   : > { %5820 = vmatpush1.bf16.msra.mxu1 %v7642_v17 }
 0x585   : > { %5821 = vmatprep.subr.bf16.mxu1 %v7647_v28 }
 0x588   : > { %5822 = vmatpush1.bf16.msra.mxu1 %v7645_v30 }
 0x589   : > { %5823 = vmatprep.subr.bf16.mxu1 %v7650_v31 }
 0x58c   : > { %5824 = vmatpush1.bf16.msra.mxu1 %v7648_v32 }
 0x58d   : > { %5825 = vmatprep.subr.bf16.mxu1 %v7653_v10 }
 0x590   : > { %5826 = vmatpush1.bf16.msra.mxu1 %v7651_v34 }
 0x591   : > { %5836 = vmatprep.subr.bf16.mxu1 %v7656_v25 }
 0x593   : > { %5828 = vmatmul.mubr.bf16.vlgmr.msra.gmra.mrb[12].mxu1 %v8752_v58  ;;  %v7666_v58 = vld [vmem:[%s8451_s29 + $0x9d0] ss:$24 sps:$4 sm:$0xff]  }
 0x594   : > { %5837 = vmatpush1.bf16.msra.mxu1 %v7654_v36  ;;  %5868 = vmatprep.mubr.bf16.mxu1 %v8825_v11  ;;  %v8963_v11 = vld [vmem:[%s440_s24] sm:$0x3f] }
 0x595   : > { %5838 = vmatprep.subr.bf16.mxu1 %v7659_v37  ;;  %v3438_v44 = vrot.slane %v8963_v11, %v8460_v53  ;;  %v3442_v49 = vrot.slane %v8963_v11, %v8463_v55  ;;  %v7672_v53 = vld [vmem:[%s8451_s29 + $0xa30] ss:$24 sps:$4 sm:$0xff]   ;;  %v7675_v55 = vld [vmem:[%s8451_s29 + $0xa60] ss:$24 sps:$4 sm:$0xff]   ;;  %v3446_v15 = vrot.slane %v8963_v11, %v8504_v0  ;;  %v3450_v5 = vrot.slane %v8963_v11, %v8507_v2 }
 0x596   : > { %v3454_v17 = vrot.slane %v8963_v11, %v1403_v23  ;;  %v3458_v28 = vrot.slane %v8963_v11, %v1407_v54 }
 0x598   : > { %5839 = vmatpush1.bf16.msra.mxu1 %v7657_v38 }
 0x599   : > { %5840 = vmatprep.subr.bf16.mxu1 %v7662_v39 }
 0x59c   : > { %5841 = vmatpush1.bf16.msra.mxu1 %v7660_v40 }
 0x59d   : > { %5842 = vmatprep.subr.bf16.mxu1 %v7665_v35 }
 0x5a0   : > { %5843 = vmatpush1.bf16.msra.mxu1 %v7663_v41 }
 0x5a1   : > { %5844 = vmatprep.subr.bf16.mxu1 %v7668_v42 }
 0x5a4   : > { %5845 = vmatpush1.bf16.msra.mxu1 %v7666_v58 }
 0x5a5   : > { %5846 = vmatprep.subr.bf16.mxu1 %v7671_v43 }
 0x5a6   : > { %v5542_v29 = vpop.f32.mrb[8].mxu1 }
 0x5a7   : > { %v6819_v46 = vadd.f32 %v5542_v29, %v3438_v44  ;;  %v5544_v47 = vpop.f32.mrb[9].mxu1 }
 0x5a8   : > { %v6820_v50 = vadd.f32 %v5544_v47, %v3442_v49  ;;  %5847 = vmatpush1.bf16.msra.mxu1 %v7669_v48  ;;  %v5546_v57 = vpop.f32.mrb[10].mxu1 }
 0x5a9   : > { %7702 = vtanh.f32 %v6819_v46  ;;  %v5547_v59 = vpop.f32.mrb[11].mxu1  ;;  %5848 = vmatprep.subr.bf16.mxu1 %v7674_v45 }
 0x5aa   : > { %7704 = vtanh.f32 %v6820_v50 }
 0x5ac   : > { %5849 = vmatpush1.bf16.msra.mxu1 %v7672_v53 }
 0x5ad   : > { %5850 = vmatprep.subr.bf16.mxu1 %v7677_v60 }
 0x5b0   : > { %5851 = vmatpush1.bf16.msra.mxu1 %v7675_v55 }
 0x5b1   : > { %5852 = vmatprep.subr.bf16.mxu1 %v7680_v61 }
 0x5b3   : > { %v7703_v1 = vpop.eup %7702 }
 0x5b4   : > { %v7705_v3 = vpop.eup %7704  ;;  %5853 = vmatpush1.bf16.msra.mxu1 %v7678_v62  ;;  %5883 = vst [vmem:[%s8980_s5] sm:$0xff] %v7703_v1 }
 0x5b5   : > { %5854 = vmatprep.subr.bf16.mxu1 %v7683_v63  ;;  %5884 = vst [vmem:[%s8980_s5 + $0x8] sm:$0xff] %v7705_v3 }
 0x5b8   : > { %5855 = vmatpush1.bf16.msra.mxu1 %v7681_v6 }
 0x5b9   : > { %5856 = vmatprep.subr.bf16.mxu1 %v7686_v33 }
 0x5bc   : > { %5857 = vmatpush1.bf16.msra.mxu1 %v7684_v7 }
 0x5bd   : > { %5858 = vmatprep.subr.bf16.mxu1 %v7689_v8 }
 0x5c0   : > { %5859 = vmatpush1.bf16.msra.mxu1 %v7687_v26 }
 0x5c1   : > { %5860 = vmatprep.subr.bf16.mxu1 %v7692_v9 }
 0x5c4   : > { %5861 = vmatpush1.bf16.msra.mxu1 %v7690_v56 }
 0x5c5   : > { %5862 = vmatprep.subr.bf16.mxu1 %v7695_v13 }
 0x5c8   : > { %5863 = vmatpush1.bf16.msra.mxu1 %v7693_v4 }
 0x5c9   : > { %5864 = vmatprep.subr.bf16.mxu1 %v7698_v14 }
 0x5ca   : > { %v5706_v19 = vpop.f32.mrb[24].mxu0 }
 0x5cb   : > { %v6821_v27 = vadd.f32 %v5706_v19, %v3446_v15  ;;  %v5708_v51 = vpop.f32.mrb[25].mxu0 }
 0x5cc   : > { %v6822_v20 = vadd.f32 %v5708_v51, %v3450_v5  ;;  %5865 = vmatpush1.bf16.msra.mxu1 %v7696_v16  ;;  %v5710_v21 = vpop.f32.mrb[26].mxu0 }
 0x5cd   : > { %7706 = vtanh.f32 %v6821_v27  ;;  %v5711_v12 = vpop.f32.mrb[27].mxu0  ;;  %5866 = vmatprep.subr.bf16.mxu1 %v7701_v18 }
 0x5ce   : > { %7708 = vtanh.f32 %v6822_v20 }
 0x5d0   : > { %5867 = vmatpush1.bf16.msra.mxu1 %v7699_v22 }
 0x5d3   : > { %5869 = vmatmul.mubr.bf16.vlgmr.msra.gmra.mrb[12].mxu1 %v8829_v24 }
 0x5d7   : > { %v7707_v0 = vpop.eup %7706 }
 0x5d8   : > { %v7709_v2 = vpop.eup %7708  ;;  %5885 = vst [vmem:[%s8980_s5 + $0x10] sm:$0xff] %v7707_v0 }
 0x5d9   : > { %5886 = vst [vmem:[%s8980_s5 + $0x18] sm:$0xff] %v7709_v2 }
 0x6a6   : > { %v5870_v30 = vpop.f32.mrb[12].mxu1 }
 0x6a7   : > { %v6823_v31 = vadd.f32 %v5870_v30, %v3454_v17  ;;  %v5872_v32 = vpop.f32.mrb[13].mxu1 }
 0x6a8   : > { %v6824_v24 = vadd.f32 %v5872_v32, %v3458_v28  ;;  %v5874_v10 = vpop.f32.mrb[14].mxu1 }
 0x6a9   : > { %7710 = vtanh.f32 %v6823_v31  ;;  %v5875_v34 = vpop.f32.mrb[15].mxu1 }
 0x6aa   : > { %7712 = vtanh.f32 %v6824_v24 }
 0x6b3   : > { %v7711_v25 = vpop.eup %7710 }
 0x6b4   : > { %v7713_v52 = vpop.eup %7712  ;;  %5887 = vst [vmem:[%s8980_s5 + $0x20] sm:$0xff] %v7711_v25 }
 0x6b5   : > { %5888 = vst [vmem:[%s8980_s5 + $0x28] sm:$0xff] %v7713_v52 }
 0x6b6   : > { %7983 = shalt.err (!%p7980_p12)
}
 0x6b7   : > { %s7984_s7 = scalar_lea.hbm %s9014_s26, 768  ;;  %s7988_s9 = scalar_lea.hbm %s9121_s3, 3072 }
 0x6b8   : > { %p7985_p0 = scmp.ne.s32.totalorder %s9014_s26, %s7984_s7  ;;  %p7989_p8 = scmp.lt.u32.totalorder %s9014_s26, %s9121_s3 }
 0x6b9   : > { %p7990_p4 = scmp.lt.u32.totalorder %s7988_s9, %s7984_s7  ;;  %p7992_p10 = scmp.lt.u32.totalorder %s7984_s7, %s9014_s26 }
 0x6ba   : > { %p7986_p2 = pnand %p7985_p0, %p9122_p5 }
 0x6bb   : > { %p7991_p7 = por %p7990_p4, %p7989_p8 }
 0x6bc   : > { %p7987_p6 = pneg %p7986_p2 }
 0x6bd   : > { %p7993_p3 = por %p7992_p10, %p7991_p7 }
 0x6bf   : > { %p7994_p13 = pnand %p7993_p3, %p7987_p6 }
 0x6c1   : > { %7997 = shalt.err (!%p7994_p13)
}
 0x6c2   : > { %6910 = dma.vmem_to_hbm [thread:$0]  (%p9122_p5), %s9016_s1, 768, %s9014_s26, %s5890_s18  }
 0x6c3 PF: > { %s9123_s21 = sld [smem:[#allocation24_spill]]  ;;  %s9124_s24 = sld [smem:[#allocation27_spill]] }
 0x6c4   : > { %p6960_p11 = scmp.ge.s32.totalorder %s8052_s12, 2 }
 0x6c9   : > { %s5916_s25 = sand.u32 1, %s9123_s21   ;;  %p9125_p9 = scmp.ne.s32.totalorder %s9124_s24, 0 }
 0x6ca   : > { %s5917_s5 = scalar_lea.sflag [#allocation4], %s5916_s25 }
 0x6cb   : > { %p6942_p1 = pnand %p6960_p11, %p9125_p9 }
 0x6cd   : > { %8035 = dma.done.wait (!%p6942_p1), %s5917_s5, 768  }
 0x6ce   : > { %8037 = vsyncadd (!%p6942_p1), %s5917_s5, 4294966528  ;;  %s9126_s12 = sld [smem:[#allocation25_spill]]  ;;  %s9127_s19 = sld [smem:[#allocation26_spill]] }
 0x6cf   : > { %s9128_s30 = smov %s8044_s10  ;;  %s9129_s10 = smov %s8048_s11 }
 0x6d4   : > { %p26_p12 = scmp.ge.s32.totalorder %s9126_s12, 6   ;;  %s9130_s11 = smov %s9127_s19 }
 0x6d6   :  { %28 = sbr.rel (!%p26_p12) target bundleno = 15 (0xf), region = 141 }
 0x6dd   :  { %5922 = vsyncpa [#allocation3], 1 }
 0x6de   :  { %5924 = vsyncpa [#allocation3 + $0x1], 1 }
 0x6df   :  { %5925 = vsyncpa [#allocation6], 1 }
 0x6e0   :  { %5926 = vsyncpa [#allocation9], 1 }
 0x6e1   :  { %5927 = vsyncpa [#allocation12], 1 }
 0x6e2   :  { %5928 = vsyncpa [#allocation15], 1 }
 0x6e3   :  { %5930 = vsyncpa [#allocation15 + $0x1], 1 }
 0x6e4   :  { %5931 = vsyncpa [#allocation4], 1 }
 0x6e5   :  { %5933 = vsyncpa [#allocation4 + $0x1], 1 }

</bundles_post_ra>
